<compile_context>
chip_gen: v7x
topology: tpu7x:2x2x1
jax: 0.10.0
libtpu: 0.0.40
codegen_flags: <defaults>
</compile_context>

<pallas_src>
import functools
import math

import jax
import jax.numpy as jnp
from jax.experimental import pallas as pl
from jax.experimental.pallas import tpu as pltpu

BN_EPS = 1e-5

_COMPILER_PARAMS = pltpu.CompilerParams(
    dimension_semantics=("parallel",),
    vmem_limit_bytes=32 * 1024 * 1024,
)

# ---------------------------------------------------------------------------
# Pallas kernels
# ---------------------------------------------------------------------------

def _stem_kernel(bT_ref, aT_ref, bias_ref, o_ref):
    """Transposed GEMM: out (Cout, M) = SiLU(Bt @ At + bias); lane-dense store."""
    acc = jnp.dot(bT_ref[...], aT_ref[...], preferred_element_type=jnp.float32)
    acc = acc + bias_ref[...]
    acc = acc * jax.nn.sigmoid(acc)                       # SiLU
    o_ref[...] = acc.astype(o_ref.dtype)


def _mbconv_kernel(*refs, H, W, Cexp, stride, has_expand, has_residual):
    """Fully fused MBConv block for one batch element.

    expand 1x1 (+BN,SiLU) -> 3x3 depthwise (+BN,SiLU) -> SE -> project 1x1
    (+BN) -> optional residual add.

    stride==1: one input ref holding all W columns of the (H*W, Cin) image.
    stride==2: two input refs holding the even / odd columns, so the stride-2
    column decimation needs only static, contiguous slices.
    """
    refs = list(refs)
    nxt = lambda: refs.pop(0)
    n_parts = 1 if stride == 1 else 2
    Wpart = W // n_parts
    Ho, Wo = H // stride, W // stride

    x_refs = [nxt() for _ in range(n_parts)]
    if has_expand:
        we_ref, be_ref = nxt(), nxt()
    wdw_ref, bdw_ref = nxt(), nxt()
    w1_ref, b1_ref, w2_ref, b2_ref = nxt(), nxt(), nxt(), nxt()
    wp_ref, bp_ref = nxt(), nxt()
    o_ref = nxt()
    h_refs = [nxt() for _ in range(n_parts)] if has_expand else x_refs
    pad_refs = [nxt() for _ in range(n_parts)]
    hdw_ref = nxt()
    assert not refs

    # 1) optional 1x1 expand conv (BN folded) + SiLU -> f32 VMEM scratch
    if has_expand:
        for xr, hr in zip(x_refs, h_refs):
            h = jnp.dot(xr[...], we_ref[...],
                        preferred_element_type=jnp.float32) + be_ref[...]
            hr[...] = h * jax.nn.sigmoid(h)

    # 2) stage into zero-padded spatial scratch(es) (no HBM im2col blow-up)
    for pr in pad_refs:
        pr[...] = jnp.zeros(pr.shape, dtype=pr.dtype)
    if stride == 1:
        # pad_refs[0] holds padded columns 0..W+1 (interior = 1..W)
        for i in range(H):
            pad_refs[0][i + 1, 1:W + 1, :] = (
                h_refs[0][i * W:(i + 1) * W, :].astype(jnp.float32))
    else:
        # even padded cols {0,2,..,W}   = [left pad] + odd  original columns
        # odd  padded cols {1,3,..,W-1} =              even original columns
        for i in range(H):
            pad_refs[0][i + 1, 1:Wpart + 1, :] = (
                h_refs[1][i * Wpart:(i + 1) * Wpart, :].astype(jnp.float32))
            pad_refs[1][i + 1, 0:Wpart, :] = (
                h_refs[0][i * Wpart:(i + 1) * Wpart, :].astype(jnp.float32))

    # 3) 3x3 depthwise conv (BN folded) + SiLU, unrolled over output rows/taps
    bdw = bdw_ref[...]
    for oi in range(Ho):
        acc = jnp.zeros((Wo, Cexp), jnp.float32)
        for di in range(3):
            r = stride * oi + di
            for dj in range(3):
                w_t = wdw_ref[3 * di + dj]                # (1, Cexp)
                if stride == 1:
                    tap = pad_refs[0][r, dj:dj + Wo, :]
                elif dj == 0:
                    tap = pad_refs[0][r, 0:Wo, :]         # even padded cols
                elif dj == 1:
                    tap = pad_refs[1][r, 0:Wo, :]         # odd padded cols
                else:
                    tap = pad_refs[0][r, 1:Wo + 1, :]
                acc = acc + tap * w_t
        acc = acc + bdw
        hdw_ref[oi * Wo:(oi + 1) * Wo, :] = acc * jax.nn.sigmoid(acc)

    # 4) squeeze-excitation (global average pool + two tiny FCs + scale)
    hdw = hdw_ref[...]
    pooled = jnp.mean(hdw, axis=0, keepdims=True)         # (1, Cexp)
    s = jnp.dot(pooled, w1_ref[...],
                preferred_element_type=jnp.float32) + b1_ref[...]
    s = s * jax.nn.sigmoid(s)
    s = jnp.dot(s, w2_ref[...],
                preferred_element_type=jnp.float32) + b2_ref[...]
    s = jax.nn.sigmoid(s)
    hs = hdw * s

    # 5) 1x1 projection (BN folded, no activation) + optional residual
    y = jnp.dot(hs.astype(jnp.bfloat16), wp_ref[...],
                preferred_element_type=jnp.float32) + bp_ref[...]
    if has_residual:
        # TODO(synk): StochasticDepth is random in train mode; eval identity.
        y = y + x_refs[0][...].astype(jnp.float32)
    o_ref[...] = y.astype(o_ref.dtype)


def _head_kernel(x_ref, wh_ref, bh_ref, wfc_ref, bfc_ref, o_ref):
    """Fused head: 1x1 conv (+BN,SiLU) + global avg pool + linear classifier."""
    h = jnp.dot(x_ref[...], wh_ref[...],
                preferred_element_type=jnp.float32) + bh_ref[...]
    h = h * jax.nn.sigmoid(h)
    pooled = jnp.mean(h, axis=0, keepdims=True)           # (1, Chead)
    # TODO(synk): Dropout is eval-mode identity.
    y = jnp.dot(pooled.astype(jnp.bfloat16), wfc_ref[...],
                preferred_element_type=jnp.float32) + bfc_ref[...]
    o_ref[...] = y


# ---------------------------------------------------------------------------
# BN folding & layer wrappers
# ---------------------------------------------------------------------------

def fold_bn(w, bn):
    """Fold eval-mode BatchNorm into a conv weight (PyTorch Cout,Cin,Kh,Kw)."""
    gamma, beta, mean, var, eps = bn
    scale = gamma / jnp.sqrt(var + eps)
    return w * scale.reshape(-1, 1, 1, 1), beta - mean * scale


def stem_conv_bn_silu(x_nhwc, w, bn):
    """3x3 stride-2 conv + BN + SiLU via a single lane-dense transposed GEMM."""
    w_f, b_f = fold_bn(w, bn)
    Cout, Cin, KH, KW = w_f.shape
    N, H, W, _ = x_nhwc.shape
    xp = jnp.pad(x_nhwc, ((0, 0), (1, 1), (1, 1), (0, 0)))
    Ho = (H + 2 - KH) // 2 + 1
    Wo = (W + 2 - KW) // 2 + 1
    cols = []
    for i in range(KH):
        for j in range(KW):
            cols.append(xp[:, i:i + 2 * (Ho - 1) + 1:2,
                           j:j + 2 * (Wo - 1) + 1:2, :])
    patches = jnp.stack(cols, axis=3)                     # (N, Ho, Wo, KK, Cin)
    M = N * Ho * Wo
    K = KH * KW * Cin
    aT = patches.reshape(M, K).T.astype(jnp.bfloat16)     # (K, M), M on lanes
    bT = jnp.transpose(w_f, (0, 2, 3, 1)).reshape(Cout, K).astype(jnp.bfloat16)
    bias = b_f.reshape(Cout, 1)

    out_t = pl.pallas_call(
        _stem_kernel,
        out_shape=jax.ShapeDtypeStruct((Cout, M), jnp.bfloat16),
        grid=(1,),
        in_specs=[pl.BlockSpec((Cout, K), lambda i: (0, 0)),
                  pl.BlockSpec((K, M), lambda i: (0, 0)),
                  pl.BlockSpec((Cout, 1), lambda i: (0, 0))],
        out_specs=pl.BlockSpec((Cout, M), lambda i: (0, 0)),
        compiler_params=_COMPILER_PARAMS,
    )(bT, aT, bias)
    # (Cout, M) -> (N, Ho*Wo, Cout) bf16 for the block kernels.
    return out_t.T.reshape(N, Ho * Wo, Cout), Ho, Wo


def mbconv_block(x_flat, blk, N, H, W):
    """One fused MBConv block.  x_flat: (N, H*W, Cin) bf16."""
    Cin, Cout, stride, k = blk["in"], blk["out"], blk["stride"], blk["kernel"]
    assert k == 3 and stride in (1, 2)
    Cexp = blk["dw_w"].shape[0]
    Csq = blk["se_w1"].shape[0]
    has_expand = "expand_w" in blk
    has_residual = (stride == 1 and Cin == Cout)
    Ho, Wo = H // stride, W // stride
    n_parts = 1 if stride == 1 else 2
    Wpart = W // n_parts

    # BN-folded / reshaped parameters (MXU weight operands cast to bf16).
    wdw_f, bdw_f = fold_bn(blk["dw_w"], blk["dw_bn"])
    wdw = jnp.transpose(wdw_f.reshape(Cexp, 9), (1, 0)).reshape(9, 1, Cexp)
    bdw = bdw_f.reshape(1, Cexp)
    wp_f, bp_f = fold_bn(blk["proj_w"], blk["proj_bn"])
    wp = jnp.transpose(wp_f.reshape(Cout, Cexp), (1, 0)).astype(jnp.bfloat16)
    bp = bp_f.reshape(1, Cout)
    w1 = jnp.transpose(blk["se_w1"].reshape(Csq, Cexp), (1, 0))   # (Cexp, Csq)
    b1 = blk["se_b1"].reshape(1, Csq)
    w2 = jnp.transpose(blk["se_w2"].reshape(Cexp, Csq), (1, 0))   # (Csq, Cexp)
    b2 = blk["se_b2"].reshape(1, Cexp)

    inputs, in_specs = [], []
    if stride == 1:
        inputs.append(x_flat)
        in_specs.append(pl.BlockSpec((None, H * W, Cin), lambda n: (n, 0, 0)))
    else:
        assert W % 2 == 0
        x4 = x_flat.reshape(N, H, W, Cin)
        x_ev = x4[:, :, 0::2, :].reshape(N, H * Wpart, Cin)
        x_od = x4[:, :, 1::2, :].reshape(N, H * Wpart, Cin)
        inputs += [x_ev, x_od]
        in_specs += [pl.BlockSpec((None, H * Wpart, Cin), lambda n: (n, 0, 0)),
                     pl.BlockSpec((None, H * Wpart, Cin), lambda n: (n, 0, 0))]
    if has_expand:
        we_f, be_f = fold_bn(blk["expand_w"], blk["expand_bn"])
        we = jnp.transpose(we_f.reshape(Cexp, Cin), (1, 0)).astype(jnp.bfloat16)
        be = be_f.reshape(1, Cexp)
        inputs += [we, be]
        in_specs += [pl.BlockSpec(we.shape, lambda n: (0, 0)),
                     pl.BlockSpec(be.shape, lambda n: (0, 0))]
    inputs += [wdw, bdw, w1, b1, w2, b2, wp, bp]
    in_specs += [pl.BlockSpec(wdw.shape, lambda n: (0, 0, 0))]
    in_specs += [pl.BlockSpec(t.shape, lambda n: (0, 0))
                 for t in (bdw, w1, b1, w2, b2, wp, bp)]

    scratch = []
    if has_expand:
        scratch += [pltpu.VMEM((H * Wpart, Cexp), jnp.float32)
                    for _ in range(n_parts)]
    if stride == 1:
        scratch.append(pltpu.VMEM((H + 2, W + 2, Cexp), jnp.float32))
    else:
        scratch.append(pltpu.VMEM((H + 2, Wpart + 1, Cexp), jnp.float32))
        scratch.append(pltpu.VMEM((H + 2, Wpart, Cexp), jnp.float32))
    scratch.append(pltpu.VMEM((Ho * Wo, Cexp), jnp.float32))

    kernel = functools.partial(
        _mbconv_kernel, H=H, W=W, Cexp=Cexp, stride=stride,
        has_expand=has_expand, has_residual=has_residual)
    out = pl.pallas_call(
        kernel,
        out_shape=jax.ShapeDtypeStruct((N, Ho * Wo, Cout), jnp.bfloat16),
        grid=(N,),
        in_specs=in_specs,
        out_specs=pl.BlockSpec((None, Ho * Wo, Cout), lambda n: (n, 0, 0)),
        scratch_shapes=scratch,
        compiler_params=_COMPILER_PARAMS,
    )(*inputs)
    return out, Ho, Wo


def head_and_classifier(x_flat, params, N, H, W):
    """Fused head 1x1 conv + BN + SiLU + AdaptiveAvgPool(1) + Linear."""
    Cin = x_flat.shape[-1]
    wh_f, bh_f = fold_bn(params["head_w"], params["head_bn"])
    Chead = wh_f.shape[0]
    wh = jnp.transpose(wh_f.reshape(Chead, Cin), (1, 0)).astype(jnp.bfloat16)
    bh = bh_f.reshape(1, Chead)
    wfc = params["fc_w"].T.astype(jnp.bfloat16)           # (Chead, classes)
    bfc = params["fc_b"].reshape(1, -1)
    nc = wfc.shape[1]
    out = pl.pallas_call(
        _head_kernel,
        out_shape=jax.ShapeDtypeStruct((N, 1, nc), jnp.float32),
        grid=(N,),
        in_specs=[pl.BlockSpec((None, H * W, Cin), lambda n: (n, 0, 0)),
                  pl.BlockSpec(wh.shape, lambda n: (0, 0)),
                  pl.BlockSpec(bh.shape, lambda n: (0, 0)),
                  pl.BlockSpec(wfc.shape, lambda n: (0, 0)),
                  pl.BlockSpec(bfc.shape, lambda n: (0, 0))],
        out_specs=pl.BlockSpec((None, 1, nc), lambda n: (n, 0, 0)),
        compiler_params=_COMPILER_PARAMS,
    )(x_flat, wh, bh, wfc, bfc)
    return out.reshape(N, nc)


# ---------------------------------------------------------------------------
# Model definition (synthetic small MBConv setting) and parameter init
# ---------------------------------------------------------------------------

# (expand_ratio, kernel, stride, input_channels, out_channels, num_layers)
SETTINGS = [
    (1, 3, 1, 8, 8, 1),
    (4, 3, 2, 8, 16, 1),
]
INPUT_CHANNELS = 4
NUM_CLASSES = 10


def _make_divisible(v, divisor=8):
    new_v = max(divisor, int(v + divisor / 2) // divisor * divisor)
    if new_v < 0.9 * v:
        new_v += divisor
    return new_v


def _bn(c):
    # (gamma, beta, running_mean, running_var, eps) at PyTorch init values
    return (jnp.ones((c,), jnp.float32), jnp.zeros((c,), jnp.float32),
            jnp.zeros((c,), jnp.float32), jnp.ones((c,), jnp.float32), BN_EPS)


def _kaiming_conv(key, cout, cin, kh, kw, groups=1):
    fan_out = cout * kh * kw // groups
    std = math.sqrt(2.0 / fan_out)
    return std * jax.random.normal(key, (cout, cin, kh, kw), jnp.float32)


def init_params(key):
    keys = iter(jax.random.split(key, 64))
    params = {}
    stem_out = SETTINGS[0][3]
    params["stem_w"] = _kaiming_conv(next(keys), stem_out, INPUT_CHANNELS, 3, 3)
    params["stem_bn"] = _bn(stem_out)
    blocks = []
    for (expand, k, stride, cin, cout, num_layers) in SETTINGS:
        for li in range(num_layers):
            in_ch = cin if li == 0 else cout
            st = stride if li == 0 else 1
            exp_ch = _make_divisible(in_ch * expand)
            sq_ch = max(1, in_ch // 4)
            blk = {"stride": st, "kernel": k, "in": in_ch, "out": cout}
            if exp_ch != in_ch:
                blk["expand_w"] = _kaiming_conv(next(keys), exp_ch, in_ch, 1, 1)
                blk["expand_bn"] = _bn(exp_ch)
            blk["dw_w"] = _kaiming_conv(next(keys), exp_ch, 1, k, k, groups=exp_ch)
            blk["dw_bn"] = _bn(exp_ch)
            blk["se_w1"] = _kaiming_conv(next(keys), sq_ch, exp_ch, 1, 1)
            blk["se_b1"] = jnp.zeros((sq_ch,), jnp.float32)
            blk["se_w2"] = _kaiming_conv(next(keys), exp_ch, sq_ch, 1, 1)
            blk["se_b2"] = jnp.zeros((exp_ch,), jnp.float32)
            blk["proj_w"] = _kaiming_conv(next(keys), cout, exp_ch, 1, 1)
            blk["proj_bn"] = _bn(cout)
            blocks.append(blk)
    params["blocks"] = blocks
    last_in = SETTINGS[-1][4]
    last_out = 4 * last_in                      # last_channel = None -> 4 * C
    params["head_w"] = _kaiming_conv(next(keys), last_out, last_in, 1, 1)
    params["head_bn"] = _bn(last_out)
    r = 1.0 / math.sqrt(NUM_CLASSES)
    params["fc_w"] = jax.random.uniform(next(keys), (NUM_CLASSES, last_out),
                                        jnp.float32, -r, r)
    params["fc_b"] = jnp.zeros((NUM_CLASSES,), jnp.float32)
    return params


def efficientnet_forward(params, x_nchw):
    # layout: PyTorch NCHW in -> channels-last (flattened spatial) internally
    x = jnp.transpose(x_nchw, (0, 2, 3, 1)).astype(jnp.float32)
    N = x.shape[0]

    # stem: Conv 3x3 stride 2 + BN + SiLU (one lane-dense GEMM kernel)
    x, H, W = stem_conv_bn_silu(x, params["stem_w"], params["stem_bn"])

    # MBConv blocks: one fused Pallas kernel per block
    for blk in params["blocks"]:
        x, H, W = mbconv_block(x, blk, N, H, W)

    # head conv + BN + SiLU + AdaptiveAvgPool2d(1) + Dropout(eval) + Linear
    return head_and_classifier(x, params, N, H, W)


if __name__ == "__main__":
    key = jax.random.PRNGKey(0)
    pkey, xkey = jax.random.split(key)
    params = init_params(pkey)
    x = jax.random.normal(xkey, (2, INPUT_CHANNELS, 16, 16), jnp.float32)

    fwd = jax.jit(functools.partial(efficientnet_forward, params))
    out = fwd(x)
    jax.block_until_ready(out)
    assert out.shape == (2, NUM_CLASSES), out.shape
    assert bool(jnp.all(jnp.isfinite(out)))
    print("KERNEL_OK")
</pallas_src>

<mosaic_0001>
module attributes {stable_mosaic.version = 11 : i64} {
  func.func @_stem_kernel(%arg0: i32, %arg1: memref<8x36xbf16, #tpu.memory_space<vmem>>, %arg2: memref<36x128xbf16, #tpu.memory_space<vmem>>, %arg3: memref<8x1xf32, #tpu.memory_space<vmem>>, %arg4: memref<8x128xbf16, #tpu.memory_space<vmem>>) attributes {dimension_semantics = [#tpu.dimension_semantics<parallel>], iteration_bounds = array<i64: 1>, scalar_prefetch = 0 : i64, scratch_operands = 0 : i64, tpu.core_type = #tpu.core_type<tc>, window_params = [{pipeline_mode = #tpu.pipeline_mode<synchronous>, transform_indices = @transform_0, window_bounds = array<i64: 8, 36>}, {pipeline_mode = #tpu.pipeline_mode<synchronous>, transform_indices = @transform_1, window_bounds = array<i64: 36, 128>}, {pipeline_mode = #tpu.pipeline_mode<synchronous>, transform_indices = @transform_2, window_bounds = array<i64: 8, 1>}, {pipeline_mode = #tpu.pipeline_mode<synchronous>, transform_indices = @transform_3, window_bounds = array<i64: 8, 128>}]} {
    %c0 = arith.constant 0 : index
    %c0_0 = arith.constant 0 : index
    %0 = vector.load %arg1[%c0, %c0_0] : memref<8x36xbf16, #tpu.memory_space<vmem>>, vector<8x36xbf16>
    %c0_1 = arith.constant 0 : index
    %c0_2 = arith.constant 0 : index
    %1 = vector.load %arg2[%c0_1, %c0_2] : memref<36x128xbf16, #tpu.memory_space<vmem>>, vector<36x128xbf16>
    %cst = arith.constant dense<0.000000e+00> : vector<8x128xf32>
    %2 = tpu.matmul %0, %1, %cst {dimension_numbers = #tpu.dot_dimension_numbers<[1], [0], [0], [1], [0, 0, 1, 1], [], []>} : vector<8x36xbf16>, vector<36x128xbf16>, vector<8x128xf32> -> vector<8x128xf32>
    %c0_3 = arith.constant 0 : index
    %c0_4 = arith.constant 0 : index
    %3 = vector.load %arg3[%c0_3, %c0_4] : memref<8x1xf32, #tpu.memory_space<vmem>>, vector<8x1xf32>
    %4 = vector.broadcast %3 : vector<8x1xf32> to vector<8x128xf32>
    %5 = arith.addf %2, %4 : vector<8x128xf32>
    %6 = arith.negf %5 : vector<8x128xf32>
    %7 = math.exp %6 : vector<8x128xf32>
    %cst_5 = arith.constant 1.000000e+00 : f32
    %8 = vector.broadcast %cst_5 : f32 to vector<8x128xf32>
    %9 = arith.addf %8, %7 : vector<8x128xf32>
    %10 = arith.divf %8, %9 : vector<8x128xf32>
    %11 = arith.mulf %5, %10 : vector<8x128xf32>
    %12 = arith.truncf %11 : vector<8x128xf32> to vector<8x128xbf16>
    %c0_6 = arith.constant 0 : index
    %c0_7 = arith.constant 0 : index
    %13 = vector.load %arg4[%c0_6, %c0_7] : memref<8x128xbf16, #tpu.memory_space<vmem>>, vector<8x128xbf16>
    tpu.vector_store %arg4[%c0_6, %c0_7], %12 {strides = array<i32>} : memref<8x128xbf16, #tpu.memory_space<vmem>>, vector<8x128xbf16>,
    return
  }
  func.func @transform_0(%arg0: i32) -> (i32, i32) {
    %c0_i32 = arith.constant 0 : i32
    %c0_i32_0 = arith.constant 0 : i32
    %c0_i32_1 = arith.constant 0 : i32
    return %c0_i32, %c0_i32_0 : i32, i32
  }
  func.func @transform_1(%arg0: i32) -> (i32, i32) {
    %c0_i32 = arith.constant 0 : i32
    %c0_i32_0 = arith.constant 0 : i32
    %c0_i32_1 = arith.constant 0 : i32
    return %c0_i32, %c0_i32_0 : i32, i32
  }
  func.func @transform_2(%arg0: i32) -> (i32, i32) {
    %c0_i32 = arith.constant 0 : i32
    %c0_i32_0 = arith.constant 0 : i32
    %c0_i32_1 = arith.constant 0 : i32
    return %c0_i32, %c0_i32_0 : i32, i32
  }
  func.func @transform_3(%arg0: i32) -> (i32, i32) {
    %c0_i32 = arith.constant 0 : i32
    %c0_i32_0 = arith.constant 0 : i32
    %c0_i32_1 = arith.constant 0 : i32
    return %c0_i32, %c0_i32_0 : i32, i32
  }
}

module attributes {stable_mosaic.version = 11 : i64} {
  func.func @_mbconv_kernel(%arg0: i32, %arg1: memref<1x64x8xbf16, #tpu.memory_space<vmem>>, %arg2: memref<9x1x8xf32, #tpu.memory_space<vmem>>, %arg3: memref<1x8xf32, #tpu.memory_space<vmem>>, %arg4: memref<8x2xf32, #tpu.memory_space<vmem>>, %arg5: memref<1x2xf32, #tpu.memory_space<vmem>>, %arg6: memref<2x8xf32, #tpu.memory_space<vmem>>, %arg7: memref<1x8xf32, #tpu.memory_space<vmem>>, %arg8: memref<8x8xbf16, #tpu.memory_space<vmem>>, %arg9: memref<1x8xf32, #tpu.memory_space<vmem>>, %arg10: memref<1x64x8xbf16, #tpu.memory_space<vmem>>, %arg11: memref<10x10x8xf32, #tpu.memory_space<vmem>>, %arg12: memref<64x8xf32, #tpu.memory_space<vmem>>) attributes {dimension_semantics = [#tpu.dimension_semantics<parallel>], iteration_bounds = array<i64: 2>, scalar_prefetch = 0 : i64, scratch_operands = 2 : i64, tpu.core_type = #tpu.core_type<tc>, window_params = [{transform_indices = @transform_0, window_bounds = array<i64: 1, 64, 8>}, {pipeline_mode = #tpu.pipeline_mode<synchronous>, transform_indices = @transform_1, window_bounds = array<i64: 9, 1, 8>}, {pipeline_mode = #tpu.pipeline_mode<synchronous>, transform_indices = @transform_2, window_bounds = array<i64: 1, 8>}, {pipeline_mode = #tpu.pipeline_mode<synchronous>, transform_indices = @transform_3, window_bounds = array<i64: 8, 2>}, {pipeline_mode = #tpu.pipeline_mode<synchronous>, transform_indices = @transform_4, window_bounds = array<i64: 1, 2>}, {pipeline_mode = #tpu.pipeline_mode<synchronous>, transform_indices = @transform_5, window_bounds = array<i64: 2, 8>}, {pipeline_mode = #tpu.pipeline_mode<synchronous>, transform_indices = @transform_6, window_bounds = array<i64: 1, 8>}, {pipeline_mode = #tpu.pipeline_mode<synchronous>, transform_indices = @transform_7, window_bounds = array<i64: 8, 8>}, {pipeline_mode = #tpu.pipeline_mode<synchronous>, transform_indices = @transform_8, window_bounds = array<i64: 1, 8>}, {transform_indices = @transform_9, window_bounds = array<i64: 1, 64, 8>}]} {
    %cst = arith.constant 0.000000e+00 : f32
    %0 = vector.broadcast %cst : f32 to vector<10x10x8xf32>
    %c0 = arith.constant 0 : index
    %c0_0 = arith.constant 0 : index
    %c0_1 = arith.constant 0 : index
    %1 = vector.load %arg11[%c0, %c0_0, %c0_1] : memref<10x10x8xf32, #tpu.memory_space<vmem>>, vector<10x10x8xf32>
    tpu.vector_store %arg11[%c0, %c0_0, %c0_1], %0 {strides = array<i32>} : memref<10x10x8xf32, #tpu.memory_space<vmem>>, vector<10x10x8xf32>,
    %c0_2 = arith.constant 0 : index
    %c0_3 = arith.constant 0 : index
    %c0_4 = arith.constant 0 : index
    %2 = vector.load %arg1[%c0_2, %c0_3, %c0_4] : memref<1x64x8xbf16, #tpu.memory_space<vmem>>, vector<1x8x8xbf16>
    %3 = vector.shape_cast %2 : vector<1x8x8xbf16> to vector<8x8xbf16>
    %4 = arith.extf %3 : vector<8x8xbf16> to vector<8x8xf32>
    %c1 = arith.constant 1 : index
    %c1_5 = arith.constant 1 : index
    %c0_6 = arith.constant 0 : index
    %5 = vector.load %arg11[%c1, %c1_5, %c0_6] : memref<10x10x8xf32, #tpu.memory_space<vmem>>, vector<1x8x8xf32>
    %6 = vector.shape_cast %5 : vector<1x8x8xf32> to vector<8x8xf32>
    %7 = vector.shape_cast %4 : vector<8x8xf32> to vector<1x8x8xf32>
    tpu.vector_store %arg11[%c1, %c1_5, %c0_6], %7 {strides = array<i32>} : memref<10x10x8xf32, #tpu.memory_space<vmem>>, vector<1x8x8xf32>,
    %c0_7 = arith.constant 0 : index
    %c8 = arith.constant 8 : index
    %c0_8 = arith.constant 0 : index
    %8 = vector.load %arg1[%c0_7, %c8, %c0_8] : memref<1x64x8xbf16, #tpu.memory_space<vmem>>, vector<1x8x8xbf16>
    %9 = vector.shape_cast %8 : vector<1x8x8xbf16> to vector<8x8xbf16>
    %10 = arith.extf %9 : vector<8x8xbf16> to vector<8x8xf32>
    %c2 = arith.constant 2 : index
    %c1_9 = arith.constant 1 : index
    %c0_10 = arith.constant 0 : index
    %11 = vector.load %arg11[%c2, %c1_9, %c0_10] : memref<10x10x8xf32, #tpu.memory_space<vmem>>, vector<1x8x8xf32>
    %12 = vector.shape_cast %11 : vector<1x8x8xf32> to vector<8x8xf32>
    %13 = vector.shape_cast %10 : vector<8x8xf32> to vector<1x8x8xf32>
    tpu.vector_store %arg11[%c2, %c1_9, %c0_10], %13 {strides = array<i32>} : memref<10x10x8xf32, #tpu.memory_space<vmem>>, vector<1x8x8xf32>,
    %c0_11 = arith.constant 0 : index
    %c16 = arith.constant 16 : index
    %c0_12 = arith.constant 0 : index
    %14 = vector.load %arg1[%c0_11, %c16, %c0_12] : memref<1x64x8xbf16, #tpu.memory_space<vmem>>, vector<1x8x8xbf16>
    %15 = vector.shape_cast %14 : vector<1x8x8xbf16> to vector<8x8xbf16>
    %16 = arith.extf %15 : vector<8x8xbf16> to vector<8x8xf32>
    %c3 = arith.constant 3 : index
    %c1_13 = arith.constant 1 : index
    %c0_14 = arith.constant 0 : index
    %17 = vector.load %arg11[%c3, %c1_13, %c0_14] : memref<10x10x8xf32, #tpu.memory_space<vmem>>, vector<1x8x8xf32>
    %18 = vector.shape_cast %17 : vector<1x8x8xf32> to vector<8x8xf32>
    %19 = vector.shape_cast %16 : vector<8x8xf32> to vector<1x8x8xf32>
    tpu.vector_store %arg11[%c3, %c1_13, %c0_14], %19 {strides = array<i32>} : memref<10x10x8xf32, #tpu.memory_space<vmem>>, vector<1x8x8xf32>,
    %c0_15 = arith.constant 0 : index
    %c24 = arith.constant 24 : index
    %c0_16 = arith.constant 0 : index
    %20 = vector.load %arg1[%c0_15, %c24, %c0_16] : memref<1x64x8xbf16, #tpu.memory_space<vmem>>, vector<1x8x8xbf16>
    %21 = vector.shape_cast %20 : vector<1x8x8xbf16> to vector<8x8xbf16>
    %22 = arith.extf %21 : vector<8x8xbf16> to vector<8x8xf32>
    %c4 = arith.constant 4 : index
    %c1_17 = arith.constant 1 : index
    %c0_18 = arith.constant 0 : index
    %23 = vector.load %arg11[%c4, %c1_17, %c0_18] : memref<10x10x8xf32, #tpu.memory_space<vmem>>, vector<1x8x8xf32>
    %24 = vector.shape_cast %23 : vector<1x8x8xf32> to vector<8x8xf32>
    %25 = vector.shape_cast %22 : vector<8x8xf32> to vector<1x8x8xf32>
    tpu.vector_store %arg11[%c4, %c1_17, %c0_18], %25 {strides = array<i32>} : memref<10x10x8xf32, #tpu.memory_space<vmem>>, vector<1x8x8xf32>,
    %c0_19 = arith.constant 0 : index
    %c32 = arith.constant 32 : index
    %c0_20 = arith.constant 0 : index
    %26 = vector.load %arg1[%c0_19, %c32, %c0_20] : memref<1x64x8xbf16, #tpu.memory_space<vmem>>, vector<1x8x8xbf16>
    %27 = vector.shape_cast %26 : vector<1x8x8xbf16> to vector<8x8xbf16>
    %28 = arith.extf %27 : vector<8x8xbf16> to vector<8x8xf32>
    %c5 = arith.constant 5 : index
    %c1_21 = arith.constant 1 : index
    %c0_22 = arith.constant 0 : index
    %29 = vector.load %arg11[%c5, %c1_21, %c0_22] : memref<10x10x8xf32, #tpu.memory_space<vmem>>, vector<1x8x8xf32>
    %30 = vector.shape_cast %29 : vector<1x8x8xf32> to vector<8x8xf32>
    %31 = vector.shape_cast %28 : vector<8x8xf32> to vector<1x8x8xf32>
    tpu.vector_store %arg11[%c5, %c1_21, %c0_22], %31 {strides = array<i32>} : memref<10x10x8xf32, #tpu.memory_space<vmem>>, vector<1x8x8xf32>,
    %c0_23 = arith.constant 0 : index
    %c40 = arith.constant 40 : index
    %c0_24 = arith.constant 0 : index
    %32 = vector.load %arg1[%c0_23, %c40, %c0_24] : memref<1x64x8xbf16, #tpu.memory_space<vmem>>, vector<1x8x8xbf16>
    %33 = vector.shape_cast %32 : vector<1x8x8xbf16> to vector<8x8xbf16>
    %34 = arith.extf %33 : vector<8x8xbf16> to vector<8x8xf32>
    %c6 = arith.constant 6 : index
    %c1_25 = arith.constant 1 : index
    %c0_26 = arith.constant 0 : index
    %35 = vector.load %arg11[%c6, %c1_25, %c0_26] : memref<10x10x8xf32, #tpu.memory_space<vmem>>, vector<1x8x8xf32>
    %36 = vector.shape_cast %35 : vector<1x8x8xf32> to vector<8x8xf32>
    %37 = vector.shape_cast %34 : vector<8x8xf32> to vector<1x8x8xf32>
    tpu.vector_store %arg11[%c6, %c1_25, %c0_26], %37 {strides = array<i32>} : memref<10x10x8xf32, #tpu.memory_space<vmem>>, vector<1x8x8xf32>,
    %c0_27 = arith.constant 0 : index
    %c48 = arith.constant 48 : index
    %c0_28 = arith.constant 0 : index
    %38 = vector.load %arg1[%c0_27, %c48, %c0_28] : memref<1x64x8xbf16, #tpu.memory_space<vmem>>, vector<1x8x8xbf16>
    %39 = vector.shape_cast %38 : vector<1x8x8xbf16> to vector<8x8xbf16>
    %40 = arith.extf %39 : vector<8x8xbf16> to vector<8x8xf32>
    %c7 = arith.constant 7 : index
    %c1_29 = arith.constant 1 : index
    %c0_30 = arith.constant 0 : index
    %41 = vector.load %arg11[%c7, %c1_29, %c0_30] : memref<10x10x8xf32, #tpu.memory_space<vmem>>, vector<1x8x8xf32>
    %42 = vector.shape_cast %41 : vector<1x8x8xf32> to vector<8x8xf32>
    %43 = vector.shape_cast %40 : vector<8x8xf32> to vector<1x8x8xf32>
    tpu.vector_store %arg11[%c7, %c1_29, %c0_30], %43 {strides = array<i32>} : memref<10x10x8xf32, #tpu.memory_space<vmem>>, vector<1x8x8xf32>,
    %c0_31 = arith.constant 0 : index
    %c56 = arith.constant 56 : index
    %c0_32 = arith.constant 0 : index
    %44 = vector.load %arg1[%c0_31, %c56, %c0_32] : memref<1x64x8xbf16, #tpu.memory_space<vmem>>, vector<1x8x8xbf16>
    %45 = vector.shape_cast %44 : vector<1x8x8xbf16> to vector<8x8xbf16>
    %46 = arith.extf %45 : vector<8x8xbf16> to vector<8x8xf32>
    %c8_33 = arith.constant 8 : index
    %c1_34 = arith.constant 1 : index
    %c0_35 = arith.constant 0 : index
    %47 = vector.load %arg11[%c8_33, %c1_34, %c0_35] : memref<10x10x8xf32, #tpu.memory_space<vmem>>, vector<1x8x8xf32>
    %48 = vector.shape_cast %47 : vector<1x8x8xf32> to vector<8x8xf32>
    %49 = vector.shape_cast %46 : vector<8x8xf32> to vector<1x8x8xf32>
    tpu.vector_store %arg11[%c8_33, %c1_34, %c0_35], %49 {strides = array<i32>} : memref<10x10x8xf32, #tpu.memory_space<vmem>>, vector<1x8x8xf32>,
    %c0_36 = arith.constant 0 : index
    %c0_37 = arith.constant 0 : index
    %50 = vector.load %arg3[%c0_36, %c0_37] : memref<1x8xf32, #tpu.memory_space<vmem>>, vector<1x8xf32>
    %cst_38 = arith.constant 0.000000e+00 : f32
    %51 = vector.broadcast %cst_38 : f32 to vector<8x8xf32>
    %c0_39 = arith.constant 0 : index
    %c0_40 = arith.constant 0 : index
    %c0_41 = arith.constant 0 : index
    %52 = vector.load %arg2[%c0_39, %c0_40, %c0_41] : memref<9x1x8xf32, #tpu.memory_space<vmem>>, vector<1x1x8xf32>
    %53 = vector.shape_cast %52 : vector<1x1x8xf32> to vector<1x8xf32>
    %c0_42 = arith.constant 0 : index
    %c0_43 = arith.constant 0 : index
    %c0_44 = arith.constant 0 : index
    %54 = vector.load %arg11[%c0_42, %c0_43, %c0_44] : memref<10x10x8xf32, #tpu.memory_space<vmem>>, vector<1x8x8xf32>
    %55 = vector.shape_cast %54 : vector<1x8x8xf32> to vector<8x8xf32>
    %56 = vector.broadcast %53 : vector<1x8xf32> to vector<8x8xf32>
    %57 = arith.mulf %55, %56 : vector<8x8xf32>
    %58 = arith.addf %51, %57 : vector<8x8xf32>
    %c1_45 = arith.constant 1 : index
    %c0_46 = arith.constant 0 : index
    %c0_47 = arith.constant 0 : index
    %59 = vector.load %arg2[%c1_45, %c0_46, %c0_47] : memref<9x1x8xf32, #tpu.memory_space<vmem>>, vector<1x1x8xf32>
    %60 = vector.shape_cast %59 : vector<1x1x8xf32> to vector<1x8xf32>
    %c0_48 = arith.constant 0 : index
    %c1_49 = arith.constant 1 : index
    %c0_50 = arith.constant 0 : index
    %61 = vector.load %arg11[%c0_48, %c1_49, %c0_50] : memref<10x10x8xf32, #tpu.memory_space<vmem>>, vector<1x8x8xf32>
    %62 = vector.shape_cast %61 : vector<1x8x8xf32> to vector<8x8xf32>
    %63 = vector.broadcast %60 : vector<1x8xf32> to vector<8x8xf32>
    %64 = arith.mulf %62, %63 : vector<8x8xf32>
    %65 = arith.addf %58, %64 : vector<8x8xf32>
    %c2_51 = arith.constant 2 : index
    %c0_52 = arith.constant 0 : index
    %c0_53 = arith.constant 0 : index
    %66 = vector.load %arg2[%c2_51, %c0_52, %c0_53] : memref<9x1x8xf32, #tpu.memory_space<vmem>>, vector<1x1x8xf32>
    %67 = vector.shape_cast %66 : vector<1x1x8xf32> to vector<1x8xf32>
    %c0_54 = arith.constant 0 : index
    %c2_55 = arith.constant 2 : index
    %c0_56 = arith.constant 0 : index
    %68 = vector.load %arg11[%c0_54, %c2_55, %c0_56] : memref<10x10x8xf32, #tpu.memory_space<vmem>>, vector<1x8x8xf32>
    %69 = vector.shape_cast %68 : vector<1x8x8xf32> to vector<8x8xf32>
    %70 = vector.broadcast %67 : vector<1x8xf32> to vector<8x8xf32>
    %71 = arith.mulf %69, %70 : vector<8x8xf32>
    %72 = arith.addf %65, %71 : vector<8x8xf32>
    %c3_57 = arith.constant 3 : index
    %c0_58 = arith.constant 0 : index
    %c0_59 = arith.constant 0 : index
    %73 = vector.load %arg2[%c3_57, %c0_58, %c0_59] : memref<9x1x8xf32, #tpu.memory_space<vmem>>, vector<1x1x8xf32>
    %74 = vector.shape_cast %73 : vector<1x1x8xf32> to vector<1x8xf32>
    %c1_60 = arith.constant 1 : index
    %c0_61 = arith.constant 0 : index
    %c0_62 = arith.constant 0 : index
    %75 = vector.load %arg11[%c1_60, %c0_61, %c0_62] : memref<10x10x8xf32, #tpu.memory_space<vmem>>, vector<1x8x8xf32>
    %76 = vector.shape_cast %75 : vector<1x8x8xf32> to vector<8x8xf32>
    %77 = vector.broadcast %74 : vector<1x8xf32> to vector<8x8xf32>
    %78 = arith.mulf %76, %77 : vector<8x8xf32>
    %79 = arith.addf %72, %78 : vector<8x8xf32>
    %c4_63 = arith.constant 4 : index
    %c0_64 = arith.constant 0 : index
    %c0_65 = arith.constant 0 : index
    %80 = vector.load %arg2[%c4_63, %c0_64, %c0_65] : memref<9x1x8xf32, #tpu.memory_space<vmem>>, vector<1x1x8xf32>
    %81 = vector.shape_cast %80 : vector<1x1x8xf32> to vector<1x8xf32>
    %c1_66 = arith.constant 1 : index
    %c1_67 = arith.constant 1 : index
    %c0_68 = arith.constant 0 : index
    %82 = vector.load %arg11[%c1_66, %c1_67, %c0_68] : memref<10x10x8xf32, #tpu.memory_space<vmem>>, vector<1x8x8xf32>
    %83 = vector.shape_cast %82 : vector<1x8x8xf32> to vector<8x8xf32>
    %84 = vector.broadcast %81 : vector<1x8xf32> to vector<8x8xf32>
    %85 = arith.mulf %83, %84 : vector<8x8xf32>
    %86 = arith.addf %79, %85 : vector<8x8xf32>
    %c5_69 = arith.constant 5 : index
    %c0_70 = arith.constant 0 : index
    %c0_71 = arith.constant 0 : index
    %87 = vector.load %arg2[%c5_69, %c0_70, %c0_71] : memref<9x1x8xf32, #tpu.memory_space<vmem>>, vector<1x1x8xf32>
    %88 = vector.shape_cast %87 : vector<1x1x8xf32> to vector<1x8xf32>
    %c1_72 = arith.constant 1 : index
    %c2_73 = arith.constant 2 : index
    %c0_74 = arith.constant 0 : index
    %89 = vector.load %arg11[%c1_72, %c2_73, %c0_74] : memref<10x10x8xf32, #tpu.memory_space<vmem>>, vector<1x8x8xf32>
    %90 = vector.shape_cast %89 : vector<1x8x8xf32> to vector<8x8xf32>
    %91 = vector.broadcast %88 : vector<1x8xf32> to vector<8x8xf32>
    %92 = arith.mulf %90, %91 : vector<8x8xf32>
    %93 = arith.addf %86, %92 : vector<8x8xf32>
    %c6_75 = arith.constant 6 : index
    %c0_76 = arith.constant 0 : index
    %c0_77 = arith.constant 0 : index
    %94 = vector.load %arg2[%c6_75, %c0_76, %c0_77] : memref<9x1x8xf32, #tpu.memory_space<vmem>>, vector<1x1x8xf32>
    %95 = vector.shape_cast %94 : vector<1x1x8xf32> to vector<1x8xf32>
    %c2_78 = arith.constant 2 : index
    %c0_79 = arith.constant 0 : index
    %c0_80 = arith.constant 0 : index
    %96 = vector.load %arg11[%c2_78, %c0_79, %c0_80] : memref<10x10x8xf32, #tpu.memory_space<vmem>>, vector<1x8x8xf32>
    %97 = vector.shape_cast %96 : vector<1x8x8xf32> to vector<8x8xf32>
    %98 = vector.broadcast %95 : vector<1x8xf32> to vector<8x8xf32>
    %99 = arith.mulf %97, %98 : vector<8x8xf32>
    %100 = arith.addf %93, %99 : vector<8x8xf32>
    %c7_81 = arith.constant 7 : index
    %c0_82 = arith.constant 0 : index
    %c0_83 = arith.constant 0 : index
    %101 = vector.load %arg2[%c7_81, %c0_82, %c0_83] : memref<9x1x8xf32, #tpu.memory_space<vmem>>, vector<1x1x8xf32>
    %102 = vector.shape_cast %101 : vector<1x1x8xf32> to vector<1x8xf32>
    %c2_84 = arith.constant 2 : index
    %c1_85 = arith.constant 1 : index
    %c0_86 = arith.constant 0 : index
    %103 = vector.load %arg11[%c2_84, %c1_85, %c0_86] : memref<10x10x8xf32, #tpu.memory_space<vmem>>, vector<1x8x8xf32>
    %104 = vector.shape_cast %103 : vector<1x8x8xf32> to vector<8x8xf32>
    %105 = vector.broadcast %102 : vector<1x8xf32> to vector<8x8xf32>
    %106 = arith.mulf %104, %105 : vector<8x8xf32>
    %107 = arith.addf %100, %106 : vector<8x8xf32>
    %c8_87 = arith.constant 8 : index
    %c0_88 = arith.constant 0 : index
    %c0_89 = arith.constant 0 : index
    %108 = vector.load %arg2[%c8_87, %c0_88, %c0_89] : memref<9x1x8xf32, #tpu.memory_space<vmem>>, vector<1x1x8xf32>
    %109 = vector.shape_cast %108 : vector<1x1x8xf32> to vector<1x8xf32>
    %c2_90 = arith.constant 2 : index
    %c2_91 = arith.constant 2 : index
    %c0_92 = arith.constant 0 : index
    %110 = vector.load %arg11[%c2_90, %c2_91, %c0_92] : memref<10x10x8xf32, #tpu.memory_space<vmem>>, vector<1x8x8xf32>
    %111 = vector.shape_cast %110 : vector<1x8x8xf32> to vector<8x8xf32>
    %112 = vector.broadcast %109 : vector<1x8xf32> to vector<8x8xf32>
    %113 = arith.mulf %111, %112 : vector<8x8xf32>
    %114 = arith.addf %107, %113 : vector<8x8xf32>
    %115 = vector.broadcast %50 : vector<1x8xf32> to vector<8x8xf32>
    %116 = arith.addf %114, %115 : vector<8x8xf32>
    %117 = arith.negf %116 : vector<8x8xf32>
    %118 = math.exp %117 : vector<8x8xf32>
    %cst_93 = arith.constant 1.000000e+00 : f32
    %119 = vector.broadcast %cst_93 : f32 to vector<8x8xf32>
    %120 = arith.addf %119, %118 : vector<8x8xf32>
    %121 = arith.divf %119, %120 : vector<8x8xf32>
    %122 = arith.mulf %116, %121 : vector<8x8xf32>
    %c0_94 = arith.constant 0 : index
    %c0_95 = arith.constant 0 : index
    %123 = vector.load %arg12[%c0_94, %c0_95] : memref<64x8xf32, #tpu.memory_space<vmem>>, vector<8x8xf32>
    tpu.vector_store %arg12[%c0_94, %c0_95], %122 {strides = array<i32>} : memref<64x8xf32, #tpu.memory_space<vmem>>, vector<8x8xf32>,
    %cst_96 = arith.constant 0.000000e+00 : f32
    %124 = vector.broadcast %cst_96 : f32 to vector<8x8xf32>
    %c0_97 = arith.constant 0 : index
    %c0_98 = arith.constant 0 : index
    %c0_99 = arith.constant 0 : index
    %125 = vector.load %arg2[%c0_97, %c0_98, %c0_99] : memref<9x1x8xf32, #tpu.memory_space<vmem>>, vector<1x1x8xf32>
    %126 = vector.shape_cast %125 : vector<1x1x8xf32> to vector<1x8xf32>
    %c1_100 = arith.constant 1 : index
    %c0_101 = arith.constant 0 : index
    %c0_102 = arith.constant 0 : index
    %127 = vector.load %arg11[%c1_100, %c0_101, %c0_102] : memref<10x10x8xf32, #tpu.memory_space<vmem>>, vector<1x8x8xf32>
    %128 = vector.shape_cast %127 : vector<1x8x8xf32> to vector<8x8xf32>
    %129 = vector.broadcast %126 : vector<1x8xf32> to vector<8x8xf32>
    %130 = arith.mulf %128, %129 : vector<8x8xf32>
    %131 = arith.addf %124, %130 : vector<8x8xf32>
    %c1_103 = arith.constant 1 : index
    %c0_104 = arith.constant 0 : index
    %c0_105 = arith.constant 0 : index
    %132 = vector.load %arg2[%c1_103, %c0_104, %c0_105] : memref<9x1x8xf32, #tpu.memory_space<vmem>>, vector<1x1x8xf32>
    %133 = vector.shape_cast %132 : vector<1x1x8xf32> to vector<1x8xf32>
    %c1_106 = arith.constant 1 : index
    %c1_107 = arith.constant 1 : index
    %c0_108 = arith.constant 0 : index
    %134 = vector.load %arg11[%c1_106, %c1_107, %c0_108] : memref<10x10x8xf32, #tpu.memory_space<vmem>>, vector<1x8x8xf32>
    %135 = vector.shape_cast %134 : vector<1x8x8xf32> to vector<8x8xf32>
    %136 = vector.broadcast %133 : vector<1x8xf32> to vector<8x8xf32>
    %137 = arith.mulf %135, %136 : vector<8x8xf32>
    %138 = arith.addf %131, %137 : vector<8x8xf32>
    %c2_109 = arith.constant 2 : index
    %c0_110 = arith.constant 0 : index
    %c0_111 = arith.constant 0 : index
    %139 = vector.load %arg2[%c2_109, %c0_110, %c0_111] : memref<9x1x8xf32, #tpu.memory_space<vmem>>, vector<1x1x8xf32>
    %140 = vector.shape_cast %139 : vector<1x1x8xf32> to vector<1x8xf32>
    %c1_112 = arith.constant 1 : index
    %c2_113 = arith.constant 2 : index
    %c0_114 = arith.constant 0 : index
    %141 = vector.load %arg11[%c1_112, %c2_113, %c0_114] : memref<10x10x8xf32, #tpu.memory_space<vmem>>, vector<1x8x8xf32>
    %142 = vector.shape_cast %141 : vector<1x8x8xf32> to vector<8x8xf32>
    %143 = vector.broadcast %140 : vector<1x8xf32> to vector<8x8xf32>
    %144 = arith.mulf %142, %143 : vector<8x8xf32>
    %145 = arith.addf %138, %144 : vector<8x8xf32>
    %c3_115 = arith.constant 3 : index
    %c0_116 = arith.constant 0 : index
    %c0_117 = arith.constant 0 : index
    %146 = vector.load %arg2[%c3_115, %c0_116, %c0_117] : memref<9x1x8xf32, #tpu.memory_space<vmem>>, vector<1x1x8xf32>
    %147 = vector.shape_cast %146 : vector<1x1x8xf32> to vector<1x8xf32>
    %c2_118 = arith.constant 2 : index
    %c0_119 = arith.constant 0 : index
    %c0_120 = arith.constant 0 : index
    %148 = vector.load %arg11[%c2_118, %c0_119, %c0_120] : memref<10x10x8xf32, #tpu.memory_space<vmem>>, vector<1x8x8xf32>
    %149 = vector.shape_cast %148 : vector<1x8x8xf32> to vector<8x8xf32>
    %150 = vector.broadcast %147 : vector<1x8xf32> to vector<8x8xf32>
    %151 = arith.mulf %149, %150 : vector<8x8xf32>
    %152 = arith.addf %145, %151 : vector<8x8xf32>
    %c4_121 = arith.constant 4 : index
    %c0_122 = arith.constant 0 : index
    %c0_123 = arith.constant 0 : index
    %153 = vector.load %arg2[%c4_121, %c0_122, %c0_123] : memref<9x1x8xf32, #tpu.memory_space<vmem>>, vector<1x1x8xf32>
    %154 = vector.shape_cast %153 : vector<1x1x8xf32> to vector<1x8xf32>
    %c2_124 = arith.constant 2 : index
    %c1_125 = arith.constant 1 : index
    %c0_126 = arith.constant 0 : index
    %155 = vector.load %arg11[%c2_124, %c1_125, %c0_126] : memref<10x10x8xf32, #tpu.memory_space<vmem>>, vector<1x8x8xf32>
    %156 = vector.shape_cast %155 : vector<1x8x8xf32> to vector<8x8xf32>
    %157 = vector.broadcast %154 : vector<1x8xf32> to vector<8x8xf32>
    %158 = arith.mulf %156, %157 : vector<8x8xf32>
    %159 = arith.addf %152, %158 : vector<8x8xf32>
    %c5_127 = arith.constant 5 : index
    %c0_128 = arith.constant 0 : index
    %c0_129 = arith.constant 0 : index
    %160 = vector.load %arg2[%c5_127, %c0_128, %c0_129] : memref<9x1x8xf32, #tpu.memory_space<vmem>>, vector<1x1x8xf32>
    %161 = vector.shape_cast %160 : vector<1x1x8xf32> to vector<1x8xf32>
    %c2_130 = arith.constant 2 : index
    %c2_131 = arith.constant 2 : index
    %c0_132 = arith.constant 0 : index
    %162 = vector.load %arg11[%c2_130, %c2_131, %c0_132] : memref<10x10x8xf32, #tpu.memory_space<vmem>>, vector<1x8x8xf32>
    %163 = vector.shape_cast %162 : vector<1x8x8xf32> to vector<8x8xf32>
    %164 = vector.broadcast %161 : vector<1x8xf32> to vector<8x8xf32>
    %165 = arith.mulf %163, %164 : vector<8x8xf32>
    %166 = arith.addf %159, %165 : vector<8x8xf32>
    %c6_133 = arith.constant 6 : index
    %c0_134 = arith.constant 0 : index
    %c0_135 = arith.constant 0 : index
    %167 = vector.load %arg2[%c6_133, %c0_134, %c0_135] : memref<9x1x8xf32, #tpu.memory_space<vmem>>, vector<1x1x8xf32>
    %168 = vector.shape_cast %167 : vector<1x1x8xf32> to vector<1x8xf32>
    %c3_136 = arith.constant 3 : index
    %c0_137 = arith.constant 0 : index
    %c0_138 = arith.constant 0 : index
    %169 = vector.load %arg11[%c3_136, %c0_137, %c0_138] : memref<10x10x8xf32, #tpu.memory_space<vmem>>, vector<1x8x8xf32>
    %170 = vector.shape_cast %169 : vector<1x8x8xf32> to vector<8x8xf32>
    %171 = vector.broadcast %168 : vector<1x8xf32> to vector<8x8xf32>
    %172 = arith.mulf %170, %171 : vector<8x8xf32>
    %173 = arith.addf %166, %172 : vector<8x8xf32>
    %c7_139 = arith.constant 7 : index
    %c0_140 = arith.constant 0 : index
    %c0_141 = arith.constant 0 : index
    %174 = vector.load %arg2[%c7_139, %c0_140, %c0_141] : memref<9x1x8xf32, #tpu.memory_space<vmem>>, vector<1x1x8xf32>
    %175 = vector.shape_cast %174 : vector<1x1x8xf32> to vector<1x8xf32>
    %c3_142 = arith.constant 3 : index
    %c1_143 = arith.constant 1 : index
    %c0_144 = arith.constant 0 : index
    %176 = vector.load %arg11[%c3_142, %c1_143, %c0_144] : memref<10x10x8xf32, #tpu.memory_space<vmem>>, vector<1x8x8xf32>
    %177 = vector.shape_cast %176 : vector<1x8x8xf32> to vector<8x8xf32>
    %178 = vector.broadcast %175 : vector<1x8xf32> to vector<8x8xf32>
    %179 = arith.mulf %177, %178 : vector<8x8xf32>
    %180 = arith.addf %173, %179 : vector<8x8xf32>
    %c8_145 = arith.constant 8 : index
    %c0_146 = arith.constant 0 : index
    %c0_147 = arith.constant 0 : index
    %181 = vector.load %arg2[%c8_145, %c0_146, %c0_147] : memref<9x1x8xf32, #tpu.memory_space<vmem>>, vector<1x1x8xf32>
    %182 = vector.shape_cast %181 : vector<1x1x8xf32> to vector<1x8xf32>
    %c3_148 = arith.constant 3 : index
    %c2_149 = arith.constant 2 : index
    %c0_150 = arith.constant 0 : index
    %183 = vector.load %arg11[%c3_148, %c2_149, %c0_150] : memref<10x10x8xf32, #tpu.memory_space<vmem>>, vector<1x8x8xf32>
    %184 = vector.shape_cast %183 : vector<1x8x8xf32> to vector<8x8xf32>
    %185 = vector.broadcast %182 : vector<1x8xf32> to vector<8x8xf32>
    %186 = arith.mulf %184, %185 : vector<8x8xf32>
    %187 = arith.addf %180, %186 : vector<8x8xf32>
    %188 = vector.broadcast %50 : vector<1x8xf32> to vector<8x8xf32>
    %189 = arith.addf %187, %188 : vector<8x8xf32>
    %190 = arith.negf %189 : vector<8x8xf32>
    %191 = math.exp %190 : vector<8x8xf32>
    %cst_151 = arith.constant 1.000000e+00 : f32
    %192 = vector.broadcast %cst_151 : f32 to vector<8x8xf32>
    %193 = arith.addf %192, %191 : vector<8x8xf32>
    %194 = arith.divf %192, %193 : vector<8x8xf32>
    %195 = arith.mulf %189, %194 : vector<8x8xf32>
    %c8_152 = arith.constant 8 : index
    %c0_153 = arith.constant 0 : index
    %196 = vector.load %arg12[%c8_152, %c0_153] : memref<64x8xf32, #tpu.memory_space<vmem>>, vector<8x8xf32>
    tpu.vector_store %arg12[%c8_152, %c0_153], %195 {strides = array<i32>} : memref<64x8xf32, #tpu.memory_space<vmem>>, vector<8x8xf32>,
    %cst_154 = arith.constant 0.000000e+00 : f32
    %197 = vector.broadcast %cst_154 : f32 to vector<8x8xf32>
    %c0_155 = arith.constant 0 : index
    %c0_156 = arith.constant 0 : index
    %c0_157 = arith.constant 0 : index
    %198 = vector.load %arg2[%c0_155, %c0_156, %c0_157] : memref<9x1x8xf32, #tpu.memory_space<vmem>>, vector<1x1x8xf32>
    %199 = vector.shape_cast %198 : vector<1x1x8xf32> to vector<1x8xf32>
    %c2_158 = arith.constant 2 : index
    %c0_159 = arith.constant 0 : index
    %c0_160 = arith.constant 0 : index
    %200 = vector.load %arg11[%c2_158, %c0_159, %c0_160] : memref<10x10x8xf32, #tpu.memory_space<vmem>>, vector<1x8x8xf32>
    %201 = vector.shape_cast %200 : vector<1x8x8xf32> to vector<8x8xf32>
    %202 = vector.broadcast %199 : vector<1x8xf32> to vector<8x8xf32>
    %203 = arith.mulf %201, %202 : vector<8x8xf32>
    %204 = arith.addf %197, %203 : vector<8x8xf32>
    %c1_161 = arith.constant 1 : index
    %c0_162 = arith.constant 0 : index
    %c0_163 = arith.constant 0 : index
    %205 = vector.load %arg2[%c1_161, %c0_162, %c0_163] : memref<9x1x8xf32, #tpu.memory_space<vmem>>, vector<1x1x8xf32>
    %206 = vector.shape_cast %205 : vector<1x1x8xf32> to vector<1x8xf32>
    %c2_164 = arith.constant 2 : index
    %c1_165 = arith.constant 1 : index
    %c0_166 = arith.constant 0 : index
    %207 = vector.load %arg11[%c2_164, %c1_165, %c0_166] : memref<10x10x8xf32, #tpu.memory_space<vmem>>, vector<1x8x8xf32>
    %208 = vector.shape_cast %207 : vector<1x8x8xf32> to vector<8x8xf32>
    %209 = vector.broadcast %206 : vector<1x8xf32> to vector<8x8xf32>
    %210 = arith.mulf %208, %209 : vector<8x8xf32>
    %211 = arith.addf %204, %210 : vector<8x8xf32>
    %c2_167 = arith.constant 2 : index
    %c0_168 = arith.constant 0 : index
    %c0_169 = arith.constant 0 : index
    %212 = vector.load %arg2[%c2_167, %c0_168, %c0_169] : memref<9x1x8xf32, #tpu.memory_space<vmem>>, vector<1x1x8xf32>
    %213 = vector.shape_cast %212 : vector<1x1x8xf32> to vector<1x8xf32>
    %c2_170 = arith.constant 2 : index
    %c2_171 = arith.constant 2 : index
    %c0_172 = arith.constant 0 : index
    %214 = vector.load %arg11[%c2_170, %c2_171, %c0_172] : memref<10x10x8xf32, #tpu.memory_space<vmem>>, vector<1x8x8xf32>
    %215 = vector.shape_cast %214 : vector<1x8x8xf32> to vector<8x8xf32>
    %216 = vector.broadcast %213 : vector<1x8xf32> to vector<8x8xf32>
    %217 = arith.mulf %215, %216 : vector<8x8xf32>
    %218 = arith.addf %211, %217 : vector<8x8xf32>
    %c3_173 = arith.constant 3 : index
    %c0_174 = arith.constant 0 : index
    %c0_175 = arith.constant 0 : index
    %219 = vector.load %arg2[%c3_173, %c0_174, %c0_175] : memref<9x1x8xf32, #tpu.memory_space<vmem>>, vector<1x1x8xf32>
    %220 = vector.shape_cast %219 : vector<1x1x8xf32> to vector<1x8xf32>
    %c3_176 = arith.constant 3 : index
    %c0_177 = arith.constant 0 : index
    %c0_178 = arith.constant 0 : index
    %221 = vector.load %arg11[%c3_176, %c0_177, %c0_178] : memref<10x10x8xf32, #tpu.memory_space<vmem>>, vector<1x8x8xf32>
    %222 = vector.shape_cast %221 : vector<1x8x8xf32> to vector<8x8xf32>
    %223 = vector.broadcast %220 : vector<1x8xf32> to vector<8x8xf32>
    %224 = arith.mulf %222, %223 : vector<8x8xf32>
    %225 = arith.addf %218, %224 : vector<8x8xf32>
    %c4_179 = arith.constant 4 : index
    %c0_180 = arith.constant 0 : index
    %c0_181 = arith.constant 0 : index
    %226 = vector.load %arg2[%c4_179, %c0_180, %c0_181] : memref<9x1x8xf32, #tpu.memory_space<vmem>>, vector<1x1x8xf32>
    %227 = vector.shape_cast %226 : vector<1x1x8xf32> to vector<1x8xf32>
    %c3_182 = arith.constant 3 : index
    %c1_183 = arith.constant 1 : index
    %c0_184 = arith.constant 0 : index
    %228 = vector.load %arg11[%c3_182, %c1_183, %c0_184] : memref<10x10x8xf32, #tpu.memory_space<vmem>>, vector<1x8x8xf32>
    %229 = vector.shape_cast %228 : vector<1x8x8xf32> to vector<8x8xf32>
    %230 = vector.broadcast %227 : vector<1x8xf32> to vector<8x8xf32>
    %231 = arith.mulf %229, %230 : vector<8x8xf32>
    %232 = arith.addf %225, %231 : vector<8x8xf32>
    %c5_185 = arith.constant 5 : index
    %c0_186 = arith.constant 0 : index
    %c0_187 = arith.constant 0 : index
    %233 = vector.load %arg2[%c5_185, %c0_186, %c0_187] : memref<9x1x8xf32, #tpu.memory_space<vmem>>, vector<1x1x8xf32>
    %234 = vector.shape_cast %233 : vector<1x1x8xf32> to vector<1x8xf32>
    %c3_188 = arith.constant 3 : index
    %c2_189 = arith.constant 2 : index
    %c0_190 = arith.constant 0 : index
    %235 = vector.load %arg11[%c3_188, %c2_189, %c0_190] : memref<10x10x8xf32, #tpu.memory_space<vmem>>, vector<1x8x8xf32>
    %236 = vector.shape_cast %235 : vector<1x8x8xf32> to vector<8x8xf32>
    %237 = vector.broadcast %234 : vector<1x8xf32> to vector<8x8xf32>
    %238 = arith.mulf %236, %237 : vector<8x8xf32>
    %239 = arith.addf %232, %238 : vector<8x8xf32>
    %c6_191 = arith.constant 6 : index
    %c0_192 = arith.constant 0 : index
    %c0_193 = arith.constant 0 : index
    %240 = vector.load %arg2[%c6_191, %c0_192, %c0_193] : memref<9x1x8xf32, #tpu.memory_space<vmem>>, vector<1x1x8xf32>
    %241 = vector.shape_cast %240 : vector<1x1x8xf32> to vector<1x8xf32>
    %c4_194 = arith.constant 4 : index
    %c0_195 = arith.constant 0 : index
    %c0_196 = arith.constant 0 : index
    %242 = vector.load %arg11[%c4_194, %c0_195, %c0_196] : memref<10x10x8xf32, #tpu.memory_space<vmem>>, vector<1x8x8xf32>
    %243 = vector.shape_cast %242 : vector<1x8x8xf32> to vector<8x8xf32>
    %244 = vector.broadcast %241 : vector<1x8xf32> to vector<8x8xf32>
    %245 = arith.mulf %243, %244 : vector<8x8xf32>
    %246 = arith.addf %239, %245 : vector<8x8xf32>
    %c7_197 = arith.constant 7 : index
    %c0_198 = arith.constant 0 : index
    %c0_199 = arith.constant 0 : index
    %247 = vector.load %arg2[%c7_197, %c0_198, %c0_199] : memref<9x1x8xf32, #tpu.memory_space<vmem>>, vector<1x1x8xf32>
    %248 = vector.shape_cast %247 : vector<1x1x8xf32> to vector<1x8xf32>
    %c4_200 = arith.constant 4 : index
    %c1_201 = arith.constant 1 : index
    %c0_202 = arith.constant 0 : index
    %249 = vector.load %arg11[%c4_200, %c1_201, %c0_202] : memref<10x10x8xf32, #tpu.memory_space<vmem>>, vector<1x8x8xf32>
    %250 = vector.shape_cast %249 : vector<1x8x8xf32> to vector<8x8xf32>
    %251 = vector.broadcast %248 : vector<1x8xf32> to vector<8x8xf32>
    %252 = arith.mulf %250, %251 : vector<8x8xf32>
    %253 = arith.addf %246, %252 : vector<8x8xf32>
    %c8_203 = arith.constant 8 : index
    %c0_204 = arith.constant 0 : index
    %c0_205 = arith.constant 0 : index
    %254 = vector.load %arg2[%c8_203, %c0_204, %c0_205] : memref<9x1x8xf32, #tpu.memory_space<vmem>>, vector<1x1x8xf32>
    %255 = vector.shape_cast %254 : vector<1x1x8xf32> to vector<1x8xf32>
    %c4_206 = arith.constant 4 : index
    %c2_207 = arith.constant 2 : index
    %c0_208 = arith.constant 0 : index
    %256 = vector.load %arg11[%c4_206, %c2_207, %c0_208] : memref<10x10x8xf32, #tpu.memory_space<vmem>>, vector<1x8x8xf32>
    %257 = vector.shape_cast %256 : vector<1x8x8xf32> to vector<8x8xf32>
    %258 = vector.broadcast %255 : vector<1x8xf32> to vector<8x8xf32>
    %259 = arith.mulf %257, %258 : vector<8x8xf32>
    %260 = arith.addf %253, %259 : vector<8x8xf32>
    %261 = vector.broadcast %50 : vector<1x8xf32> to vector<8x8xf32>
    %262 = arith.addf %260, %261 : vector<8x8xf32>
    %263 = arith.negf %262 : vector<8x8xf32>
    %264 = math.exp %263 : vector<8x8xf32>
    %cst_209 = arith.constant 1.000000e+00 : f32
    %265 = vector.broadcast %cst_209 : f32 to vector<8x8xf32>
    %266 = arith.addf %265, %264 : vector<8x8xf32>
    %267 = arith.divf %265, %266 : vector<8x8xf32>
    %268 = arith.mulf %262, %267 : vector<8x8xf32>
    %c16_210 = arith.constant 16 : index
    %c0_211 = arith.constant 0 : index
    %269 = vector.load %arg12[%c16_210, %c0_211] : memref<64x8xf32, #tpu.memory_space<vmem>>, vector<8x8xf32>
    tpu.vector_store %arg12[%c16_210, %c0_211], %268 {strides = array<i32>} : memref<64x8xf32, #tpu.memory_space<vmem>>, vector<8x8xf32>,
    %cst_212 = arith.constant 0.000000e+00 : f32
    %270 = vector.broadcast %cst_212 : f32 to vector<8x8xf32>
    %c0_213 = arith.constant 0 : index
    %c0_214 = arith.constant 0 : index
    %c0_215 = arith.constant 0 : index
    %271 = vector.load %arg2[%c0_213, %c0_214, %c0_215] : memref<9x1x8xf32, #tpu.memory_space<vmem>>, vector<1x1x8xf32>
    %272 = vector.shape_cast %271 : vector<1x1x8xf32> to vector<1x8xf32>
    %c3_216 = arith.constant 3 : index
    %c0_217 = arith.constant 0 : index
    %c0_218 = arith.constant 0 : index
    %273 = vector.load %arg11[%c3_216, %c0_217, %c0_218] : memref<10x10x8xf32, #tpu.memory_space<vmem>>, vector<1x8x8xf32>
    %274 = vector.shape_cast %273 : vector<1x8x8xf32> to vector<8x8xf32>
    %275 = vector.broadcast %272 : vector<1x8xf32> to vector<8x8xf32>
    %276 = arith.mulf %274, %275 : vector<8x8xf32>
    %277 = arith.addf %270, %276 : vector<8x8xf32>
    %c1_219 = arith.constant 1 : index
    %c0_220 = arith.constant 0 : index
    %c0_221 = arith.constant 0 : index
    %278 = vector.load %arg2[%c1_219, %c0_220, %c0_221] : memref<9x1x8xf32, #tpu.memory_space<vmem>>, vector<1x1x8xf32>
    %279 = vector.shape_cast %278 : vector<1x1x8xf32> to vector<1x8xf32>
    %c3_222 = arith.constant 3 : index
    %c1_223 = arith.constant 1 : index
    %c0_224 = arith.constant 0 : index
    %280 = vector.load %arg11[%c3_222, %c1_223, %c0_224] : memref<10x10x8xf32, #tpu.memory_space<vmem>>, vector<1x8x8xf32>
    %281 = vector.shape_cast %280 : vector<1x8x8xf32> to vector<8x8xf32>
    %282 = vector.broadcast %279 : vector<1x8xf32> to vector<8x8xf32>
    %283 = arith.mulf %281, %282 : vector<8x8xf32>
    %284 = arith.addf %277, %283 : vector<8x8xf32>
    %c2_225 = arith.constant 2 : index
    %c0_226 = arith.constant 0 : index
    %c0_227 = arith.constant 0 : index
    %285 = vector.load %arg2[%c2_225, %c0_226, %c0_227] : memref<9x1x8xf32, #tpu.memory_space<vmem>>, vector<1x1x8xf32>
    %286 = vector.shape_cast %285 : vector<1x1x8xf32> to vector<1x8xf32>
    %c3_228 = arith.constant 3 : index
    %c2_229 = arith.constant 2 : index
    %c0_230 = arith.constant 0 : index
    %287 = vector.load %arg11[%c3_228, %c2_229, %c0_230] : memref<10x10x8xf32, #tpu.memory_space<vmem>>, vector<1x8x8xf32>
    %288 = vector.shape_cast %287 : vector<1x8x8xf32> to vector<8x8xf32>
    %289 = vector.broadcast %286 : vector<1x8xf32> to vector<8x8xf32>
    %290 = arith.mulf %288, %289 : vector<8x8xf32>
    %291 = arith.addf %284, %290 : vector<8x8xf32>
    %c3_231 = arith.constant 3 : index
    %c0_232 = arith.constant 0 : index
    %c0_233 = arith.constant 0 : index
    %292 = vector.load %arg2[%c3_231, %c0_232, %c0_233] : memref<9x1x8xf32, #tpu.memory_space<vmem>>, vector<1x1x8xf32>
    %293 = vector.shape_cast %292 : vector<1x1x8xf32> to vector<1x8xf32>
    %c4_234 = arith.constant 4 : index
    %c0_235 = arith.constant 0 : index
    %c0_236 = arith.constant 0 : index
    %294 = vector.load %arg11[%c4_234, %c0_235, %c0_236] : memref<10x10x8xf32, #tpu.memory_space<vmem>>, vector<1x8x8xf32>
    %295 = vector.shape_cast %294 : vector<1x8x8xf32> to vector<8x8xf32>
    %296 = vector.broadcast %293 : vector<1x8xf32> to vector<8x8xf32>
    %297 = arith.mulf %295, %296 : vector<8x8xf32>
    %298 = arith.addf %291, %297 : vector<8x8xf32>
    %c4_237 = arith.constant 4 : index
    %c0_238 = arith.constant 0 : index
    %c0_239 = arith.constant 0 : index
    %299 = vector.load %arg2[%c4_237, %c0_238, %c0_239] : memref<9x1x8xf32, #tpu.memory_space<vmem>>, vector<1x1x8xf32>
    %300 = vector.shape_cast %299 : vector<1x1x8xf32> to vector<1x8xf32>
    %c4_240 = arith.constant 4 : index
    %c1_241 = arith.constant 1 : index
    %c0_242 = arith.constant 0 : index
    %301 = vector.load %arg11[%c4_240, %c1_241, %c0_242] : memref<10x10x8xf32, #tpu.memory_space<vmem>>, vector<1x8x8xf32>
    %302 = vector.shape_cast %301 : vector<1x8x8xf32> to vector<8x8xf32>
    %303 = vector.broadcast %300 : vector<1x8xf32> to vector<8x8xf32>
    %304 = arith.mulf %302, %303 : vector<8x8xf32>
    %305 = arith.addf %298, %304 : vector<8x8xf32>
    %c5_243 = arith.constant 5 : index
    %c0_244 = arith.constant 0 : index
    %c0_245 = arith.constant 0 : index
    %306 = vector.load %arg2[%c5_243, %c0_244, %c0_245] : memref<9x1x8xf32, #tpu.memory_space<vmem>>, vector<1x1x8xf32>
    %307 = vector.shape_cast %306 : vector<1x1x8xf32> to vector<1x8xf32>
    %c4_246 = arith.constant 4 : index
    %c2_247 = arith.constant 2 : index
    %c0_248 = arith.constant 0 : index
    %308 = vector.load %arg11[%c4_246, %c2_247, %c0_248] : memref<10x10x8xf32, #tpu.memory_space<vmem>>, vector<1x8x8xf32>
    %309 = vector.shape_cast %308 : vector<1x8x8xf32> to vector<8x8xf32>
    %310 = vector.broadcast %307 : vector<1x8xf32> to vector<8x8xf32>
    %311 = arith.mulf %309, %310 : vector<8x8xf32>
    %312 = arith.addf %305, %311 : vector<8x8xf32>
    %c6_249 = arith.constant 6 : index
    %c0_250 = arith.constant 0 : index
    %c0_251 = arith.constant 0 : index
    %313 = vector.load %arg2[%c6_249, %c0_250, %c0_251] : memref<9x1x8xf32, #tpu.memory_space<vmem>>, vector<1x1x8xf32>
    %314 = vector.shape_cast %313 : vector<1x1x8xf32> to vector<1x8xf32>
    %c5_252 = arith.constant 5 : index
    %c0_253 = arith.constant 0 : index
    %c0_254 = arith.constant 0 : index
    %315 = vector.load %arg11[%c5_252, %c0_253, %c0_254] : memref<10x10x8xf32, #tpu.memory_space<vmem>>, vector<1x8x8xf32>
    %316 = vector.shape_cast %315 : vector<1x8x8xf32> to vector<8x8xf32>
    %317 = vector.broadcast %314 : vector<1x8xf32> to vector<8x8xf32>
    %318 = arith.mulf %316, %317 : vector<8x8xf32>
    %319 = arith.addf %312, %318 : vector<8x8xf32>
    %c7_255 = arith.constant 7 : index
    %c0_256 = arith.constant 0 : index
    %c0_257 = arith.constant 0 : index
    %320 = vector.load %arg2[%c7_255, %c0_256, %c0_257] : memref<9x1x8xf32, #tpu.memory_space<vmem>>, vector<1x1x8xf32>
    %321 = vector.shape_cast %320 : vector<1x1x8xf32> to vector<1x8xf32>
    %c5_258 = arith.constant 5 : index
    %c1_259 = arith.constant 1 : index
    %c0_260 = arith.constant 0 : index
    %322 = vector.load %arg11[%c5_258, %c1_259, %c0_260] : memref<10x10x8xf32, #tpu.memory_space<vmem>>, vector<1x8x8xf32>
    %323 = vector.shape_cast %322 : vector<1x8x8xf32> to vector<8x8xf32>
    %324 = vector.broadcast %321 : vector<1x8xf32> to vector<8x8xf32>
    %325 = arith.mulf %323, %324 : vector<8x8xf32>
    %326 = arith.addf %319, %325 : vector<8x8xf32>
    %c8_261 = arith.constant 8 : index
    %c0_262 = arith.constant 0 : index
    %c0_263 = arith.constant 0 : index
    %327 = vector.load %arg2[%c8_261, %c0_262, %c0_263] : memref<9x1x8xf32, #tpu.memory_space<vmem>>, vector<1x1x8xf32>
    %328 = vector.shape_cast %327 : vector<1x1x8xf32> to vector<1x8xf32>
    %c5_264 = arith.constant 5 : index
    %c2_265 = arith.constant 2 : index
    %c0_266 = arith.constant 0 : index
    %329 = vector.load %arg11[%c5_264, %c2_265, %c0_266] : memref<10x10x8xf32, #tpu.memory_space<vmem>>, vector<1x8x8xf32>
    %330 = vector.shape_cast %329 : vector<1x8x8xf32> to vector<8x8xf32>
    %331 = vector.broadcast %328 : vector<1x8xf32> to vector<8x8xf32>
    %332 = arith.mulf %330, %331 : vector<8x8xf32>
    %333 = arith.addf %326, %332 : vector<8x8xf32>
    %334 = vector.broadcast %50 : vector<1x8xf32> to vector<8x8xf32>
    %335 = arith.addf %333, %334 : vector<8x8xf32>
    %336 = arith.negf %335 : vector<8x8xf32>
    %337 = math.exp %336 : vector<8x8xf32>
    %cst_267 = arith.constant 1.000000e+00 : f32
    %338 = vector.broadcast %cst_267 : f32 to vector<8x8xf32>
    %339 = arith.addf %338, %337 : vector<8x8xf32>
    %340 = arith.divf %338, %339 : vector<8x8xf32>
    %341 = arith.mulf %335, %340 : vector<8x8xf32>
    %c24_268 = arith.constant 24 : index
    %c0_269 = arith.constant 0 : index
    %342 = vector.load %arg12[%c24_268, %c0_269] : memref<64x8xf32, #tpu.memory_space<vmem>>, vector<8x8xf32>
    tpu.vector_store %arg12[%c24_268, %c0_269], %341 {strides = array<i32>} : memref<64x8xf32, #tpu.memory_space<vmem>>, vector<8x8xf32>,
    %cst_270 = arith.constant 0.000000e+00 : f32
    %343 = vector.broadcast %cst_270 : f32 to vector<8x8xf32>
    %c0_271 = arith.constant 0 : index
    %c0_272 = arith.constant 0 : index
    %c0_273 = arith.constant 0 : index
    %344 = vector.load %arg2[%c0_271, %c0_272, %c0_273] : memref<9x1x8xf32, #tpu.memory_space<vmem>>, vector<1x1x8xf32>
    %345 = vector.shape_cast %344 : vector<1x1x8xf32> to vector<1x8xf32>
    %c4_274 = arith.constant 4 : index
    %c0_275 = arith.constant 0 : index
    %c0_276 = arith.constant 0 : index
    %346 = vector.load %arg11[%c4_274, %c0_275, %c0_276] : memref<10x10x8xf32, #tpu.memory_space<vmem>>, vector<1x8x8xf32>
    %347 = vector.shape_cast %346 : vector<1x8x8xf32> to vector<8x8xf32>
    %348 = vector.broadcast %345 : vector<1x8xf32> to vector<8x8xf32>
    %349 = arith.mulf %347, %348 : vector<8x8xf32>
    %350 = arith.addf %343, %349 : vector<8x8xf32>
    %c1_277 = arith.constant 1 : index
    %c0_278 = arith.constant 0 : index
    %c0_279 = arith.constant 0 : index
    %351 = vector.load %arg2[%c1_277, %c0_278, %c0_279] : memref<9x1x8xf32, #tpu.memory_space<vmem>>, vector<1x1x8xf32>
    %352 = vector.shape_cast %351 : vector<1x1x8xf32> to vector<1x8xf32>
    %c4_280 = arith.constant 4 : index
    %c1_281 = arith.constant 1 : index
    %c0_282 = arith.constant 0 : index
    %353 = vector.load %arg11[%c4_280, %c1_281, %c0_282] : memref<10x10x8xf32, #tpu.memory_space<vmem>>, vector<1x8x8xf32>
    %354 = vector.shape_cast %353 : vector<1x8x8xf32> to vector<8x8xf32>
    %355 = vector.broadcast %352 : vector<1x8xf32> to vector<8x8xf32>
    %356 = arith.mulf %354, %355 : vector<8x8xf32>
    %357 = arith.addf %350, %356 : vector<8x8xf32>
    %c2_283 = arith.constant 2 : index
    %c0_284 = arith.constant 0 : index
    %c0_285 = arith.constant 0 : index
    %358 = vector.load %arg2[%c2_283, %c0_284, %c0_285] : memref<9x1x8xf32, #tpu.memory_space<vmem>>, vector<1x1x8xf32>
    %359 = vector.shape_cast %358 : vector<1x1x8xf32> to vector<1x8xf32>
    %c4_286 = arith.constant 4 : index
    %c2_287 = arith.constant 2 : index
    %c0_288 = arith.constant 0 : index
    %360 = vector.load %arg11[%c4_286, %c2_287, %c0_288] : memref<10x10x8xf32, #tpu.memory_space<vmem>>, vector<1x8x8xf32>
    %361 = vector.shape_cast %360 : vector<1x8x8xf32> to vector<8x8xf32>
    %362 = vector.broadcast %359 : vector<1x8xf32> to vector<8x8xf32>
    %363 = arith.mulf %361, %362 : vector<8x8xf32>
    %364 = arith.addf %357, %363 : vector<8x8xf32>
    %c3_289 = arith.constant 3 : index
    %c0_290 = arith.constant 0 : index
    %c0_291 = arith.constant 0 : index
    %365 = vector.load %arg2[%c3_289, %c0_290, %c0_291] : memref<9x1x8xf32, #tpu.memory_space<vmem>>, vector<1x1x8xf32>
    %366 = vector.shape_cast %365 : vector<1x1x8xf32> to vector<1x8xf32>
    %c5_292 = arith.constant 5 : index
    %c0_293 = arith.constant 0 : index
    %c0_294 = arith.constant 0 : index
    %367 = vector.load %arg11[%c5_292, %c0_293, %c0_294] : memref<10x10x8xf32, #tpu.memory_space<vmem>>, vector<1x8x8xf32>
    %368 = vector.shape_cast %367 : vector<1x8x8xf32> to vector<8x8xf32>
    %369 = vector.broadcast %366 : vector<1x8xf32> to vector<8x8xf32>
    %370 = arith.mulf %368, %369 : vector<8x8xf32>
    %371 = arith.addf %364, %370 : vector<8x8xf32>
    %c4_295 = arith.constant 4 : index
    %c0_296 = arith.constant 0 : index
    %c0_297 = arith.constant 0 : index
    %372 = vector.load %arg2[%c4_295, %c0_296, %c0_297] : memref<9x1x8xf32, #tpu.memory_space<vmem>>, vector<1x1x8xf32>
    %373 = vector.shape_cast %372 : vector<1x1x8xf32> to vector<1x8xf32>
    %c5_298 = arith.constant 5 : index
    %c1_299 = arith.constant 1 : index
    %c0_300 = arith.constant 0 : index
    %374 = vector.load %arg11[%c5_298, %c1_299, %c0_300] : memref<10x10x8xf32, #tpu.memory_space<vmem>>, vector<1x8x8xf32>
    %375 = vector.shape_cast %374 : vector<1x8x8xf32> to vector<8x8xf32>
    %376 = vector.broadcast %373 : vector<1x8xf32> to vector<8x8xf32>
    %377 = arith.mulf %375, %376 : vector<8x8xf32>
    %378 = arith.addf %371, %377 : vector<8x8xf32>
    %c5_301 = arith.constant 5 : index
    %c0_302 = arith.constant 0 : index
    %c0_303 = arith.constant 0 : index
    %379 = vector.load %arg2[%c5_301, %c0_302, %c0_303] : memref<9x1x8xf32, #tpu.memory_space<vmem>>, vector<1x1x8xf32>
    %380 = vector.shape_cast %379 : vector<1x1x8xf32> to vector<1x8xf32>
    %c5_304 = arith.constant 5 : index
    %c2_305 = arith.constant 2 : index
    %c0_306 = arith.constant 0 : index
    %381 = vector.load %arg11[%c5_304, %c2_305, %c0_306] : memref<10x10x8xf32, #tpu.memory_space<vmem>>, vector<1x8x8xf32>
    %382 = vector.shape_cast %381 : vector<1x8x8xf32> to vector<8x8xf32>
    %383 = vector.broadcast %380 : vector<1x8xf32> to vector<8x8xf32>
    %384 = arith.mulf %382, %383 : vector<8x8xf32>
    %385 = arith.addf %378, %384 : vector<8x8xf32>
    %c6_307 = arith.constant 6 : index
    %c0_308 = arith.constant 0 : index
    %c0_309 = arith.constant 0 : index
    %386 = vector.load %arg2[%c6_307, %c0_308, %c0_309] : memref<9x1x8xf32, #tpu.memory_space<vmem>>, vector<1x1x8xf32>
    %387 = vector.shape_cast %386 : vector<1x1x8xf32> to vector<1x8xf32>
    %c6_310 = arith.constant 6 : index
    %c0_311 = arith.constant 0 : index
    %c0_312 = arith.constant 0 : index
    %388 = vector.load %arg11[%c6_310, %c0_311, %c0_312] : memref<10x10x8xf32, #tpu.memory_space<vmem>>, vector<1x8x8xf32>
    %389 = vector.shape_cast %388 : vector<1x8x8xf32> to vector<8x8xf32>
    %390 = vector.broadcast %387 : vector<1x8xf32> to vector<8x8xf32>
    %391 = arith.mulf %389, %390 : vector<8x8xf32>
    %392 = arith.addf %385, %391 : vector<8x8xf32>
    %c7_313 = arith.constant 7 : index
    %c0_314 = arith.constant 0 : index
    %c0_315 = arith.constant 0 : index
    %393 = vector.load %arg2[%c7_313, %c0_314, %c0_315] : memref<9x1x8xf32, #tpu.memory_space<vmem>>, vector<1x1x8xf32>
    %394 = vector.shape_cast %393 : vector<1x1x8xf32> to vector<1x8xf32>
    %c6_316 = arith.constant 6 : index
    %c1_317 = arith.constant 1 : index
    %c0_318 = arith.constant 0 : index
    %395 = vector.load %arg11[%c6_316, %c1_317, %c0_318] : memref<10x10x8xf32, #tpu.memory_space<vmem>>, vector<1x8x8xf32>
    %396 = vector.shape_cast %395 : vector<1x8x8xf32> to vector<8x8xf32>
    %397 = vector.broadcast %394 : vector<1x8xf32> to vector<8x8xf32>
    %398 = arith.mulf %396, %397 : vector<8x8xf32>
    %399 = arith.addf %392, %398 : vector<8x8xf32>
    %c8_319 = arith.constant 8 : index
    %c0_320 = arith.constant 0 : index
    %c0_321 = arith.constant 0 : index
    %400 = vector.load %arg2[%c8_319, %c0_320, %c0_321] : memref<9x1x8xf32, #tpu.memory_space<vmem>>, vector<1x1x8xf32>
    %401 = vector.shape_cast %400 : vector<1x1x8xf32> to vector<1x8xf32>
    %c6_322 = arith.constant 6 : index
    %c2_323 = arith.constant 2 : index
    %c0_324 = arith.constant 0 : index
    %402 = vector.load %arg11[%c6_322, %c2_323, %c0_324] : memref<10x10x8xf32, #tpu.memory_space<vmem>>, vector<1x8x8xf32>
    %403 = vector.shape_cast %402 : vector<1x8x8xf32> to vector<8x8xf32>
    %404 = vector.broadcast %401 : vector<1x8xf32> to vector<8x8xf32>
    %405 = arith.mulf %403, %404 : vector<8x8xf32>
    %406 = arith.addf %399, %405 : vector<8x8xf32>
    %407 = vector.broadcast %50 : vector<1x8xf32> to vector<8x8xf32>
    %408 = arith.addf %406, %407 : vector<8x8xf32>
    %409 = arith.negf %408 : vector<8x8xf32>
    %410 = math.exp %409 : vector<8x8xf32>
    %cst_325 = arith.constant 1.000000e+00 : f32
    %411 = vector.broadcast %cst_325 : f32 to vector<8x8xf32>
    %412 = arith.addf %411, %410 : vector<8x8xf32>
    %413 = arith.divf %411, %412 : vector<8x8xf32>
    %414 = arith.mulf %408, %413 : vector<8x8xf32>
    %c32_326 = arith.constant 32 : index
    %c0_327 = arith.constant 0 : index
    %415 = vector.load %arg12[%c32_326, %c0_327] : memref<64x8xf32, #tpu.memory_space<vmem>>, vector<8x8xf32>
    tpu.vector_store %arg12[%c32_326, %c0_327], %414 {strides = array<i32>} : memref<64x8xf32, #tpu.memory_space<vmem>>, vector<8x8xf32>,
    %cst_328 = arith.constant 0.000000e+00 : f32
    %416 = vector.broadcast %cst_328 : f32 to vector<8x8xf32>
    %c0_329 = arith.constant 0 : index
    %c0_330 = arith.constant 0 : index
    %c0_331 = arith.constant 0 : index
    %417 = vector.load %arg2[%c0_329, %c0_330, %c0_331] : memref<9x1x8xf32, #tpu.memory_space<vmem>>, vector<1x1x8xf32>
    %418 = vector.shape_cast %417 : vector<1x1x8xf32> to vector<1x8xf32>
    %c5_332 = arith.constant 5 : index
    %c0_333 = arith.constant 0 : index
    %c0_334 = arith.constant 0 : index
    %419 = vector.load %arg11[%c5_332, %c0_333, %c0_334] : memref<10x10x8xf32, #tpu.memory_space<vmem>>, vector<1x8x8xf32>
    %420 = vector.shape_cast %419 : vector<1x8x8xf32> to vector<8x8xf32>
    %421 = vector.broadcast %418 : vector<1x8xf32> to vector<8x8xf32>
    %422 = arith.mulf %420, %421 : vector<8x8xf32>
    %423 = arith.addf %416, %422 : vector<8x8xf32>
    %c1_335 = arith.constant 1 : index
    %c0_336 = arith.constant 0 : index
    %c0_337 = arith.constant 0 : index
    %424 = vector.load %arg2[%c1_335, %c0_336, %c0_337] : memref<9x1x8xf32, #tpu.memory_space<vmem>>, vector<1x1x8xf32>
    %425 = vector.shape_cast %424 : vector<1x1x8xf32> to vector<1x8xf32>
    %c5_338 = arith.constant 5 : index
    %c1_339 = arith.constant 1 : index
    %c0_340 = arith.constant 0 : index
    %426 = vector.load %arg11[%c5_338, %c1_339, %c0_340] : memref<10x10x8xf32, #tpu.memory_space<vmem>>, vector<1x8x8xf32>
    %427 = vector.shape_cast %426 : vector<1x8x8xf32> to vector<8x8xf32>
    %428 = vector.broadcast %425 : vector<1x8xf32> to vector<8x8xf32>
    %429 = arith.mulf %427, %428 : vector<8x8xf32>
    %430 = arith.addf %423, %429 : vector<8x8xf32>
    %c2_341 = arith.constant 2 : index
    %c0_342 = arith.constant 0 : index
    %c0_343 = arith.constant 0 : index
    %431 = vector.load %arg2[%c2_341, %c0_342, %c0_343] : memref<9x1x8xf32, #tpu.memory_space<vmem>>, vector<1x1x8xf32>
    %432 = vector.shape_cast %431 : vector<1x1x8xf32> to vector<1x8xf32>
    %c5_344 = arith.constant 5 : index
    %c2_345 = arith.constant 2 : index
    %c0_346 = arith.constant 0 : index
    %433 = vector.load %arg11[%c5_344, %c2_345, %c0_346] : memref<10x10x8xf32, #tpu.memory_space<vmem>>, vector<1x8x8xf32>
    %434 = vector.shape_cast %433 : vector<1x8x8xf32> to vector<8x8xf32>
    %435 = vector.broadcast %432 : vector<1x8xf32> to vector<8x8xf32>
    %436 = arith.mulf %434, %435 : vector<8x8xf32>
    %437 = arith.addf %430, %436 : vector<8x8xf32>
    %c3_347 = arith.constant 3 : index
    %c0_348 = arith.constant 0 : index
    %c0_349 = arith.constant 0 : index
    %438 = vector.load %arg2[%c3_347, %c0_348, %c0_349] : memref<9x1x8xf32, #tpu.memory_space<vmem>>, vector<1x1x8xf32>
    %439 = vector.shape_cast %438 : vector<1x1x8xf32> to vector<1x8xf32>
    %c6_350 = arith.constant 6 : index
    %c0_351 = arith.constant 0 : index
    %c0_352 = arith.constant 0 : index
    %440 = vector.load %arg11[%c6_350, %c0_351, %c0_352] : memref<10x10x8xf32, #tpu.memory_space<vmem>>, vector<1x8x8xf32>
    %441 = vector.shape_cast %440 : vector<1x8x8xf32> to vector<8x8xf32>
    %442 = vector.broadcast %439 : vector<1x8xf32> to vector<8x8xf32>
    %443 = arith.mulf %441, %442 : vector<8x8xf32>
    %444 = arith.addf %437, %443 : vector<8x8xf32>
    %c4_353 = arith.constant 4 : index
    %c0_354 = arith.constant 0 : index
    %c0_355 = arith.constant 0 : index
    %445 = vector.load %arg2[%c4_353, %c0_354, %c0_355] : memref<9x1x8xf32, #tpu.memory_space<vmem>>, vector<1x1x8xf32>
    %446 = vector.shape_cast %445 : vector<1x1x8xf32> to vector<1x8xf32>
    %c6_356 = arith.constant 6 : index
    %c1_357 = arith.constant 1 : index
    %c0_358 = arith.constant 0 : index
    %447 = vector.load %arg11[%c6_356, %c1_357, %c0_358] : memref<10x10x8xf32, #tpu.memory_space<vmem>>, vector<1x8x8xf32>
    %448 = vector.shape_cast %447 : vector<1x8x8xf32> to vector<8x8xf32>
    %449 = vector.broadcast %446 : vector<1x8xf32> to vector<8x8xf32>
    %450 = arith.mulf %448, %449 : vector<8x8xf32>
    %451 = arith.addf %444, %450 : vector<8x8xf32>
    %c5_359 = arith.constant 5 : index
    %c0_360 = arith.constant 0 : index
    %c0_361 = arith.constant 0 : index
    %452 = vector.load %arg2[%c5_359, %c0_360, %c0_361] : memref<9x1x8xf32, #tpu.memory_space<vmem>>, vector<1x1x8xf32>
    %453 = vector.shape_cast %452 : vector<1x1x8xf32> to vector<1x8xf32>
    %c6_362 = arith.constant 6 : index
    %c2_363 = arith.constant 2 : index
    %c0_364 = arith.constant 0 : index
    %454 = vector.load %arg11[%c6_362, %c2_363, %c0_364] : memref<10x10x8xf32, #tpu.memory_space<vmem>>, vector<1x8x8xf32>
    %455 = vector.shape_cast %454 : vector<1x8x8xf32> to vector<8x8xf32>
    %456 = vector.broadcast %453 : vector<1x8xf32> to vector<8x8xf32>
    %457 = arith.mulf %455, %456 : vector<8x8xf32>
    %458 = arith.addf %451, %457 : vector<8x8xf32>
    %c6_365 = arith.constant 6 : index
    %c0_366 = arith.constant 0 : index
    %c0_367 = arith.constant 0 : index
    %459 = vector.load %arg2[%c6_365, %c0_366, %c0_367] : memref<9x1x8xf32, #tpu.memory_space<vmem>>, vector<1x1x8xf32>
    %460 = vector.shape_cast %459 : vector<1x1x8xf32> to vector<1x8xf32>
    %c7_368 = arith.constant 7 : index
    %c0_369 = arith.constant 0 : index
    %c0_370 = arith.constant 0 : index
    %461 = vector.load %arg11[%c7_368, %c0_369, %c0_370] : memref<10x10x8xf32, #tpu.memory_space<vmem>>, vector<1x8x8xf32>
    %462 = vector.shape_cast %461 : vector<1x8x8xf32> to vector<8x8xf32>
    %463 = vector.broadcast %460 : vector<1x8xf32> to vector<8x8xf32>
    %464 = arith.mulf %462, %463 : vector<8x8xf32>
    %465 = arith.addf %458, %464 : vector<8x8xf32>
    %c7_371 = arith.constant 7 : index
    %c0_372 = arith.constant 0 : index
    %c0_373 = arith.constant 0 : index
    %466 = vector.load %arg2[%c7_371, %c0_372, %c0_373] : memref<9x1x8xf32, #tpu.memory_space<vmem>>, vector<1x1x8xf32>
    %467 = vector.shape_cast %466 : vector<1x1x8xf32> to vector<1x8xf32>
    %c7_374 = arith.constant 7 : index
    %c1_375 = arith.constant 1 : index
    %c0_376 = arith.constant 0 : index
    %468 = vector.load %arg11[%c7_374, %c1_375, %c0_376] : memref<10x10x8xf32, #tpu.memory_space<vmem>>, vector<1x8x8xf32>
    %469 = vector.shape_cast %468 : vector<1x8x8xf32> to vector<8x8xf32>
    %470 = vector.broadcast %467 : vector<1x8xf32> to vector<8x8xf32>
    %471 = arith.mulf %469, %470 : vector<8x8xf32>
    %472 = arith.addf %465, %471 : vector<8x8xf32>
    %c8_377 = arith.constant 8 : index
    %c0_378 = arith.constant 0 : index
    %c0_379 = arith.constant 0 : index
    %473 = vector.load %arg2[%c8_377, %c0_378, %c0_379] : memref<9x1x8xf32, #tpu.memory_space<vmem>>, vector<1x1x8xf32>
    %474 = vector.shape_cast %473 : vector<1x1x8xf32> to vector<1x8xf32>
    %c7_380 = arith.constant 7 : index
    %c2_381 = arith.constant 2 : index
    %c0_382 = arith.constant 0 : index
    %475 = vector.load %arg11[%c7_380, %c2_381, %c0_382] : memref<10x10x8xf32, #tpu.memory_space<vmem>>, vector<1x8x8xf32>
    %476 = vector.shape_cast %475 : vector<1x8x8xf32> to vector<8x8xf32>
    %477 = vector.broadcast %474 : vector<1x8xf32> to vector<8x8xf32>
    %478 = arith.mulf %476, %477 : vector<8x8xf32>
    %479 = arith.addf %472, %478 : vector<8x8xf32>
    %480 = vector.broadcast %50 : vector<1x8xf32> to vector<8x8xf32>
    %481 = arith.addf %479, %480 : vector<8x8xf32>
    %482 = arith.negf %481 : vector<8x8xf32>
    %483 = math.exp %482 : vector<8x8xf32>
    %cst_383 = arith.constant 1.000000e+00 : f32
    %484 = vector.broadcast %cst_383 : f32 to vector<8x8xf32>
    %485 = arith.addf %484, %483 : vector<8x8xf32>
    %486 = arith.divf %484, %485 : vector<8x8xf32>
    %487 = arith.mulf %481, %486 : vector<8x8xf32>
    %c40_384 = arith.constant 40 : index
    %c0_385 = arith.constant 0 : index
    %488 = vector.load %arg12[%c40_384, %c0_385] : memref<64x8xf32, #tpu.memory_space<vmem>>, vector<8x8xf32>
    tpu.vector_store %arg12[%c40_384, %c0_385], %487 {strides = array<i32>} : memref<64x8xf32, #tpu.memory_space<vmem>>, vector<8x8xf32>,
    %cst_386 = arith.constant 0.000000e+00 : f32
    %489 = vector.broadcast %cst_386 : f32 to vector<8x8xf32>
    %c0_387 = arith.constant 0 : index
    %c0_388 = arith.constant 0 : index
    %c0_389 = arith.constant 0 : index
    %490 = vector.load %arg2[%c0_387, %c0_388, %c0_389] : memref<9x1x8xf32, #tpu.memory_space<vmem>>, vector<1x1x8xf32>
    %491 = vector.shape_cast %490 : vector<1x1x8xf32> to vector<1x8xf32>
    %c6_390 = arith.constant 6 : index
    %c0_391 = arith.constant 0 : index
    %c0_392 = arith.constant 0 : index
    %492 = vector.load %arg11[%c6_390, %c0_391, %c0_392] : memref<10x10x8xf32, #tpu.memory_space<vmem>>, vector<1x8x8xf32>
    %493 = vector.shape_cast %492 : vector<1x8x8xf32> to vector<8x8xf32>
    %494 = vector.broadcast %491 : vector<1x8xf32> to vector<8x8xf32>
    %495 = arith.mulf %493, %494 : vector<8x8xf32>
    %496 = arith.addf %489, %495 : vector<8x8xf32>
    %c1_393 = arith.constant 1 : index
    %c0_394 = arith.constant 0 : index
    %c0_395 = arith.constant 0 : index
    %497 = vector.load %arg2[%c1_393, %c0_394, %c0_395] : memref<9x1x8xf32, #tpu.memory_space<vmem>>, vector<1x1x8xf32>
    %498 = vector.shape_cast %497 : vector<1x1x8xf32> to vector<1x8xf32>
    %c6_396 = arith.constant 6 : index
    %c1_397 = arith.constant 1 : index
    %c0_398 = arith.constant 0 : index
    %499 = vector.load %arg11[%c6_396, %c1_397, %c0_398] : memref<10x10x8xf32, #tpu.memory_space<vmem>>, vector<1x8x8xf32>
    %500 = vector.shape_cast %499 : vector<1x8x8xf32> to vector<8x8xf32>
    %501 = vector.broadcast %498 : vector<1x8xf32> to vector<8x8xf32>
    %502 = arith.mulf %500, %501 : vector<8x8xf32>
    %503 = arith.addf %496, %502 : vector<8x8xf32>
    %c2_399 = arith.constant 2 : index
    %c0_400 = arith.constant 0 : index
    %c0_401 = arith.constant 0 : index
    %504 = vector.load %arg2[%c2_399, %c0_400, %c0_401] : memref<9x1x8xf32, #tpu.memory_space<vmem>>, vector<1x1x8xf32>
    %505 = vector.shape_cast %504 : vector<1x1x8xf32> to vector<1x8xf32>
    %c6_402 = arith.constant 6 : index
    %c2_403 = arith.constant 2 : index
    %c0_404 = arith.constant 0 : index
    %506 = vector.load %arg11[%c6_402, %c2_403, %c0_404] : memref<10x10x8xf32, #tpu.memory_space<vmem>>, vector<1x8x8xf32>
    %507 = vector.shape_cast %506 : vector<1x8x8xf32> to vector<8x8xf32>
    %508 = vector.broadcast %505 : vector<1x8xf32> to vector<8x8xf32>
    %509 = arith.mulf %507, %508 : vector<8x8xf32>
    %510 = arith.addf %503, %509 : vector<8x8xf32>
    %c3_405 = arith.constant 3 : index
    %c0_406 = arith.constant 0 : index
    %c0_407 = arith.constant 0 : index
    %511 = vector.load %arg2[%c3_405, %c0_406, %c0_407] : memref<9x1x8xf32, #tpu.memory_space<vmem>>, vector<1x1x8xf32>
    %512 = vector.shape_cast %511 : vector<1x1x8xf32> to vector<1x8xf32>
    %c7_408 = arith.constant 7 : index
    %c0_409 = arith.constant 0 : index
    %c0_410 = arith.constant 0 : index
    %513 = vector.load %arg11[%c7_408, %c0_409, %c0_410] : memref<10x10x8xf32, #tpu.memory_space<vmem>>, vector<1x8x8xf32>
    %514 = vector.shape_cast %513 : vector<1x8x8xf32> to vector<8x8xf32>
    %515 = vector.broadcast %512 : vector<1x8xf32> to vector<8x8xf32>
    %516 = arith.mulf %514, %515 : vector<8x8xf32>
    %517 = arith.addf %510, %516 : vector<8x8xf32>
    %c4_411 = arith.constant 4 : index
    %c0_412 = arith.constant 0 : index
    %c0_413 = arith.constant 0 : index
    %518 = vector.load %arg2[%c4_411, %c0_412, %c0_413] : memref<9x1x8xf32, #tpu.memory_space<vmem>>, vector<1x1x8xf32>
    %519 = vector.shape_cast %518 : vector<1x1x8xf32> to vector<1x8xf32>
    %c7_414 = arith.constant 7 : index
    %c1_415 = arith.constant 1 : index
    %c0_416 = arith.constant 0 : index
    %520 = vector.load %arg11[%c7_414, %c1_415, %c0_416] : memref<10x10x8xf32, #tpu.memory_space<vmem>>, vector<1x8x8xf32>
    %521 = vector.shape_cast %520 : vector<1x8x8xf32> to vector<8x8xf32>
    %522 = vector.broadcast %519 : vector<1x8xf32> to vector<8x8xf32>
    %523 = arith.mulf %521, %522 : vector<8x8xf32>
    %524 = arith.addf %517, %523 : vector<8x8xf32>
    %c5_417 = arith.constant 5 : index
    %c0_418 = arith.constant 0 : index
    %c0_419 = arith.constant 0 : index
    %525 = vector.load %arg2[%c5_417, %c0_418, %c0_419] : memref<9x1x8xf32, #tpu.memory_space<vmem>>, vector<1x1x8xf32>
    %526 = vector.shape_cast %525 : vector<1x1x8xf32> to vector<1x8xf32>
    %c7_420 = arith.constant 7 : index
    %c2_421 = arith.constant 2 : index
    %c0_422 = arith.constant 0 : index
    %527 = vector.load %arg11[%c7_420, %c2_421, %c0_422] : memref<10x10x8xf32, #tpu.memory_space<vmem>>, vector<1x8x8xf32>
    %528 = vector.shape_cast %527 : vector<1x8x8xf32> to vector<8x8xf32>
    %529 = vector.broadcast %526 : vector<1x8xf32> to vector<8x8xf32>
    %530 = arith.mulf %528, %529 : vector<8x8xf32>
    %531 = arith.addf %524, %530 : vector<8x8xf32>
    %c6_423 = arith.constant 6 : index
    %c0_424 = arith.constant 0 : index
    %c0_425 = arith.constant 0 : index
    %532 = vector.load %arg2[%c6_423, %c0_424, %c0_425] : memref<9x1x8xf32, #tpu.memory_space<vmem>>, vector<1x1x8xf32>
    %533 = vector.shape_cast %532 : vector<1x1x8xf32> to vector<1x8xf32>
    %c8_426 = arith.constant 8 : index
    %c0_427 = arith.constant 0 : index
    %c0_428 = arith.constant 0 : index
    %534 = vector.load %arg11[%c8_426, %c0_427, %c0_428] : memref<10x10x8xf32, #tpu.memory_space<vmem>>, vector<1x8x8xf32>
    %535 = vector.shape_cast %534 : vector<1x8x8xf32> to vector<8x8xf32>
    %536 = vector.broadcast %533 : vector<1x8xf32> to vector<8x8xf32>
    %537 = arith.mulf %535, %536 : vector<8x8xf32>
    %538 = arith.addf %531, %537 : vector<8x8xf32>
    %c7_429 = arith.constant 7 : index
    %c0_430 = arith.constant 0 : index
    %c0_431 = arith.constant 0 : index
    %539 = vector.load %arg2[%c7_429, %c0_430, %c0_431] : memref<9x1x8xf32, #tpu.memory_space<vmem>>, vector<1x1x8xf32>
    %540 = vector.shape_cast %539 : vector<1x1x8xf32> to vector<1x8xf32>
    %c8_432 = arith.constant 8 : index
    %c1_433 = arith.constant 1 : index
    %c0_434 = arith.constant 0 : index
    %541 = vector.load %arg11[%c8_432, %c1_433, %c0_434] : memref<10x10x8xf32, #tpu.memory_space<vmem>>, vector<1x8x8xf32>
    %542 = vector.shape_cast %541 : vector<1x8x8xf32> to vector<8x8xf32>
    %543 = vector.broadcast %540 : vector<1x8xf32> to vector<8x8xf32>
    %544 = arith.mulf %542, %543 : vector<8x8xf32>
    %545 = arith.addf %538, %544 : vector<8x8xf32>
    %c8_435 = arith.constant 8 : index
    %c0_436 = arith.constant 0 : index
    %c0_437 = arith.constant 0 : index
    %546 = vector.load %arg2[%c8_435, %c0_436, %c0_437] : memref<9x1x8xf32, #tpu.memory_space<vmem>>, vector<1x1x8xf32>
    %547 = vector.shape_cast %546 : vector<1x1x8xf32> to vector<1x8xf32>
    %c8_438 = arith.constant 8 : index
    %c2_439 = arith.constant 2 : index
    %c0_440 = arith.constant 0 : index
    %548 = vector.load %arg11[%c8_438, %c2_439, %c0_440] : memref<10x10x8xf32, #tpu.memory_space<vmem>>, vector<1x8x8xf32>
    %549 = vector.shape_cast %548 : vector<1x8x8xf32> to vector<8x8xf32>
    %550 = vector.broadcast %547 : vector<1x8xf32> to vector<8x8xf32>
    %551 = arith.mulf %549, %550 : vector<8x8xf32>
    %552 = arith.addf %545, %551 : vector<8x8xf32>
    %553 = vector.broadcast %50 : vector<1x8xf32> to vector<8x8xf32>
    %554 = arith.addf %552, %553 : vector<8x8xf32>
    %555 = arith.negf %554 : vector<8x8xf32>
    %556 = math.exp %555 : vector<8x8xf32>
    %cst_441 = arith.constant 1.000000e+00 : f32
    %557 = vector.broadcast %cst_441 : f32 to vector<8x8xf32>
    %558 = arith.addf %557, %556 : vector<8x8xf32>
    %559 = arith.divf %557, %558 : vector<8x8xf32>
    %560 = arith.mulf %554, %559 : vector<8x8xf32>
    %c48_442 = arith.constant 48 : index
    %c0_443 = arith.constant 0 : index
    %561 = vector.load %arg12[%c48_442, %c0_443] : memref<64x8xf32, #tpu.memory_space<vmem>>, vector<8x8xf32>
    tpu.vector_store %arg12[%c48_442, %c0_443], %560 {strides = array<i32>} : memref<64x8xf32, #tpu.memory_space<vmem>>, vector<8x8xf32>,
    %cst_444 = arith.constant 0.000000e+00 : f32
    %562 = vector.broadcast %cst_444 : f32 to vector<8x8xf32>
    %c0_445 = arith.constant 0 : index
    %c0_446 = arith.constant 0 : index
    %c0_447 = arith.constant 0 : index
    %563 = vector.load %arg2[%c0_445, %c0_446, %c0_447] : memref<9x1x8xf32, #tpu.memory_space<vmem>>, vector<1x1x8xf32>
    %564 = vector.shape_cast %563 : vector<1x1x8xf32> to vector<1x8xf32>
    %c7_448 = arith.constant 7 : index
    %c0_449 = arith.constant 0 : index
    %c0_450 = arith.constant 0 : index
    %565 = vector.load %arg11[%c7_448, %c0_449, %c0_450] : memref<10x10x8xf32, #tpu.memory_space<vmem>>, vector<1x8x8xf32>
    %566 = vector.shape_cast %565 : vector<1x8x8xf32> to vector<8x8xf32>
    %567 = vector.broadcast %564 : vector<1x8xf32> to vector<8x8xf32>
    %568 = arith.mulf %566, %567 : vector<8x8xf32>
    %569 = arith.addf %562, %568 : vector<8x8xf32>
    %c1_451 = arith.constant 1 : index
    %c0_452 = arith.constant 0 : index
    %c0_453 = arith.constant 0 : index
    %570 = vector.load %arg2[%c1_451, %c0_452, %c0_453] : memref<9x1x8xf32, #tpu.memory_space<vmem>>, vector<1x1x8xf32>
    %571 = vector.shape_cast %570 : vector<1x1x8xf32> to vector<1x8xf32>
    %c7_454 = arith.constant 7 : index
    %c1_455 = arith.constant 1 : index
    %c0_456 = arith.constant 0 : index
    %572 = vector.load %arg11[%c7_454, %c1_455, %c0_456] : memref<10x10x8xf32, #tpu.memory_space<vmem>>, vector<1x8x8xf32>
    %573 = vector.shape_cast %572 : vector<1x8x8xf32> to vector<8x8xf32>
    %574 = vector.broadcast %571 : vector<1x8xf32> to vector<8x8xf32>
    %575 = arith.mulf %573, %574 : vector<8x8xf32>
    %576 = arith.addf %569, %575 : vector<8x8xf32>
    %c2_457 = arith.constant 2 : index
    %c0_458 = arith.constant 0 : index
    %c0_459 = arith.constant 0 : index
    %577 = vector.load %arg2[%c2_457, %c0_458, %c0_459] : memref<9x1x8xf32, #tpu.memory_space<vmem>>, vector<1x1x8xf32>
    %578 = vector.shape_cast %577 : vector<1x1x8xf32> to vector<1x8xf32>
    %c7_460 = arith.constant 7 : index
    %c2_461 = arith.constant 2 : index
    %c0_462 = arith.constant 0 : index
    %579 = vector.load %arg11[%c7_460, %c2_461, %c0_462] : memref<10x10x8xf32, #tpu.memory_space<vmem>>, vector<1x8x8xf32>
    %580 = vector.shape_cast %579 : vector<1x8x8xf32> to vector<8x8xf32>
    %581 = vector.broadcast %578 : vector<1x8xf32> to vector<8x8xf32>
    %582 = arith.mulf %580, %581 : vector<8x8xf32>
    %583 = arith.addf %576, %582 : vector<8x8xf32>
    %c3_463 = arith.constant 3 : index
    %c0_464 = arith.constant 0 : index
    %c0_465 = arith.constant 0 : index
    %584 = vector.load %arg2[%c3_463, %c0_464, %c0_465] : memref<9x1x8xf32, #tpu.memory_space<vmem>>, vector<1x1x8xf32>
    %585 = vector.shape_cast %584 : vector<1x1x8xf32> to vector<1x8xf32>
    %c8_466 = arith.constant 8 : index
    %c0_467 = arith.constant 0 : index
    %c0_468 = arith.constant 0 : index
    %586 = vector.load %arg11[%c8_466, %c0_467, %c0_468] : memref<10x10x8xf32, #tpu.memory_space<vmem>>, vector<1x8x8xf32>
    %587 = vector.shape_cast %586 : vector<1x8x8xf32> to vector<8x8xf32>
    %588 = vector.broadcast %585 : vector<1x8xf32> to vector<8x8xf32>
    %589 = arith.mulf %587, %588 : vector<8x8xf32>
    %590 = arith.addf %583, %589 : vector<8x8xf32>
    %c4_469 = arith.constant 4 : index
    %c0_470 = arith.constant 0 : index
    %c0_471 = arith.constant 0 : index
    %591 = vector.load %arg2[%c4_469, %c0_470, %c0_471] : memref<9x1x8xf32, #tpu.memory_space<vmem>>, vector<1x1x8xf32>
    %592 = vector.shape_cast %591 : vector<1x1x8xf32> to vector<1x8xf32>
    %c8_472 = arith.constant 8 : index
    %c1_473 = arith.constant 1 : index
    %c0_474 = arith.constant 0 : index
    %593 = vector.load %arg11[%c8_472, %c1_473, %c0_474] : memref<10x10x8xf32, #tpu.memory_space<vmem>>, vector<1x8x8xf32>
    %594 = vector.shape_cast %593 : vector<1x8x8xf32> to vector<8x8xf32>
    %595 = vector.broadcast %592 : vector<1x8xf32> to vector<8x8xf32>
    %596 = arith.mulf %594, %595 : vector<8x8xf32>
    %597 = arith.addf %590, %596 : vector<8x8xf32>
    %c5_475 = arith.constant 5 : index
    %c0_476 = arith.constant 0 : index
    %c0_477 = arith.constant 0 : index
    %598 = vector.load %arg2[%c5_475, %c0_476, %c0_477] : memref<9x1x8xf32, #tpu.memory_space<vmem>>, vector<1x1x8xf32>
    %599 = vector.shape_cast %598 : vector<1x1x8xf32> to vector<1x8xf32>
    %c8_478 = arith.constant 8 : index
    %c2_479 = arith.constant 2 : index
    %c0_480 = arith.constant 0 : index
    %600 = vector.load %arg11[%c8_478, %c2_479, %c0_480] : memref<10x10x8xf32, #tpu.memory_space<vmem>>, vector<1x8x8xf32>
    %601 = vector.shape_cast %600 : vector<1x8x8xf32> to vector<8x8xf32>
    %602 = vector.broadcast %599 : vector<1x8xf32> to vector<8x8xf32>
    %603 = arith.mulf %601, %602 : vector<8x8xf32>
    %604 = arith.addf %597, %603 : vector<8x8xf32>
    %c6_481 = arith.constant 6 : index
    %c0_482 = arith.constant 0 : index
    %c0_483 = arith.constant 0 : index
    %605 = vector.load %arg2[%c6_481, %c0_482, %c0_483] : memref<9x1x8xf32, #tpu.memory_space<vmem>>, vector<1x1x8xf32>
    %606 = vector.shape_cast %605 : vector<1x1x8xf32> to vector<1x8xf32>
    %c9 = arith.constant 9 : index
    %c0_484 = arith.constant 0 : index
    %c0_485 = arith.constant 0 : index
    %607 = vector.load %arg11[%c9, %c0_484, %c0_485] : memref<10x10x8xf32, #tpu.memory_space<vmem>>, vector<1x8x8xf32>
    %608 = vector.shape_cast %607 : vector<1x8x8xf32> to vector<8x8xf32>
    %609 = vector.broadcast %606 : vector<1x8xf32> to vector<8x8xf32>
    %610 = arith.mulf %608, %609 : vector<8x8xf32>
    %611 = arith.addf %604, %610 : vector<8x8xf32>
    %c7_486 = arith.constant 7 : index
    %c0_487 = arith.constant 0 : index
    %c0_488 = arith.constant 0 : index
    %612 = vector.load %arg2[%c7_486, %c0_487, %c0_488] : memref<9x1x8xf32, #tpu.memory_space<vmem>>, vector<1x1x8xf32>
    %613 = vector.shape_cast %612 : vector<1x1x8xf32> to vector<1x8xf32>
    %c9_489 = arith.constant 9 : index
    %c1_490 = arith.constant 1 : index
    %c0_491 = arith.constant 0 : index
    %614 = vector.load %arg11[%c9_489, %c1_490, %c0_491] : memref<10x10x8xf32, #tpu.memory_space<vmem>>, vector<1x8x8xf32>
    %615 = vector.shape_cast %614 : vector<1x8x8xf32> to vector<8x8xf32>
    %616 = vector.broadcast %613 : vector<1x8xf32> to vector<8x8xf32>
    %617 = arith.mulf %615, %616 : vector<8x8xf32>
    %618 = arith.addf %611, %617 : vector<8x8xf32>
    %c8_492 = arith.constant 8 : index
    %c0_493 = arith.constant 0 : index
    %c0_494 = arith.constant 0 : index
    %619 = vector.load %arg2[%c8_492, %c0_493, %c0_494] : memref<9x1x8xf32, #tpu.memory_space<vmem>>, vector<1x1x8xf32>
    %620 = vector.shape_cast %619 : vector<1x1x8xf32> to vector<1x8xf32>
    %c9_495 = arith.constant 9 : index
    %c2_496 = arith.constant 2 : index
    %c0_497 = arith.constant 0 : index
    %621 = vector.load %arg11[%c9_495, %c2_496, %c0_497] : memref<10x10x8xf32, #tpu.memory_space<vmem>>, vector<1x8x8xf32>
    %622 = vector.shape_cast %621 : vector<1x8x8xf32> to vector<8x8xf32>
    %623 = vector.broadcast %620 : vector<1x8xf32> to vector<8x8xf32>
    %624 = arith.mulf %622, %623 : vector<8x8xf32>
    %625 = arith.addf %618, %624 : vector<8x8xf32>
    %626 = vector.broadcast %50 : vector<1x8xf32> to vector<8x8xf32>
    %627 = arith.addf %625, %626 : vector<8x8xf32>
    %628 = arith.negf %627 : vector<8x8xf32>
    %629 = math.exp %628 : vector<8x8xf32>
    %cst_498 = arith.constant 1.000000e+00 : f32
    %630 = vector.broadcast %cst_498 : f32 to vector<8x8xf32>
    %631 = arith.addf %630, %629 : vector<8x8xf32>
    %632 = arith.divf %630, %631 : vector<8x8xf32>
    %633 = arith.mulf %627, %632 : vector<8x8xf32>
    %c56_499 = arith.constant 56 : index
    %c0_500 = arith.constant 0 : index
    %634 = vector.load %arg12[%c56_499, %c0_500] : memref<64x8xf32, #tpu.memory_space<vmem>>, vector<8x8xf32>
    tpu.vector_store %arg12[%c56_499, %c0_500], %633 {strides = array<i32>} : memref<64x8xf32, #tpu.memory_space<vmem>>, vector<8x8xf32>,
    %c0_501 = arith.constant 0 : index
    %c0_502 = arith.constant 0 : index
    %635 = vector.load %arg12[%c0_501, %c0_502] : memref<64x8xf32, #tpu.memory_space<vmem>>, vector<64x8xf32>
    %cst_503 = arith.constant dense<0.000000e+00> : vector<8xf32>
    %636 = vector.multi_reduction <add>, %635, %cst_503 [0] : vector<64x8xf32> to vector<8xf32>
    %637 = vector.shape_cast %636 : vector<8xf32> to vector<1x8xf32>
    %cst_504 = arith.constant 6.400000e+01 : f32
    %638 = vector.broadcast %cst_504 : f32 to vector<1x8xf32>
    %639 = arith.divf %637, %638 : vector<1x8xf32>
    %c0_505 = arith.constant 0 : index
    %c0_506 = arith.constant 0 : index
    %640 = vector.load %arg4[%c0_505, %c0_506] : memref<8x2xf32, #tpu.memory_space<vmem>>, vector<8x2xf32>
    %cst_507 = arith.constant dense<0.000000e+00> : vector<1x2xf32>
    %641 = tpu.matmul %639, %640, %cst_507 {dimension_numbers = #tpu.dot_dimension_numbers<[1], [0], [0], [1], [0, 0, 1, 1], [], []>} : vector<1x8xf32>, vector<8x2xf32>, vector<1x2xf32> -> vector<1x2xf32>
    %c0_508 = arith.constant 0 : index
    %c0_509 = arith.constant 0 : index
    %642 = vector.load %arg5[%c0_508, %c0_509] : memref<1x2xf32, #tpu.memory_space<vmem>>, vector<1x2xf32>
    %643 = arith.addf %641, %642 : vector<1x2xf32>
    %644 = arith.negf %643 : vector<1x2xf32>
    %645 = math.exp %644 : vector<1x2xf32>
    %cst_510 = arith.constant 1.000000e+00 : f32
    %646 = vector.broadcast %cst_510 : f32 to vector<1x2xf32>
    %647 = arith.addf %646, %645 : vector<1x2xf32>
    %648 = arith.divf %646, %647 : vector<1x2xf32>
    %649 = arith.mulf %643, %648 : vector<1x2xf32>
    %c0_511 = arith.constant 0 : index
    %c0_512 = arith.constant 0 : index
    %650 = vector.load %arg6[%c0_511, %c0_512] : memref<2x8xf32, #tpu.memory_space<vmem>>, vector<2x8xf32>
    %cst_513 = arith.constant dense<0.000000e+00> : vector<1x8xf32>
    %651 = tpu.matmul %649, %650, %cst_513 {dimension_numbers = #tpu.dot_dimension_numbers<[1], [0], [0], [1], [0, 0, 1, 1], [], []>} : vector<1x2xf32>, vector<2x8xf32>, vector<1x8xf32> -> vector<1x8xf32>
    %c0_514 = arith.constant 0 : index
    %c0_515 = arith.constant 0 : index
    %652 = vector.load %arg7[%c0_514, %c0_515] : memref<1x8xf32, #tpu.memory_space<vmem>>, vector<1x8xf32>
    %653 = arith.addf %651, %652 : vector<1x8xf32>
    %654 = arith.negf %653 : vector<1x8xf32>
    %655 = math.exp %654 : vector<1x8xf32>
    %cst_516 = arith.constant 1.000000e+00 : f32
    %656 = vector.broadcast %cst_516 : f32 to vector<1x8xf32>
    %657 = arith.addf %656, %655 : vector<1x8xf32>
    %658 = arith.divf %656, %657 : vector<1x8xf32>
    %659 = vector.broadcast %658 : vector<1x8xf32> to vector<64x8xf32>
    %660 = arith.mulf %635, %659 : vector<64x8xf32>
    %661 = arith.truncf %660 : vector<64x8xf32> to vector<64x8xbf16>
    %c0_517 = arith.constant 0 : index
    %c0_518 = arith.constant 0 : index
    %662 = vector.load %arg8[%c0_517, %c0_518] : memref<8x8xbf16, #tpu.memory_space<vmem>>, vector<8x8xbf16>
    %cst_519 = arith.constant dense<0.000000e+00> : vector<64x8xf32>
    %663 = tpu.matmul %661, %662, %cst_519 {dimension_numbers = #tpu.dot_dimension_numbers<[1], [0], [0], [1], [0, 0, 1, 1], [], []>} : vector<64x8xbf16>, vector<8x8xbf16>, vector<64x8xf32> -> vector<64x8xf32>
    %c0_520 = arith.constant 0 : index
    %c0_521 = arith.constant 0 : index
    %664 = vector.load %arg9[%c0_520, %c0_521] : memref<1x8xf32, #tpu.memory_space<vmem>>, vector<1x8xf32>
    %665 = vector.broadcast %664 : vector<1x8xf32> to vector<64x8xf32>
    %666 = arith.addf %663, %665 : vector<64x8xf32>
    %c0_522 = arith.constant 0 : index
    %c0_523 = arith.constant 0 : index
    %c0_524 = arith.constant 0 : index
    %667 = vector.load %arg1[%c0_522, %c0_523, %c0_524] : memref<1x64x8xbf16, #tpu.memory_space<vmem>>, vector<1x64x8xbf16>
    %668 = vector.shape_cast %667 : vector<1x64x8xbf16> to vector<64x8xbf16>
    %669 = arith.extf %668 : vector<64x8xbf16> to vector<64x8xf32>
    %670 = arith.addf %666, %669 : vector<64x8xf32>
    %671 = arith.truncf %670 : vector<64x8xf32> to vector<64x8xbf16>
    %c0_525 = arith.constant 0 : index
    %c0_526 = arith.constant 0 : index
    %c0_527 = arith.constant 0 : index
    %672 = vector.load %arg10[%c0_525, %c0_526, %c0_527] : memref<1x64x8xbf16, #tpu.memory_space<vmem>>, vector<1x64x8xbf16>
    %673 = vector.shape_cast %672 : vector<1x64x8xbf16> to vector<64x8xbf16>
    %674 = vector.shape_cast %671 : vector<64x8xbf16> to vector<1x64x8xbf16>
    tpu.vector_store %arg10[%c0_525, %c0_526, %c0_527], %674 {strides = array<i32>} : memref<1x64x8xbf16, #tpu.memory_space<vmem>>, vector<1x64x8xbf16>,
    return
  }
  func.func @transform_0(%arg0: i32) -> (i32, i32, i32) {
    %c0_i32 = arith.constant 0 : i32
    %c0_i32_0 = arith.constant 0 : i32
    %c0_i32_1 = arith.constant 0 : i32
    return %arg0, %c0_i32, %c0_i32_0 : i32, i32, i32
  }
  func.func @transform_1(%arg0: i32) -> (i32, i32, i32) {
    %c0_i32 = arith.constant 0 : i32
    %c0_i32_0 = arith.constant 0 : i32
    %c0_i32_1 = arith.constant 0 : i32
    %c0_i32_2 = arith.constant 0 : i32
    return %c0_i32, %c0_i32_0, %c0_i32_1 : i32, i32, i32
  }
  func.func @transform_2(%arg0: i32) -> (i32, i32) {
    %c0_i32 = arith.constant 0 : i32
    %c0_i32_0 = arith.constant 0 : i32
    %c0_i32_1 = arith.constant 0 : i32
    return %c0_i32, %c0_i32_0 : i32, i32
  }
  func.func @transform_3(%arg0: i32) -> (i32, i32) {
    %c0_i32 = arith.constant 0 : i32
    %c0_i32_0 = arith.constant 0 : i32
    %c0_i32_1 = arith.constant 0 : i32
    return %c0_i32, %c0_i32_0 : i32, i32
  }
  func.func @transform_4(%arg0: i32) -> (i32, i32) {
    %c0_i32 = arith.constant 0 : i32
    %c0_i32_0 = arith.constant 0 : i32
    %c0_i32_1 = arith.constant 0 : i32
    return %c0_i32, %c0_i32_0 : i32, i32
  }
  func.func @transform_5(%arg0: i32) -> (i32, i32) {
    %c0_i32 = arith.constant 0 : i32
    %c0_i32_0 = arith.constant 0 : i32
    %c0_i32_1 = arith.constant 0 : i32
    return %c0_i32, %c0_i32_0 : i32, i32
  }
  func.func @transform_6(%arg0: i32) -> (i32, i32) {
    %c0_i32 = arith.constant 0 : i32
    %c0_i32_0 = arith.constant 0 : i32
    %c0_i32_1 = arith.constant 0 : i32
    return %c0_i32, %c0_i32_0 : i32, i32
  }
  func.func @transform_7(%arg0: i32) -> (i32, i32) {
    %c0_i32 = arith.constant 0 : i32
    %c0_i32_0 = arith.constant 0 : i32
    %c0_i32_1 = arith.constant 0 : i32
    return %c0_i32, %c0_i32_0 : i32, i32
  }
  func.func @transform_8(%arg0: i32) -> (i32, i32) {
    %c0_i32 = arith.constant 0 : i32
    %c0_i32_0 = arith.constant 0 : i32
    %c0_i32_1 = arith.constant 0 : i32
    return %c0_i32, %c0_i32_0 : i32, i32
  }
  func.func @transform_9(%arg0: i32) -> (i32, i32, i32) {
    %c0_i32 = arith.constant 0 : i32
    %c0_i32_0 = arith.constant 0 : i32
    %c0_i32_1 = arith.constant 0 : i32
    return %arg0, %c0_i32, %c0_i32_0 : i32, i32, i32
  }
}

module attributes {stable_mosaic.version = 11 : i64} {
  func.func @_mbconv_kernel(%arg0: i32, %arg1: memref<1x32x8xbf16, #tpu.memory_space<vmem>>, %arg2: memref<1x32x8xbf16, #tpu.memory_space<vmem>>, %arg3: memref<8x32xbf16, #tpu.memory_space<vmem>>, %arg4: memref<1x32xf32, #tpu.memory_space<vmem>>, %arg5: memref<9x1x32xf32, #tpu.memory_space<vmem>>, %arg6: memref<1x32xf32, #tpu.memory_space<vmem>>, %arg7: memref<32x2xf32, #tpu.memory_space<vmem>>, %arg8: memref<1x2xf32, #tpu.memory_space<vmem>>, %arg9: memref<2x32xf32, #tpu.memory_space<vmem>>, %arg10: memref<1x32xf32, #tpu.memory_space<vmem>>, %arg11: memref<32x16xbf16, #tpu.memory_space<vmem>>, %arg12: memref<1x16xf32, #tpu.memory_space<vmem>>, %arg13: memref<1x16x16xbf16, #tpu.memory_space<vmem>>, %arg14: memref<32x32xf32, #tpu.memory_space<vmem>>, %arg15: memref<32x32xf32, #tpu.memory_space<vmem>>, %arg16: memref<10x5x32xf32, #tpu.memory_space<vmem>>, %arg17: memref<10x4x32xf32, #tpu.memory_space<vmem>>, %arg18: memref<16x32xf32, #tpu.memory_space<vmem>>) attributes {dimension_semantics = [#tpu.dimension_semantics<parallel>], iteration_bounds = array<i64: 2>, scalar_prefetch = 0 : i64, scratch_operands = 5 : i64, tpu.core_type = #tpu.core_type<tc>, window_params = [{transform_indices = @transform_0, window_bounds = array<i64: 1, 32, 8>}, {transform_indices = @transform_1, window_bounds = array<i64: 1, 32, 8>}, {pipeline_mode = #tpu.pipeline_mode<synchronous>, transform_indices = @transform_2, window_bounds = array<i64: 8, 32>}, {pipeline_mode = #tpu.pipeline_mode<synchronous>, transform_indices = @transform_3, window_bounds = array<i64: 1, 32>}, {pipeline_mode = #tpu.pipeline_mode<synchronous>, transform_indices = @transform_4, window_bounds = array<i64: 9, 1, 32>}, {pipeline_mode = #tpu.pipeline_mode<synchronous>, transform_indices = @transform_5, window_bounds = array<i64: 1, 32>}, {pipeline_mode = #tpu.pipeline_mode<synchronous>, transform_indices = @transform_6, window_bounds = array<i64: 32, 2>}, {pipeline_mode = #tpu.pipeline_mode<synchronous>, transform_indices = @transform_7, window_bounds = array<i64: 1, 2>}, {pipeline_mode = #tpu.pipeline_mode<synchronous>, transform_indices = @transform_8, window_bounds = array<i64: 2, 32>}, {pipeline_mode = #tpu.pipeline_mode<synchronous>, transform_indices = @transform_9, window_bounds = array<i64: 1, 32>}, {pipeline_mode = #tpu.pipeline_mode<synchronous>, transform_indices = @transform_10, window_bounds = array<i64: 32, 16>}, {pipeline_mode = #tpu.pipeline_mode<synchronous>, transform_indices = @transform_11, window_bounds = array<i64: 1, 16>}, {transform_indices = @transform_12, window_bounds = array<i64: 1, 16, 16>}]} {
    %c0 = arith.constant 0 : index
    %c0_0 = arith.constant 0 : index
    %c0_1 = arith.constant 0 : index
    %0 = vector.load %arg1[%c0, %c0_0, %c0_1] : memref<1x32x8xbf16, #tpu.memory_space<vmem>>, vector<1x32x8xbf16>
    %1 = vector.shape_cast %0 : vector<1x32x8xbf16> to vector<32x8xbf16>
    %c0_2 = arith.constant 0 : index
    %c0_3 = arith.constant 0 : index
    %2 = vector.load %arg3[%c0_2, %c0_3] : memref<8x32xbf16, #tpu.memory_space<vmem>>, vector<8x32xbf16>
    %cst = arith.constant dense<0.000000e+00> : vector<32x32xf32>
    %3 = tpu.matmul %1, %2, %cst {dimension_numbers = #tpu.dot_dimension_numbers<[1], [0], [0], [1], [0, 0, 1, 1], [], []>} : vector<32x8xbf16>, vector<8x32xbf16>, vector<32x32xf32> -> vector<32x32xf32>
    %c0_4 = arith.constant 0 : index
    %c0_5 = arith.constant 0 : index
    %4 = vector.load %arg4[%c0_4, %c0_5] : memref<1x32xf32, #tpu.memory_space<vmem>>, vector<1x32xf32>
    %5 = vector.broadcast %4 : vector<1x32xf32> to vector<32x32xf32>
    %6 = arith.addf %3, %5 : vector<32x32xf32>
    %7 = arith.negf %6 : vector<32x32xf32>
    %8 = math.exp %7 : vector<32x32xf32>
    %cst_6 = arith.constant 1.000000e+00 : f32
    %9 = vector.broadcast %cst_6 : f32 to vector<32x32xf32>
    %10 = arith.addf %9, %8 : vector<32x32xf32>
    %11 = arith.divf %9, %10 : vector<32x32xf32>
    %12 = arith.mulf %6, %11 : vector<32x32xf32>
    %c0_7 = arith.constant 0 : index
    %c0_8 = arith.constant 0 : index
    %13 = vector.load %arg14[%c0_7, %c0_8] : memref<32x32xf32, #tpu.memory_space<vmem>>, vector<32x32xf32>
    tpu.vector_store %arg14[%c0_7, %c0_8], %12 {strides = array<i32>} : memref<32x32xf32, #tpu.memory_space<vmem>>, vector<32x32xf32>,
    %c0_9 = arith.constant 0 : index
    %c0_10 = arith.constant 0 : index
    %c0_11 = arith.constant 0 : index
    %14 = vector.load %arg2[%c0_9, %c0_10, %c0_11] : memref<1x32x8xbf16, #tpu.memory_space<vmem>>, vector<1x32x8xbf16>
    %15 = vector.shape_cast %14 : vector<1x32x8xbf16> to vector<32x8xbf16>
    %c0_12 = arith.constant 0 : index
    %c0_13 = arith.constant 0 : index
    %16 = vector.load %arg3[%c0_12, %c0_13] : memref<8x32xbf16, #tpu.memory_space<vmem>>, vector<8x32xbf16>
    %cst_14 = arith.constant dense<0.000000e+00> : vector<32x32xf32>
    %17 = tpu.matmul %15, %16, %cst_14 {dimension_numbers = #tpu.dot_dimension_numbers<[1], [0], [0], [1], [0, 0, 1, 1], [], []>} : vector<32x8xbf16>, vector<8x32xbf16>, vector<32x32xf32> -> vector<32x32xf32>
    %c0_15 = arith.constant 0 : index
    %c0_16 = arith.constant 0 : index
    %18 = vector.load %arg4[%c0_15, %c0_16] : memref<1x32xf32, #tpu.memory_space<vmem>>, vector<1x32xf32>
    %19 = vector.broadcast %18 : vector<1x32xf32> to vector<32x32xf32>
    %20 = arith.addf %17, %19 : vector<32x32xf32>
    %21 = arith.negf %20 : vector<32x32xf32>
    %22 = math.exp %21 : vector<32x32xf32>
    %cst_17 = arith.constant 1.000000e+00 : f32
    %23 = vector.broadcast %cst_17 : f32 to vector<32x32xf32>
    %24 = arith.addf %23, %22 : vector<32x32xf32>
    %25 = arith.divf %23, %24 : vector<32x32xf32>
    %26 = arith.mulf %20, %25 : vector<32x32xf32>
    %c0_18 = arith.constant 0 : index
    %c0_19 = arith.constant 0 : index
    %27 = vector.load %arg15[%c0_18, %c0_19] : memref<32x32xf32, #tpu.memory_space<vmem>>, vector<32x32xf32>
    tpu.vector_store %arg15[%c0_18, %c0_19], %26 {strides = array<i32>} : memref<32x32xf32, #tpu.memory_space<vmem>>, vector<32x32xf32>,
    %cst_20 = arith.constant 0.000000e+00 : f32
    %28 = vector.broadcast %cst_20 : f32 to vector<10x5x32xf32>
    %c0_21 = arith.constant 0 : index
    %c0_22 = arith.constant 0 : index
    %c0_23 = arith.constant 0 : index
    %29 = vector.load %arg16[%c0_21, %c0_22, %c0_23] : memref<10x5x32xf32, #tpu.memory_space<vmem>>, vector<10x5x32xf32>
    tpu.vector_store %arg16[%c0_21, %c0_22, %c0_23], %28 {strides = array<i32>} : memref<10x5x32xf32, #tpu.memory_space<vmem>>, vector<10x5x32xf32>,
    %cst_24 = arith.constant 0.000000e+00 : f32
    %30 = vector.broadcast %cst_24 : f32 to vector<10x4x32xf32>
    %c0_25 = arith.constant 0 : index
    %c0_26 = arith.constant 0 : index
    %c0_27 = arith.constant 0 : index
    %31 = vector.load %arg17[%c0_25, %c0_26, %c0_27] : memref<10x4x32xf32, #tpu.memory_space<vmem>>, vector<10x4x32xf32>
    tpu.vector_store %arg17[%c0_25, %c0_26, %c0_27], %30 {strides = array<i32>} : memref<10x4x32xf32, #tpu.memory_space<vmem>>, vector<10x4x32xf32>,
    %c0_28 = arith.constant 0 : index
    %c0_29 = arith.constant 0 : index
    %32 = vector.load %arg15[%c0_28, %c0_29] : memref<32x32xf32, #tpu.memory_space<vmem>>, vector<4x32xf32>
    %c1 = arith.constant 1 : index
    %c1_30 = arith.constant 1 : index
    %c0_31 = arith.constant 0 : index
    %33 = vector.load %arg16[%c1, %c1_30, %c0_31] : memref<10x5x32xf32, #tpu.memory_space<vmem>>, vector<1x4x32xf32>
    %34 = vector.shape_cast %33 : vector<1x4x32xf32> to vector<4x32xf32>
    %35 = vector.shape_cast %32 : vector<4x32xf32> to vector<1x4x32xf32>
    tpu.vector_store %arg16[%c1, %c1_30, %c0_31], %35 {strides = array<i32>} : memref<10x5x32xf32, #tpu.memory_space<vmem>>, vector<1x4x32xf32>,
    %c0_32 = arith.constant 0 : index
    %c0_33 = arith.constant 0 : index
    %36 = vector.load %arg14[%c0_32, %c0_33] : memref<32x32xf32, #tpu.memory_space<vmem>>, vector<4x32xf32>
    %c1_34 = arith.constant 1 : index
    %c0_35 = arith.constant 0 : index
    %c0_36 = arith.constant 0 : index
    %37 = vector.load %arg17[%c1_34, %c0_35, %c0_36] : memref<10x4x32xf32, #tpu.memory_space<vmem>>, vector<1x4x32xf32>
    %38 = vector.shape_cast %37 : vector<1x4x32xf32> to vector<4x32xf32>
    %39 = vector.shape_cast %36 : vector<4x32xf32> to vector<1x4x32xf32>
    tpu.vector_store %arg17[%c1_34, %c0_35, %c0_36], %39 {strides = array<i32>} : memref<10x4x32xf32, #tpu.memory_space<vmem>>, vector<1x4x32xf32>,
    %c4 = arith.constant 4 : index
    %c0_37 = arith.constant 0 : index
    %40 = vector.load %arg15[%c4, %c0_37] : memref<32x32xf32, #tpu.memory_space<vmem>>, vector<4x32xf32>
    %c2 = arith.constant 2 : index
    %c1_38 = arith.constant 1 : index
    %c0_39 = arith.constant 0 : index
    %41 = vector.load %arg16[%c2, %c1_38, %c0_39] : memref<10x5x32xf32, #tpu.memory_space<vmem>>, vector<1x4x32xf32>
    %42 = vector.shape_cast %41 : vector<1x4x32xf32> to vector<4x32xf32>
    %43 = vector.shape_cast %40 : vector<4x32xf32> to vector<1x4x32xf32>
    tpu.vector_store %arg16[%c2, %c1_38, %c0_39], %43 {strides = array<i32>} : memref<10x5x32xf32, #tpu.memory_space<vmem>>, vector<1x4x32xf32>,
    %c4_40 = arith.constant 4 : index
    %c0_41 = arith.constant 0 : index
    %44 = vector.load %arg14[%c4_40, %c0_41] : memref<32x32xf32, #tpu.memory_space<vmem>>, vector<4x32xf32>
    %c2_42 = arith.constant 2 : index
    %c0_43 = arith.constant 0 : index
    %c0_44 = arith.constant 0 : index
    %45 = vector.load %arg17[%c2_42, %c0_43, %c0_44] : memref<10x4x32xf32, #tpu.memory_space<vmem>>, vector<1x4x32xf32>
    %46 = vector.shape_cast %45 : vector<1x4x32xf32> to vector<4x32xf32>
    %47 = vector.shape_cast %44 : vector<4x32xf32> to vector<1x4x32xf32>
    tpu.vector_store %arg17[%c2_42, %c0_43, %c0_44], %47 {strides = array<i32>} : memref<10x4x32xf32, #tpu.memory_space<vmem>>, vector<1x4x32xf32>,
    %c8 = arith.constant 8 : index
    %c0_45 = arith.constant 0 : index
    %48 = vector.load %arg15[%c8, %c0_45] : memref<32x32xf32, #tpu.memory_space<vmem>>, vector<4x32xf32>
    %c3 = arith.constant 3 : index
    %c1_46 = arith.constant 1 : index
    %c0_47 = arith.constant 0 : index
    %49 = vector.load %arg16[%c3, %c1_46, %c0_47] : memref<10x5x32xf32, #tpu.memory_space<vmem>>, vector<1x4x32xf32>
    %50 = vector.shape_cast %49 : vector<1x4x32xf32> to vector<4x32xf32>
    %51 = vector.shape_cast %48 : vector<4x32xf32> to vector<1x4x32xf32>
    tpu.vector_store %arg16[%c3, %c1_46, %c0_47], %51 {strides = array<i32>} : memref<10x5x32xf32, #tpu.memory_space<vmem>>, vector<1x4x32xf32>,
    %c8_48 = arith.constant 8 : index
    %c0_49 = arith.constant 0 : index
    %52 = vector.load %arg14[%c8_48, %c0_49] : memref<32x32xf32, #tpu.memory_space<vmem>>, vector<4x32xf32>
    %c3_50 = arith.constant 3 : index
    %c0_51 = arith.constant 0 : index
    %c0_52 = arith.constant 0 : index
    %53 = vector.load %arg17[%c3_50, %c0_51, %c0_52] : memref<10x4x32xf32, #tpu.memory_space<vmem>>, vector<1x4x32xf32>
    %54 = vector.shape_cast %53 : vector<1x4x32xf32> to vector<4x32xf32>
    %55 = vector.shape_cast %52 : vector<4x32xf32> to vector<1x4x32xf32>
    tpu.vector_store %arg17[%c3_50, %c0_51, %c0_52], %55 {strides = array<i32>} : memref<10x4x32xf32, #tpu.memory_space<vmem>>, vector<1x4x32xf32>,
    %c12 = arith.constant 12 : index
    %c0_53 = arith.constant 0 : index
    %56 = vector.load %arg15[%c12, %c0_53] : memref<32x32xf32, #tpu.memory_space<vmem>>, vector<4x32xf32>
    %c4_54 = arith.constant 4 : index
    %c1_55 = arith.constant 1 : index
    %c0_56 = arith.constant 0 : index
    %57 = vector.load %arg16[%c4_54, %c1_55, %c0_56] : memref<10x5x32xf32, #tpu.memory_space<vmem>>, vector<1x4x32xf32>
    %58 = vector.shape_cast %57 : vector<1x4x32xf32> to vector<4x32xf32>
    %59 = vector.shape_cast %56 : vector<4x32xf32> to vector<1x4x32xf32>
    tpu.vector_store %arg16[%c4_54, %c1_55, %c0_56], %59 {strides = array<i32>} : memref<10x5x32xf32, #tpu.memory_space<vmem>>, vector<1x4x32xf32>,
    %c12_57 = arith.constant 12 : index
    %c0_58 = arith.constant 0 : index
    %60 = vector.load %arg14[%c12_57, %c0_58] : memref<32x32xf32, #tpu.memory_space<vmem>>, vector<4x32xf32>
    %c4_59 = arith.constant 4 : index
    %c0_60 = arith.constant 0 : index
    %c0_61 = arith.constant 0 : index
    %61 = vector.load %arg17[%c4_59, %c0_60, %c0_61] : memref<10x4x32xf32, #tpu.memory_space<vmem>>, vector<1x4x32xf32>
    %62 = vector.shape_cast %61 : vector<1x4x32xf32> to vector<4x32xf32>
    %63 = vector.shape_cast %60 : vector<4x32xf32> to vector<1x4x32xf32>
    tpu.vector_store %arg17[%c4_59, %c0_60, %c0_61], %63 {strides = array<i32>} : memref<10x4x32xf32, #tpu.memory_space<vmem>>, vector<1x4x32xf32>,
    %c16 = arith.constant 16 : index
    %c0_62 = arith.constant 0 : index
    %64 = vector.load %arg15[%c16, %c0_62] : memref<32x32xf32, #tpu.memory_space<vmem>>, vector<4x32xf32>
    %c5 = arith.constant 5 : index
    %c1_63 = arith.constant 1 : index
    %c0_64 = arith.constant 0 : index
    %65 = vector.load %arg16[%c5, %c1_63, %c0_64] : memref<10x5x32xf32, #tpu.memory_space<vmem>>, vector<1x4x32xf32>
    %66 = vector.shape_cast %65 : vector<1x4x32xf32> to vector<4x32xf32>
    %67 = vector.shape_cast %64 : vector<4x32xf32> to vector<1x4x32xf32>
    tpu.vector_store %arg16[%c5, %c1_63, %c0_64], %67 {strides = array<i32>} : memref<10x5x32xf32, #tpu.memory_space<vmem>>, vector<1x4x32xf32>,
    %c16_65 = arith.constant 16 : index
    %c0_66 = arith.constant 0 : index
    %68 = vector.load %arg14[%c16_65, %c0_66] : memref<32x32xf32, #tpu.memory_space<vmem>>, vector<4x32xf32>
    %c5_67 = arith.constant 5 : index
    %c0_68 = arith.constant 0 : index
    %c0_69 = arith.constant 0 : index
    %69 = vector.load %arg17[%c5_67, %c0_68, %c0_69] : memref<10x4x32xf32, #tpu.memory_space<vmem>>, vector<1x4x32xf32>
    %70 = vector.shape_cast %69 : vector<1x4x32xf32> to vector<4x32xf32>
    %71 = vector.shape_cast %68 : vector<4x32xf32> to vector<1x4x32xf32>
    tpu.vector_store %arg17[%c5_67, %c0_68, %c0_69], %71 {strides = array<i32>} : memref<10x4x32xf32, #tpu.memory_space<vmem>>, vector<1x4x32xf32>,
    %c20 = arith.constant 20 : index
    %c0_70 = arith.constant 0 : index
    %72 = vector.load %arg15[%c20, %c0_70] : memref<32x32xf32, #tpu.memory_space<vmem>>, vector<4x32xf32>
    %c6 = arith.constant 6 : index
    %c1_71 = arith.constant 1 : index
    %c0_72 = arith.constant 0 : index
    %73 = vector.load %arg16[%c6, %c1_71, %c0_72] : memref<10x5x32xf32, #tpu.memory_space<vmem>>, vector<1x4x32xf32>
    %74 = vector.shape_cast %73 : vector<1x4x32xf32> to vector<4x32xf32>
    %75 = vector.shape_cast %72 : vector<4x32xf32> to vector<1x4x32xf32>
    tpu.vector_store %arg16[%c6, %c1_71, %c0_72], %75 {strides = array<i32>} : memref<10x5x32xf32, #tpu.memory_space<vmem>>, vector<1x4x32xf32>,
    %c20_73 = arith.constant 20 : index
    %c0_74 = arith.constant 0 : index
    %76 = vector.load %arg14[%c20_73, %c0_74] : memref<32x32xf32, #tpu.memory_space<vmem>>, vector<4x32xf32>
    %c6_75 = arith.constant 6 : index
    %c0_76 = arith.constant 0 : index
    %c0_77 = arith.constant 0 : index
    %77 = vector.load %arg17[%c6_75, %c0_76, %c0_77] : memref<10x4x32xf32, #tpu.memory_space<vmem>>, vector<1x4x32xf32>
    %78 = vector.shape_cast %77 : vector<1x4x32xf32> to vector<4x32xf32>
    %79 = vector.shape_cast %76 : vector<4x32xf32> to vector<1x4x32xf32>
    tpu.vector_store %arg17[%c6_75, %c0_76, %c0_77], %79 {strides = array<i32>} : memref<10x4x32xf32, #tpu.memory_space<vmem>>, vector<1x4x32xf32>,
    %c24 = arith.constant 24 : index
    %c0_78 = arith.constant 0 : index
    %80 = vector.load %arg15[%c24, %c0_78] : memref<32x32xf32, #tpu.memory_space<vmem>>, vector<4x32xf32>
    %c7 = arith.constant 7 : index
    %c1_79 = arith.constant 1 : index
    %c0_80 = arith.constant 0 : index
    %81 = vector.load %arg16[%c7, %c1_79, %c0_80] : memref<10x5x32xf32, #tpu.memory_space<vmem>>, vector<1x4x32xf32>
    %82 = vector.shape_cast %81 : vector<1x4x32xf32> to vector<4x32xf32>
    %83 = vector.shape_cast %80 : vector<4x32xf32> to vector<1x4x32xf32>
    tpu.vector_store %arg16[%c7, %c1_79, %c0_80], %83 {strides = array<i32>} : memref<10x5x32xf32, #tpu.memory_space<vmem>>, vector<1x4x32xf32>,
    %c24_81 = arith.constant 24 : index
    %c0_82 = arith.constant 0 : index
    %84 = vector.load %arg14[%c24_81, %c0_82] : memref<32x32xf32, #tpu.memory_space<vmem>>, vector<4x32xf32>
    %c7_83 = arith.constant 7 : index
    %c0_84 = arith.constant 0 : index
    %c0_85 = arith.constant 0 : index
    %85 = vector.load %arg17[%c7_83, %c0_84, %c0_85] : memref<10x4x32xf32, #tpu.memory_space<vmem>>, vector<1x4x32xf32>
    %86 = vector.shape_cast %85 : vector<1x4x32xf32> to vector<4x32xf32>
    %87 = vector.shape_cast %84 : vector<4x32xf32> to vector<1x4x32xf32>
    tpu.vector_store %arg17[%c7_83, %c0_84, %c0_85], %87 {strides = array<i32>} : memref<10x4x32xf32, #tpu.memory_space<vmem>>, vector<1x4x32xf32>,
    %c28 = arith.constant 28 : index
    %c0_86 = arith.constant 0 : index
    %88 = vector.load %arg15[%c28, %c0_86] : memref<32x32xf32, #tpu.memory_space<vmem>>, vector<4x32xf32>
    %c8_87 = arith.constant 8 : index
    %c1_88 = arith.constant 1 : index
    %c0_89 = arith.constant 0 : index
    %89 = vector.load %arg16[%c8_87, %c1_88, %c0_89] : memref<10x5x32xf32, #tpu.memory_space<vmem>>, vector<1x4x32xf32>
    %90 = vector.shape_cast %89 : vector<1x4x32xf32> to vector<4x32xf32>
    %91 = vector.shape_cast %88 : vector<4x32xf32> to vector<1x4x32xf32>
    tpu.vector_store %arg16[%c8_87, %c1_88, %c0_89], %91 {strides = array<i32>} : memref<10x5x32xf32, #tpu.memory_space<vmem>>, vector<1x4x32xf32>,
    %c28_90 = arith.constant 28 : index
    %c0_91 = arith.constant 0 : index
    %92 = vector.load %arg14[%c28_90, %c0_91] : memref<32x32xf32, #tpu.memory_space<vmem>>, vector<4x32xf32>
    %c8_92 = arith.constant 8 : index
    %c0_93 = arith.constant 0 : index
    %c0_94 = arith.constant 0 : index
    %93 = vector.load %arg17[%c8_92, %c0_93, %c0_94] : memref<10x4x32xf32, #tpu.memory_space<vmem>>, vector<1x4x32xf32>
    %94 = vector.shape_cast %93 : vector<1x4x32xf32> to vector<4x32xf32>
    %95 = vector.shape_cast %92 : vector<4x32xf32> to vector<1x4x32xf32>
    tpu.vector_store %arg17[%c8_92, %c0_93, %c0_94], %95 {strides = array<i32>} : memref<10x4x32xf32, #tpu.memory_space<vmem>>, vector<1x4x32xf32>,
    %c0_95 = arith.constant 0 : index
    %c0_96 = arith.constant 0 : index
    %96 = vector.load %arg6[%c0_95, %c0_96] : memref<1x32xf32, #tpu.memory_space<vmem>>, vector<1x32xf32>
    %cst_97 = arith.constant 0.000000e+00 : f32
    %97 = vector.broadcast %cst_97 : f32 to vector<4x32xf32>
    %c0_98 = arith.constant 0 : index
    %c0_99 = arith.constant 0 : index
    %c0_100 = arith.constant 0 : index
    %98 = vector.load %arg5[%c0_98, %c0_99, %c0_100] : memref<9x1x32xf32, #tpu.memory_space<vmem>>, vector<1x1x32xf32>
    %99 = vector.shape_cast %98 : vector<1x1x32xf32> to vector<1x32xf32>
    %c0_101 = arith.constant 0 : index
    %c0_102 = arith.constant 0 : index
    %c0_103 = arith.constant 0 : index
    %100 = vector.load %arg16[%c0_101, %c0_102, %c0_103] : memref<10x5x32xf32, #tpu.memory_space<vmem>>, vector<1x4x32xf32>
    %101 = vector.shape_cast %100 : vector<1x4x32xf32> to vector<4x32xf32>
    %102 = vector.broadcast %99 : vector<1x32xf32> to vector<4x32xf32>
    %103 = arith.mulf %101, %102 : vector<4x32xf32>
    %104 = arith.addf %97, %103 : vector<4x32xf32>
    %c1_104 = arith.constant 1 : index
    %c0_105 = arith.constant 0 : index
    %c0_106 = arith.constant 0 : index
    %105 = vector.load %arg5[%c1_104, %c0_105, %c0_106] : memref<9x1x32xf32, #tpu.memory_space<vmem>>, vector<1x1x32xf32>
    %106 = vector.shape_cast %105 : vector<1x1x32xf32> to vector<1x32xf32>
    %c0_107 = arith.constant 0 : index
    %c0_108 = arith.constant 0 : index
    %c0_109 = arith.constant 0 : index
    %107 = vector.load %arg17[%c0_107, %c0_108, %c0_109] : memref<10x4x32xf32, #tpu.memory_space<vmem>>, vector<1x4x32xf32>
    %108 = vector.shape_cast %107 : vector<1x4x32xf32> to vector<4x32xf32>
    %109 = vector.broadcast %106 : vector<1x32xf32> to vector<4x32xf32>
    %110 = arith.mulf %108, %109 : vector<4x32xf32>
    %111 = arith.addf %104, %110 : vector<4x32xf32>
    %c2_110 = arith.constant 2 : index
    %c0_111 = arith.constant 0 : index
    %c0_112 = arith.constant 0 : index
    %112 = vector.load %arg5[%c2_110, %c0_111, %c0_112] : memref<9x1x32xf32, #tpu.memory_space<vmem>>, vector<1x1x32xf32>
    %113 = vector.shape_cast %112 : vector<1x1x32xf32> to vector<1x32xf32>
    %c0_113 = arith.constant 0 : index
    %c1_114 = arith.constant 1 : index
    %c0_115 = arith.constant 0 : index
    %114 = vector.load %arg16[%c0_113, %c1_114, %c0_115] : memref<10x5x32xf32, #tpu.memory_space<vmem>>, vector<1x4x32xf32>
    %115 = vector.shape_cast %114 : vector<1x4x32xf32> to vector<4x32xf32>
    %116 = vector.broadcast %113 : vector<1x32xf32> to vector<4x32xf32>
    %117 = arith.mulf %115, %116 : vector<4x32xf32>
    %118 = arith.addf %111, %117 : vector<4x32xf32>
    %c3_116 = arith.constant 3 : index
    %c0_117 = arith.constant 0 : index
    %c0_118 = arith.constant 0 : index
    %119 = vector.load %arg5[%c3_116, %c0_117, %c0_118] : memref<9x1x32xf32, #tpu.memory_space<vmem>>, vector<1x1x32xf32>
    %120 = vector.shape_cast %119 : vector<1x1x32xf32> to vector<1x32xf32>
    %c1_119 = arith.constant 1 : index
    %c0_120 = arith.constant 0 : index
    %c0_121 = arith.constant 0 : index
    %121 = vector.load %arg16[%c1_119, %c0_120, %c0_121] : memref<10x5x32xf32, #tpu.memory_space<vmem>>, vector<1x4x32xf32>
    %122 = vector.shape_cast %121 : vector<1x4x32xf32> to vector<4x32xf32>
    %123 = vector.broadcast %120 : vector<1x32xf32> to vector<4x32xf32>
    %124 = arith.mulf %122, %123 : vector<4x32xf32>
    %125 = arith.addf %118, %124 : vector<4x32xf32>
    %c4_122 = arith.constant 4 : index
    %c0_123 = arith.constant 0 : index
    %c0_124 = arith.constant 0 : index
    %126 = vector.load %arg5[%c4_122, %c0_123, %c0_124] : memref<9x1x32xf32, #tpu.memory_space<vmem>>, vector<1x1x32xf32>
    %127 = vector.shape_cast %126 : vector<1x1x32xf32> to vector<1x32xf32>
    %c1_125 = arith.constant 1 : index
    %c0_126 = arith.constant 0 : index
    %c0_127 = arith.constant 0 : index
    %128 = vector.load %arg17[%c1_125, %c0_126, %c0_127] : memref<10x4x32xf32, #tpu.memory_space<vmem>>, vector<1x4x32xf32>
    %129 = vector.shape_cast %128 : vector<1x4x32xf32> to vector<4x32xf32>
    %130 = vector.broadcast %127 : vector<1x32xf32> to vector<4x32xf32>
    %131 = arith.mulf %129, %130 : vector<4x32xf32>
    %132 = arith.addf %125, %131 : vector<4x32xf32>
    %c5_128 = arith.constant 5 : index
    %c0_129 = arith.constant 0 : index
    %c0_130 = arith.constant 0 : index
    %133 = vector.load %arg5[%c5_128, %c0_129, %c0_130] : memref<9x1x32xf32, #tpu.memory_space<vmem>>, vector<1x1x32xf32>
    %134 = vector.shape_cast %133 : vector<1x1x32xf32> to vector<1x32xf32>
    %c1_131 = arith.constant 1 : index
    %c1_132 = arith.constant 1 : index
    %c0_133 = arith.constant 0 : index
    %135 = vector.load %arg16[%c1_131, %c1_132, %c0_133] : memref<10x5x32xf32, #tpu.memory_space<vmem>>, vector<1x4x32xf32>
    %136 = vector.shape_cast %135 : vector<1x4x32xf32> to vector<4x32xf32>
    %137 = vector.broadcast %134 : vector<1x32xf32> to vector<4x32xf32>
    %138 = arith.mulf %136, %137 : vector<4x32xf32>
    %139 = arith.addf %132, %138 : vector<4x32xf32>
    %c6_134 = arith.constant 6 : index
    %c0_135 = arith.constant 0 : index
    %c0_136 = arith.constant 0 : index
    %140 = vector.load %arg5[%c6_134, %c0_135, %c0_136] : memref<9x1x32xf32, #tpu.memory_space<vmem>>, vector<1x1x32xf32>
    %141 = vector.shape_cast %140 : vector<1x1x32xf32> to vector<1x32xf32>
    %c2_137 = arith.constant 2 : index
    %c0_138 = arith.constant 0 : index
    %c0_139 = arith.constant 0 : index
    %142 = vector.load %arg16[%c2_137, %c0_138, %c0_139] : memref<10x5x32xf32, #tpu.memory_space<vmem>>, vector<1x4x32xf32>
    %143 = vector.shape_cast %142 : vector<1x4x32xf32> to vector<4x32xf32>
    %144 = vector.broadcast %141 : vector<1x32xf32> to vector<4x32xf32>
    %145 = arith.mulf %143, %144 : vector<4x32xf32>
    %146 = arith.addf %139, %145 : vector<4x32xf32>
    %c7_140 = arith.constant 7 : index
    %c0_141 = arith.constant 0 : index
    %c0_142 = arith.constant 0 : index
    %147 = vector.load %arg5[%c7_140, %c0_141, %c0_142] : memref<9x1x32xf32, #tpu.memory_space<vmem>>, vector<1x1x32xf32>
    %148 = vector.shape_cast %147 : vector<1x1x32xf32> to vector<1x32xf32>
    %c2_143 = arith.constant 2 : index
    %c0_144 = arith.constant 0 : index
    %c0_145 = arith.constant 0 : index
    %149 = vector.load %arg17[%c2_143, %c0_144, %c0_145] : memref<10x4x32xf32, #tpu.memory_space<vmem>>, vector<1x4x32xf32>
    %150 = vector.shape_cast %149 : vector<1x4x32xf32> to vector<4x32xf32>
    %151 = vector.broadcast %148 : vector<1x32xf32> to vector<4x32xf32>
    %152 = arith.mulf %150, %151 : vector<4x32xf32>
    %153 = arith.addf %146, %152 : vector<4x32xf32>
    %c8_146 = arith.constant 8 : index
    %c0_147 = arith.constant 0 : index
    %c0_148 = arith.constant 0 : index
    %154 = vector.load %arg5[%c8_146, %c0_147, %c0_148] : memref<9x1x32xf32, #tpu.memory_space<vmem>>, vector<1x1x32xf32>
    %155 = vector.shape_cast %154 : vector<1x1x32xf32> to vector<1x32xf32>
    %c2_149 = arith.constant 2 : index
    %c1_150 = arith.constant 1 : index
    %c0_151 = arith.constant 0 : index
    %156 = vector.load %arg16[%c2_149, %c1_150, %c0_151] : memref<10x5x32xf32, #tpu.memory_space<vmem>>, vector<1x4x32xf32>
    %157 = vector.shape_cast %156 : vector<1x4x32xf32> to vector<4x32xf32>
    %158 = vector.broadcast %155 : vector<1x32xf32> to vector<4x32xf32>
    %159 = arith.mulf %157, %158 : vector<4x32xf32>
    %160 = arith.addf %153, %159 : vector<4x32xf32>
    %161 = vector.broadcast %96 : vector<1x32xf32> to vector<4x32xf32>
    %162 = arith.addf %160, %161 : vector<4x32xf32>
    %163 = arith.negf %162 : vector<4x32xf32>
    %164 = math.exp %163 : vector<4x32xf32>
    %cst_152 = arith.constant 1.000000e+00 : f32
    %165 = vector.broadcast %cst_152 : f32 to vector<4x32xf32>
    %166 = arith.addf %165, %164 : vector<4x32xf32>
    %167 = arith.divf %165, %166 : vector<4x32xf32>
    %168 = arith.mulf %162, %167 : vector<4x32xf32>
    %c0_153 = arith.constant 0 : index
    %c0_154 = arith.constant 0 : index
    %169 = vector.load %arg18[%c0_153, %c0_154] : memref<16x32xf32, #tpu.memory_space<vmem>>, vector<4x32xf32>
    tpu.vector_store %arg18[%c0_153, %c0_154], %168 {strides = array<i32>} : memref<16x32xf32, #tpu.memory_space<vmem>>, vector<4x32xf32>,
    %cst_155 = arith.constant 0.000000e+00 : f32
    %170 = vector.broadcast %cst_155 : f32 to vector<4x32xf32>
    %c0_156 = arith.constant 0 : index
    %c0_157 = arith.constant 0 : index
    %c0_158 = arith.constant 0 : index
    %171 = vector.load %arg5[%c0_156, %c0_157, %c0_158] : memref<9x1x32xf32, #tpu.memory_space<vmem>>, vector<1x1x32xf32>
    %172 = vector.shape_cast %171 : vector<1x1x32xf32> to vector<1x32xf32>
    %c2_159 = arith.constant 2 : index
    %c0_160 = arith.constant 0 : index
    %c0_161 = arith.constant 0 : index
    %173 = vector.load %arg16[%c2_159, %c0_160, %c0_161] : memref<10x5x32xf32, #tpu.memory_space<vmem>>, vector<1x4x32xf32>
    %174 = vector.shape_cast %173 : vector<1x4x32xf32> to vector<4x32xf32>
    %175 = vector.broadcast %172 : vector<1x32xf32> to vector<4x32xf32>
    %176 = arith.mulf %174, %175 : vector<4x32xf32>
    %177 = arith.addf %170, %176 : vector<4x32xf32>
    %c1_162 = arith.constant 1 : index
    %c0_163 = arith.constant 0 : index
    %c0_164 = arith.constant 0 : index
    %178 = vector.load %arg5[%c1_162, %c0_163, %c0_164] : memref<9x1x32xf32, #tpu.memory_space<vmem>>, vector<1x1x32xf32>
    %179 = vector.shape_cast %178 : vector<1x1x32xf32> to vector<1x32xf32>
    %c2_165 = arith.constant 2 : index
    %c0_166 = arith.constant 0 : index
    %c0_167 = arith.constant 0 : index
    %180 = vector.load %arg17[%c2_165, %c0_166, %c0_167] : memref<10x4x32xf32, #tpu.memory_space<vmem>>, vector<1x4x32xf32>
    %181 = vector.shape_cast %180 : vector<1x4x32xf32> to vector<4x32xf32>
    %182 = vector.broadcast %179 : vector<1x32xf32> to vector<4x32xf32>
    %183 = arith.mulf %181, %182 : vector<4x32xf32>
    %184 = arith.addf %177, %183 : vector<4x32xf32>
    %c2_168 = arith.constant 2 : index
    %c0_169 = arith.constant 0 : index
    %c0_170 = arith.constant 0 : index
    %185 = vector.load %arg5[%c2_168, %c0_169, %c0_170] : memref<9x1x32xf32, #tpu.memory_space<vmem>>, vector<1x1x32xf32>
    %186 = vector.shape_cast %185 : vector<1x1x32xf32> to vector<1x32xf32>
    %c2_171 = arith.constant 2 : index
    %c1_172 = arith.constant 1 : index
    %c0_173 = arith.constant 0 : index
    %187 = vector.load %arg16[%c2_171, %c1_172, %c0_173] : memref<10x5x32xf32, #tpu.memory_space<vmem>>, vector<1x4x32xf32>
    %188 = vector.shape_cast %187 : vector<1x4x32xf32> to vector<4x32xf32>
    %189 = vector.broadcast %186 : vector<1x32xf32> to vector<4x32xf32>
    %190 = arith.mulf %188, %189 : vector<4x32xf32>
    %191 = arith.addf %184, %190 : vector<4x32xf32>
    %c3_174 = arith.constant 3 : index
    %c0_175 = arith.constant 0 : index
    %c0_176 = arith.constant 0 : index
    %192 = vector.load %arg5[%c3_174, %c0_175, %c0_176] : memref<9x1x32xf32, #tpu.memory_space<vmem>>, vector<1x1x32xf32>
    %193 = vector.shape_cast %192 : vector<1x1x32xf32> to vector<1x32xf32>
    %c3_177 = arith.constant 3 : index
    %c0_178 = arith.constant 0 : index
    %c0_179 = arith.constant 0 : index
    %194 = vector.load %arg16[%c3_177, %c0_178, %c0_179] : memref<10x5x32xf32, #tpu.memory_space<vmem>>, vector<1x4x32xf32>
    %195 = vector.shape_cast %194 : vector<1x4x32xf32> to vector<4x32xf32>
    %196 = vector.broadcast %193 : vector<1x32xf32> to vector<4x32xf32>
    %197 = arith.mulf %195, %196 : vector<4x32xf32>
    %198 = arith.addf %191, %197 : vector<4x32xf32>
    %c4_180 = arith.constant 4 : index
    %c0_181 = arith.constant 0 : index
    %c0_182 = arith.constant 0 : index
    %199 = vector.load %arg5[%c4_180, %c0_181, %c0_182] : memref<9x1x32xf32, #tpu.memory_space<vmem>>, vector<1x1x32xf32>
    %200 = vector.shape_cast %199 : vector<1x1x32xf32> to vector<1x32xf32>
    %c3_183 = arith.constant 3 : index
    %c0_184 = arith.constant 0 : index
    %c0_185 = arith.constant 0 : index
    %201 = vector.load %arg17[%c3_183, %c0_184, %c0_185] : memref<10x4x32xf32, #tpu.memory_space<vmem>>, vector<1x4x32xf32>
    %202 = vector.shape_cast %201 : vector<1x4x32xf32> to vector<4x32xf32>
    %203 = vector.broadcast %200 : vector<1x32xf32> to vector<4x32xf32>
    %204 = arith.mulf %202, %203 : vector<4x32xf32>
    %205 = arith.addf %198, %204 : vector<4x32xf32>
    %c5_186 = arith.constant 5 : index
    %c0_187 = arith.constant 0 : index
    %c0_188 = arith.constant 0 : index
    %206 = vector.load %arg5[%c5_186, %c0_187, %c0_188] : memref<9x1x32xf32, #tpu.memory_space<vmem>>, vector<1x1x32xf32>
    %207 = vector.shape_cast %206 : vector<1x1x32xf32> to vector<1x32xf32>
    %c3_189 = arith.constant 3 : index
    %c1_190 = arith.constant 1 : index
    %c0_191 = arith.constant 0 : index
    %208 = vector.load %arg16[%c3_189, %c1_190, %c0_191] : memref<10x5x32xf32, #tpu.memory_space<vmem>>, vector<1x4x32xf32>
    %209 = vector.shape_cast %208 : vector<1x4x32xf32> to vector<4x32xf32>
    %210 = vector.broadcast %207 : vector<1x32xf32> to vector<4x32xf32>
    %211 = arith.mulf %209, %210 : vector<4x32xf32>
    %212 = arith.addf %205, %211 : vector<4x32xf32>
    %c6_192 = arith.constant 6 : index
    %c0_193 = arith.constant 0 : index
    %c0_194 = arith.constant 0 : index
    %213 = vector.load %arg5[%c6_192, %c0_193, %c0_194] : memref<9x1x32xf32, #tpu.memory_space<vmem>>, vector<1x1x32xf32>
    %214 = vector.shape_cast %213 : vector<1x1x32xf32> to vector<1x32xf32>
    %c4_195 = arith.constant 4 : index
    %c0_196 = arith.constant 0 : index
    %c0_197 = arith.constant 0 : index
    %215 = vector.load %arg16[%c4_195, %c0_196, %c0_197] : memref<10x5x32xf32, #tpu.memory_space<vmem>>, vector<1x4x32xf32>
    %216 = vector.shape_cast %215 : vector<1x4x32xf32> to vector<4x32xf32>
    %217 = vector.broadcast %214 : vector<1x32xf32> to vector<4x32xf32>
    %218 = arith.mulf %216, %217 : vector<4x32xf32>
    %219 = arith.addf %212, %218 : vector<4x32xf32>
    %c7_198 = arith.constant 7 : index
    %c0_199 = arith.constant 0 : index
    %c0_200 = arith.constant 0 : index
    %220 = vector.load %arg5[%c7_198, %c0_199, %c0_200] : memref<9x1x32xf32, #tpu.memory_space<vmem>>, vector<1x1x32xf32>
    %221 = vector.shape_cast %220 : vector<1x1x32xf32> to vector<1x32xf32>
    %c4_201 = arith.constant 4 : index
    %c0_202 = arith.constant 0 : index
    %c0_203 = arith.constant 0 : index
    %222 = vector.load %arg17[%c4_201, %c0_202, %c0_203] : memref<10x4x32xf32, #tpu.memory_space<vmem>>, vector<1x4x32xf32>
    %223 = vector.shape_cast %222 : vector<1x4x32xf32> to vector<4x32xf32>
    %224 = vector.broadcast %221 : vector<1x32xf32> to vector<4x32xf32>
    %225 = arith.mulf %223, %224 : vector<4x32xf32>
    %226 = arith.addf %219, %225 : vector<4x32xf32>
    %c8_204 = arith.constant 8 : index
    %c0_205 = arith.constant 0 : index
    %c0_206 = arith.constant 0 : index
    %227 = vector.load %arg5[%c8_204, %c0_205, %c0_206] : memref<9x1x32xf32, #tpu.memory_space<vmem>>, vector<1x1x32xf32>
    %228 = vector.shape_cast %227 : vector<1x1x32xf32> to vector<1x32xf32>
    %c4_207 = arith.constant 4 : index
    %c1_208 = arith.constant 1 : index
    %c0_209 = arith.constant 0 : index
    %229 = vector.load %arg16[%c4_207, %c1_208, %c0_209] : memref<10x5x32xf32, #tpu.memory_space<vmem>>, vector<1x4x32xf32>
    %230 = vector.shape_cast %229 : vector<1x4x32xf32> to vector<4x32xf32>
    %231 = vector.broadcast %228 : vector<1x32xf32> to vector<4x32xf32>
    %232 = arith.mulf %230, %231 : vector<4x32xf32>
    %233 = arith.addf %226, %232 : vector<4x32xf32>
    %234 = vector.broadcast %96 : vector<1x32xf32> to vector<4x32xf32>
    %235 = arith.addf %233, %234 : vector<4x32xf32>
    %236 = arith.negf %235 : vector<4x32xf32>
    %237 = math.exp %236 : vector<4x32xf32>
    %cst_210 = arith.constant 1.000000e+00 : f32
    %238 = vector.broadcast %cst_210 : f32 to vector<4x32xf32>
    %239 = arith.addf %238, %237 : vector<4x32xf32>
    %240 = arith.divf %238, %239 : vector<4x32xf32>
    %241 = arith.mulf %235, %240 : vector<4x32xf32>
    %c4_211 = arith.constant 4 : index
    %c0_212 = arith.constant 0 : index
    %242 = vector.load %arg18[%c4_211, %c0_212] : memref<16x32xf32, #tpu.memory_space<vmem>>, vector<4x32xf32>
    tpu.vector_store %arg18[%c4_211, %c0_212], %241 {strides = array<i32>} : memref<16x32xf32, #tpu.memory_space<vmem>>, vector<4x32xf32>,
    %cst_213 = arith.constant 0.000000e+00 : f32
    %243 = vector.broadcast %cst_213 : f32 to vector<4x32xf32>
    %c0_214 = arith.constant 0 : index
    %c0_215 = arith.constant 0 : index
    %c0_216 = arith.constant 0 : index
    %244 = vector.load %arg5[%c0_214, %c0_215, %c0_216] : memref<9x1x32xf32, #tpu.memory_space<vmem>>, vector<1x1x32xf32>
    %245 = vector.shape_cast %244 : vector<1x1x32xf32> to vector<1x32xf32>
    %c4_217 = arith.constant 4 : index
    %c0_218 = arith.constant 0 : index
    %c0_219 = arith.constant 0 : index
    %246 = vector.load %arg16[%c4_217, %c0_218, %c0_219] : memref<10x5x32xf32, #tpu.memory_space<vmem>>, vector<1x4x32xf32>
    %247 = vector.shape_cast %246 : vector<1x4x32xf32> to vector<4x32xf32>
    %248 = vector.broadcast %245 : vector<1x32xf32> to vector<4x32xf32>
    %249 = arith.mulf %247, %248 : vector<4x32xf32>
    %250 = arith.addf %243, %249 : vector<4x32xf32>
    %c1_220 = arith.constant 1 : index
    %c0_221 = arith.constant 0 : index
    %c0_222 = arith.constant 0 : index
    %251 = vector.load %arg5[%c1_220, %c0_221, %c0_222] : memref<9x1x32xf32, #tpu.memory_space<vmem>>, vector<1x1x32xf32>
    %252 = vector.shape_cast %251 : vector<1x1x32xf32> to vector<1x32xf32>
    %c4_223 = arith.constant 4 : index
    %c0_224 = arith.constant 0 : index
    %c0_225 = arith.constant 0 : index
    %253 = vector.load %arg17[%c4_223, %c0_224, %c0_225] : memref<10x4x32xf32, #tpu.memory_space<vmem>>, vector<1x4x32xf32>
    %254 = vector.shape_cast %253 : vector<1x4x32xf32> to vector<4x32xf32>
    %255 = vector.broadcast %252 : vector<1x32xf32> to vector<4x32xf32>
    %256 = arith.mulf %254, %255 : vector<4x32xf32>
    %257 = arith.addf %250, %256 : vector<4x32xf32>
    %c2_226 = arith.constant 2 : index
    %c0_227 = arith.constant 0 : index
    %c0_228 = arith.constant 0 : index
    %258 = vector.load %arg5[%c2_226, %c0_227, %c0_228] : memref<9x1x32xf32, #tpu.memory_space<vmem>>, vector<1x1x32xf32>
    %259 = vector.shape_cast %258 : vector<1x1x32xf32> to vector<1x32xf32>
    %c4_229 = arith.constant 4 : index
    %c1_230 = arith.constant 1 : index
    %c0_231 = arith.constant 0 : index
    %260 = vector.load %arg16[%c4_229, %c1_230, %c0_231] : memref<10x5x32xf32, #tpu.memory_space<vmem>>, vector<1x4x32xf32>
    %261 = vector.shape_cast %260 : vector<1x4x32xf32> to vector<4x32xf32>
    %262 = vector.broadcast %259 : vector<1x32xf32> to vector<4x32xf32>
    %263 = arith.mulf %261, %262 : vector<4x32xf32>
    %264 = arith.addf %257, %263 : vector<4x32xf32>
    %c3_232 = arith.constant 3 : index
    %c0_233 = arith.constant 0 : index
    %c0_234 = arith.constant 0 : index
    %265 = vector.load %arg5[%c3_232, %c0_233, %c0_234] : memref<9x1x32xf32, #tpu.memory_space<vmem>>, vector<1x1x32xf32>
    %266 = vector.shape_cast %265 : vector<1x1x32xf32> to vector<1x32xf32>
    %c5_235 = arith.constant 5 : index
    %c0_236 = arith.constant 0 : index
    %c0_237 = arith.constant 0 : index
    %267 = vector.load %arg16[%c5_235, %c0_236, %c0_237] : memref<10x5x32xf32, #tpu.memory_space<vmem>>, vector<1x4x32xf32>
    %268 = vector.shape_cast %267 : vector<1x4x32xf32> to vector<4x32xf32>
    %269 = vector.broadcast %266 : vector<1x32xf32> to vector<4x32xf32>
    %270 = arith.mulf %268, %269 : vector<4x32xf32>
    %271 = arith.addf %264, %270 : vector<4x32xf32>
    %c4_238 = arith.constant 4 : index
    %c0_239 = arith.constant 0 : index
    %c0_240 = arith.constant 0 : index
    %272 = vector.load %arg5[%c4_238, %c0_239, %c0_240] : memref<9x1x32xf32, #tpu.memory_space<vmem>>, vector<1x1x32xf32>
    %273 = vector.shape_cast %272 : vector<1x1x32xf32> to vector<1x32xf32>
    %c5_241 = arith.constant 5 : index
    %c0_242 = arith.constant 0 : index
    %c0_243 = arith.constant 0 : index
    %274 = vector.load %arg17[%c5_241, %c0_242, %c0_243] : memref<10x4x32xf32, #tpu.memory_space<vmem>>, vector<1x4x32xf32>
    %275 = vector.shape_cast %274 : vector<1x4x32xf32> to vector<4x32xf32>
    %276 = vector.broadcast %273 : vector<1x32xf32> to vector<4x32xf32>
    %277 = arith.mulf %275, %276 : vector<4x32xf32>
    %278 = arith.addf %271, %277 : vector<4x32xf32>
    %c5_244 = arith.constant 5 : index
    %c0_245 = arith.constant 0 : index
    %c0_246 = arith.constant 0 : index
    %279 = vector.load %arg5[%c5_244, %c0_245, %c0_246] : memref<9x1x32xf32, #tpu.memory_space<vmem>>, vector<1x1x32xf32>
    %280 = vector.shape_cast %279 : vector<1x1x32xf32> to vector<1x32xf32>
    %c5_247 = arith.constant 5 : index
    %c1_248 = arith.constant 1 : index
    %c0_249 = arith.constant 0 : index
    %281 = vector.load %arg16[%c5_247, %c1_248, %c0_249] : memref<10x5x32xf32, #tpu.memory_space<vmem>>, vector<1x4x32xf32>
    %282 = vector.shape_cast %281 : vector<1x4x32xf32> to vector<4x32xf32>
    %283 = vector.broadcast %280 : vector<1x32xf32> to vector<4x32xf32>
    %284 = arith.mulf %282, %283 : vector<4x32xf32>
    %285 = arith.addf %278, %284 : vector<4x32xf32>
    %c6_250 = arith.constant 6 : index
    %c0_251 = arith.constant 0 : index
    %c0_252 = arith.constant 0 : index
    %286 = vector.load %arg5[%c6_250, %c0_251, %c0_252] : memref<9x1x32xf32, #tpu.memory_space<vmem>>, vector<1x1x32xf32>
    %287 = vector.shape_cast %286 : vector<1x1x32xf32> to vector<1x32xf32>
    %c6_253 = arith.constant 6 : index
    %c0_254 = arith.constant 0 : index
    %c0_255 = arith.constant 0 : index
    %288 = vector.load %arg16[%c6_253, %c0_254, %c0_255] : memref<10x5x32xf32, #tpu.memory_space<vmem>>, vector<1x4x32xf32>
    %289 = vector.shape_cast %288 : vector<1x4x32xf32> to vector<4x32xf32>
    %290 = vector.broadcast %287 : vector<1x32xf32> to vector<4x32xf32>
    %291 = arith.mulf %289, %290 : vector<4x32xf32>
    %292 = arith.addf %285, %291 : vector<4x32xf32>
    %c7_256 = arith.constant 7 : index
    %c0_257 = arith.constant 0 : index
    %c0_258 = arith.constant 0 : index
    %293 = vector.load %arg5[%c7_256, %c0_257, %c0_258] : memref<9x1x32xf32, #tpu.memory_space<vmem>>, vector<1x1x32xf32>
    %294 = vector.shape_cast %293 : vector<1x1x32xf32> to vector<1x32xf32>
    %c6_259 = arith.constant 6 : index
    %c0_260 = arith.constant 0 : index
    %c0_261 = arith.constant 0 : index
    %295 = vector.load %arg17[%c6_259, %c0_260, %c0_261] : memref<10x4x32xf32, #tpu.memory_space<vmem>>, vector<1x4x32xf32>
    %296 = vector.shape_cast %295 : vector<1x4x32xf32> to vector<4x32xf32>
    %297 = vector.broadcast %294 : vector<1x32xf32> to vector<4x32xf32>
    %298 = arith.mulf %296, %297 : vector<4x32xf32>
    %299 = arith.addf %292, %298 : vector<4x32xf32>
    %c8_262 = arith.constant 8 : index
    %c0_263 = arith.constant 0 : index
    %c0_264 = arith.constant 0 : index
    %300 = vector.load %arg5[%c8_262, %c0_263, %c0_264] : memref<9x1x32xf32, #tpu.memory_space<vmem>>, vector<1x1x32xf32>
    %301 = vector.shape_cast %300 : vector<1x1x32xf32> to vector<1x32xf32>
    %c6_265 = arith.constant 6 : index
    %c1_266 = arith.constant 1 : index
    %c0_267 = arith.constant 0 : index
    %302 = vector.load %arg16[%c6_265, %c1_266, %c0_267] : memref<10x5x32xf32, #tpu.memory_space<vmem>>, vector<1x4x32xf32>
    %303 = vector.shape_cast %302 : vector<1x4x32xf32> to vector<4x32xf32>
    %304 = vector.broadcast %301 : vector<1x32xf32> to vector<4x32xf32>
    %305 = arith.mulf %303, %304 : vector<4x32xf32>
    %306 = arith.addf %299, %305 : vector<4x32xf32>
    %307 = vector.broadcast %96 : vector<1x32xf32> to vector<4x32xf32>
    %308 = arith.addf %306, %307 : vector<4x32xf32>
    %309 = arith.negf %308 : vector<4x32xf32>
    %310 = math.exp %309 : vector<4x32xf32>
    %cst_268 = arith.constant 1.000000e+00 : f32
    %311 = vector.broadcast %cst_268 : f32 to vector<4x32xf32>
    %312 = arith.addf %311, %310 : vector<4x32xf32>
    %313 = arith.divf %311, %312 : vector<4x32xf32>
    %314 = arith.mulf %308, %313 : vector<4x32xf32>
    %c8_269 = arith.constant 8 : index
    %c0_270 = arith.constant 0 : index
    %315 = vector.load %arg18[%c8_269, %c0_270] : memref<16x32xf32, #tpu.memory_space<vmem>>, vector<4x32xf32>
    tpu.vector_store %arg18[%c8_269, %c0_270], %314 {strides = array<i32>} : memref<16x32xf32, #tpu.memory_space<vmem>>, vector<4x32xf32>,
    %cst_271 = arith.constant 0.000000e+00 : f32
    %316 = vector.broadcast %cst_271 : f32 to vector<4x32xf32>
    %c0_272 = arith.constant 0 : index
    %c0_273 = arith.constant 0 : index
    %c0_274 = arith.constant 0 : index
    %317 = vector.load %arg5[%c0_272, %c0_273, %c0_274] : memref<9x1x32xf32, #tpu.memory_space<vmem>>, vector<1x1x32xf32>
    %318 = vector.shape_cast %317 : vector<1x1x32xf32> to vector<1x32xf32>
    %c6_275 = arith.constant 6 : index
    %c0_276 = arith.constant 0 : index
    %c0_277 = arith.constant 0 : index
    %319 = vector.load %arg16[%c6_275, %c0_276, %c0_277] : memref<10x5x32xf32, #tpu.memory_space<vmem>>, vector<1x4x32xf32>
    %320 = vector.shape_cast %319 : vector<1x4x32xf32> to vector<4x32xf32>
    %321 = vector.broadcast %318 : vector<1x32xf32> to vector<4x32xf32>
    %322 = arith.mulf %320, %321 : vector<4x32xf32>
    %323 = arith.addf %316, %322 : vector<4x32xf32>
    %c1_278 = arith.constant 1 : index
    %c0_279 = arith.constant 0 : index
    %c0_280 = arith.constant 0 : index
    %324 = vector.load %arg5[%c1_278, %c0_279, %c0_280] : memref<9x1x32xf32, #tpu.memory_space<vmem>>, vector<1x1x32xf32>
    %325 = vector.shape_cast %324 : vector<1x1x32xf32> to vector<1x32xf32>
    %c6_281 = arith.constant 6 : index
    %c0_282 = arith.constant 0 : index
    %c0_283 = arith.constant 0 : index
    %326 = vector.load %arg17[%c6_281, %c0_282, %c0_283] : memref<10x4x32xf32, #tpu.memory_space<vmem>>, vector<1x4x32xf32>
    %327 = vector.shape_cast %326 : vector<1x4x32xf32> to vector<4x32xf32>
    %328 = vector.broadcast %325 : vector<1x32xf32> to vector<4x32xf32>
    %329 = arith.mulf %327, %328 : vector<4x32xf32>
    %330 = arith.addf %323, %329 : vector<4x32xf32>
    %c2_284 = arith.constant 2 : index
    %c0_285 = arith.constant 0 : index
    %c0_286 = arith.constant 0 : index
    %331 = vector.load %arg5[%c2_284, %c0_285, %c0_286] : memref<9x1x32xf32, #tpu.memory_space<vmem>>, vector<1x1x32xf32>
    %332 = vector.shape_cast %331 : vector<1x1x32xf32> to vector<1x32xf32>
    %c6_287 = arith.constant 6 : index
    %c1_288 = arith.constant 1 : index
    %c0_289 = arith.constant 0 : index
    %333 = vector.load %arg16[%c6_287, %c1_288, %c0_289] : memref<10x5x32xf32, #tpu.memory_space<vmem>>, vector<1x4x32xf32>
    %334 = vector.shape_cast %333 : vector<1x4x32xf32> to vector<4x32xf32>
    %335 = vector.broadcast %332 : vector<1x32xf32> to vector<4x32xf32>
    %336 = arith.mulf %334, %335 : vector<4x32xf32>
    %337 = arith.addf %330, %336 : vector<4x32xf32>
    %c3_290 = arith.constant 3 : index
    %c0_291 = arith.constant 0 : index
    %c0_292 = arith.constant 0 : index
    %338 = vector.load %arg5[%c3_290, %c0_291, %c0_292] : memref<9x1x32xf32, #tpu.memory_space<vmem>>, vector<1x1x32xf32>
    %339 = vector.shape_cast %338 : vector<1x1x32xf32> to vector<1x32xf32>
    %c7_293 = arith.constant 7 : index
    %c0_294 = arith.constant 0 : index
    %c0_295 = arith.constant 0 : index
    %340 = vector.load %arg16[%c7_293, %c0_294, %c0_295] : memref<10x5x32xf32, #tpu.memory_space<vmem>>, vector<1x4x32xf32>
    %341 = vector.shape_cast %340 : vector<1x4x32xf32> to vector<4x32xf32>
    %342 = vector.broadcast %339 : vector<1x32xf32> to vector<4x32xf32>
    %343 = arith.mulf %341, %342 : vector<4x32xf32>
    %344 = arith.addf %337, %343 : vector<4x32xf32>
    %c4_296 = arith.constant 4 : index
    %c0_297 = arith.constant 0 : index
    %c0_298 = arith.constant 0 : index
    %345 = vector.load %arg5[%c4_296, %c0_297, %c0_298] : memref<9x1x32xf32, #tpu.memory_space<vmem>>, vector<1x1x32xf32>
    %346 = vector.shape_cast %345 : vector<1x1x32xf32> to vector<1x32xf32>
    %c7_299 = arith.constant 7 : index
    %c0_300 = arith.constant 0 : index
    %c0_301 = arith.constant 0 : index
    %347 = vector.load %arg17[%c7_299, %c0_300, %c0_301] : memref<10x4x32xf32, #tpu.memory_space<vmem>>, vector<1x4x32xf32>
    %348 = vector.shape_cast %347 : vector<1x4x32xf32> to vector<4x32xf32>
    %349 = vector.broadcast %346 : vector<1x32xf32> to vector<4x32xf32>
    %350 = arith.mulf %348, %349 : vector<4x32xf32>
    %351 = arith.addf %344, %350 : vector<4x32xf32>
    %c5_302 = arith.constant 5 : index
    %c0_303 = arith.constant 0 : index
    %c0_304 = arith.constant 0 : index
    %352 = vector.load %arg5[%c5_302, %c0_303, %c0_304] : memref<9x1x32xf32, #tpu.memory_space<vmem>>, vector<1x1x32xf32>
    %353 = vector.shape_cast %352 : vector<1x1x32xf32> to vector<1x32xf32>
    %c7_305 = arith.constant 7 : index
    %c1_306 = arith.constant 1 : index
    %c0_307 = arith.constant 0 : index
    %354 = vector.load %arg16[%c7_305, %c1_306, %c0_307] : memref<10x5x32xf32, #tpu.memory_space<vmem>>, vector<1x4x32xf32>
    %355 = vector.shape_cast %354 : vector<1x4x32xf32> to vector<4x32xf32>
    %356 = vector.broadcast %353 : vector<1x32xf32> to vector<4x32xf32>
    %357 = arith.mulf %355, %356 : vector<4x32xf32>
    %358 = arith.addf %351, %357 : vector<4x32xf32>
    %c6_308 = arith.constant 6 : index
    %c0_309 = arith.constant 0 : index
    %c0_310 = arith.constant 0 : index
    %359 = vector.load %arg5[%c6_308, %c0_309, %c0_310] : memref<9x1x32xf32, #tpu.memory_space<vmem>>, vector<1x1x32xf32>
    %360 = vector.shape_cast %359 : vector<1x1x32xf32> to vector<1x32xf32>
    %c8_311 = arith.constant 8 : index
    %c0_312 = arith.constant 0 : index
    %c0_313 = arith.constant 0 : index
    %361 = vector.load %arg16[%c8_311, %c0_312, %c0_313] : memref<10x5x32xf32, #tpu.memory_space<vmem>>, vector<1x4x32xf32>
    %362 = vector.shape_cast %361 : vector<1x4x32xf32> to vector<4x32xf32>
    %363 = vector.broadcast %360 : vector<1x32xf32> to vector<4x32xf32>
    %364 = arith.mulf %362, %363 : vector<4x32xf32>
    %365 = arith.addf %358, %364 : vector<4x32xf32>
    %c7_314 = arith.constant 7 : index
    %c0_315 = arith.constant 0 : index
    %c0_316 = arith.constant 0 : index
    %366 = vector.load %arg5[%c7_314, %c0_315, %c0_316] : memref<9x1x32xf32, #tpu.memory_space<vmem>>, vector<1x1x32xf32>
    %367 = vector.shape_cast %366 : vector<1x1x32xf32> to vector<1x32xf32>
    %c8_317 = arith.constant 8 : index
    %c0_318 = arith.constant 0 : index
    %c0_319 = arith.constant 0 : index
    %368 = vector.load %arg17[%c8_317, %c0_318, %c0_319] : memref<10x4x32xf32, #tpu.memory_space<vmem>>, vector<1x4x32xf32>
    %369 = vector.shape_cast %368 : vector<1x4x32xf32> to vector<4x32xf32>
    %370 = vector.broadcast %367 : vector<1x32xf32> to vector<4x32xf32>
    %371 = arith.mulf %369, %370 : vector<4x32xf32>
    %372 = arith.addf %365, %371 : vector<4x32xf32>
    %c8_320 = arith.constant 8 : index
    %c0_321 = arith.constant 0 : index
    %c0_322 = arith.constant 0 : index
    %373 = vector.load %arg5[%c8_320, %c0_321, %c0_322] : memref<9x1x32xf32, #tpu.memory_space<vmem>>, vector<1x1x32xf32>
    %374 = vector.shape_cast %373 : vector<1x1x32xf32> to vector<1x32xf32>
    %c8_323 = arith.constant 8 : index
    %c1_324 = arith.constant 1 : index
    %c0_325 = arith.constant 0 : index
    %375 = vector.load %arg16[%c8_323, %c1_324, %c0_325] : memref<10x5x32xf32, #tpu.memory_space<vmem>>, vector<1x4x32xf32>
    %376 = vector.shape_cast %375 : vector<1x4x32xf32> to vector<4x32xf32>
    %377 = vector.broadcast %374 : vector<1x32xf32> to vector<4x32xf32>
    %378 = arith.mulf %376, %377 : vector<4x32xf32>
    %379 = arith.addf %372, %378 : vector<4x32xf32>
    %380 = vector.broadcast %96 : vector<1x32xf32> to vector<4x32xf32>
    %381 = arith.addf %379, %380 : vector<4x32xf32>
    %382 = arith.negf %381 : vector<4x32xf32>
    %383 = math.exp %382 : vector<4x32xf32>
    %cst_326 = arith.constant 1.000000e+00 : f32
    %384 = vector.broadcast %cst_326 : f32 to vector<4x32xf32>
    %385 = arith.addf %384, %383 : vector<4x32xf32>
    %386 = arith.divf %384, %385 : vector<4x32xf32>
    %387 = arith.mulf %381, %386 : vector<4x32xf32>
    %c12_327 = arith.constant 12 : index
    %c0_328 = arith.constant 0 : index
    %388 = vector.load %arg18[%c12_327, %c0_328] : memref<16x32xf32, #tpu.memory_space<vmem>>, vector<4x32xf32>
    tpu.vector_store %arg18[%c12_327, %c0_328], %387 {strides = array<i32>} : memref<16x32xf32, #tpu.memory_space<vmem>>, vector<4x32xf32>,
    %c0_329 = arith.constant 0 : index
    %c0_330 = arith.constant 0 : index
    %389 = vector.load %arg18[%c0_329, %c0_330] : memref<16x32xf32, #tpu.memory_space<vmem>>, vector<16x32xf32>
    %cst_331 = arith.constant dense<0.000000e+00> : vector<32xf32>
    %390 = vector.multi_reduction <add>, %389, %cst_331 [0] : vector<16x32xf32> to vector<32xf32>
    %391 = vector.shape_cast %390 : vector<32xf32> to vector<1x32xf32>
    %cst_332 = arith.constant 1.600000e+01 : f32
    %392 = vector.broadcast %cst_332 : f32 to vector<1x32xf32>
    %393 = arith.divf %391, %392 : vector<1x32xf32>
    %c0_333 = arith.constant 0 : index
    %c0_334 = arith.constant 0 : index
    %394 = vector.load %arg7[%c0_333, %c0_334] : memref<32x2xf32, #tpu.memory_space<vmem>>, vector<32x2xf32>
    %cst_335 = arith.constant dense<0.000000e+00> : vector<1x2xf32>
    %395 = tpu.matmul %393, %394, %cst_335 {dimension_numbers = #tpu.dot_dimension_numbers<[1], [0], [0], [1], [0, 0, 1, 1], [], []>} : vector<1x32xf32>, vector<32x2xf32>, vector<1x2xf32> -> vector<1x2xf32>
    %c0_336 = arith.constant 0 : index
    %c0_337 = arith.constant 0 : index
    %396 = vector.load %arg8[%c0_336, %c0_337] : memref<1x2xf32, #tpu.memory_space<vmem>>, vector<1x2xf32>
    %397 = arith.addf %395, %396 : vector<1x2xf32>
    %398 = arith.negf %397 : vector<1x2xf32>
    %399 = math.exp %398 : vector<1x2xf32>
    %cst_338 = arith.constant 1.000000e+00 : f32
    %400 = vector.broadcast %cst_338 : f32 to vector<1x2xf32>
    %401 = arith.addf %400, %399 : vector<1x2xf32>
    %402 = arith.divf %400, %401 : vector<1x2xf32>
    %403 = arith.mulf %397, %402 : vector<1x2xf32>
    %c0_339 = arith.constant 0 : index
    %c0_340 = arith.constant 0 : index
    %404 = vector.load %arg9[%c0_339, %c0_340] : memref<2x32xf32, #tpu.memory_space<vmem>>, vector<2x32xf32>
    %cst_341 = arith.constant dense<0.000000e+00> : vector<1x32xf32>
    %405 = tpu.matmul %403, %404, %cst_341 {dimension_numbers = #tpu.dot_dimension_numbers<[1], [0], [0], [1], [0, 0, 1, 1], [], []>} : vector<1x2xf32>, vector<2x32xf32>, vector<1x32xf32> -> vector<1x32xf32>
    %c0_342 = arith.constant 0 : index
    %c0_343 = arith.constant 0 : index
    %406 = vector.load %arg10[%c0_342, %c0_343] : memref<1x32xf32, #tpu.memory_space<vmem>>, vector<1x32xf32>
    %407 = arith.addf %405, %406 : vector<1x32xf32>
    %408 = arith.negf %407 : vector<1x32xf32>
    %409 = math.exp %408 : vector<1x32xf32>
    %cst_344 = arith.constant 1.000000e+00 : f32
    %410 = vector.broadcast %cst_344 : f32 to vector<1x32xf32>
    %411 = arith.addf %410, %409 : vector<1x32xf32>
    %412 = arith.divf %410, %411 : vector<1x32xf32>
    %413 = vector.broadcast %412 : vector<1x32xf32> to vector<16x32xf32>
    %414 = arith.mulf %389, %413 : vector<16x32xf32>
    %415 = arith.truncf %414 : vector<16x32xf32> to vector<16x32xbf16>
    %c0_345 = arith.constant 0 : index
    %c0_346 = arith.constant 0 : index
    %416 = vector.load %arg11[%c0_345, %c0_346] : memref<32x16xbf16, #tpu.memory_space<vmem>>, vector<32x16xbf16>
    %cst_347 = arith.constant dense<0.000000e+00> : vector<16x16xf32>
    %417 = tpu.matmul %415, %416, %cst_347 {dimension_numbers = #tpu.dot_dimension_numbers<[1], [0], [0], [1], [0, 0, 1, 1], [], []>} : vector<16x32xbf16>, vector<32x16xbf16>, vector<16x16xf32> -> vector<16x16xf32>
    %c0_348 = arith.constant 0 : index
    %c0_349 = arith.constant 0 : index
    %418 = vector.load %arg12[%c0_348, %c0_349] : memref<1x16xf32, #tpu.memory_space<vmem>>, vector<1x16xf32>
    %419 = vector.broadcast %418 : vector<1x16xf32> to vector<16x16xf32>
    %420 = arith.addf %417, %419 : vector<16x16xf32>
    %421 = arith.truncf %420 : vector<16x16xf32> to vector<16x16xbf16>
    %c0_350 = arith.constant 0 : index
    %c0_351 = arith.constant 0 : index
    %c0_352 = arith.constant 0 : index
    %422 = vector.load %arg13[%c0_350, %c0_351, %c0_352] : memref<1x16x16xbf16, #tpu.memory_space<vmem>>, vector<1x16x16xbf16>
    %423 = vector.shape_cast %422 : vector<1x16x16xbf16> to vector<16x16xbf16>
    %424 = vector.shape_cast %421 : vector<16x16xbf16> to vector<1x16x16xbf16>
    tpu.vector_store %arg13[%c0_350, %c0_351, %c0_352], %424 {strides = array<i32>} : memref<1x16x16xbf16, #tpu.memory_space<vmem>>, vector<1x16x16xbf16>,
    return
  }
  func.func @transform_0(%arg0: i32) -> (i32, i32, i32) {
    %c0_i32 = arith.constant 0 : i32
    %c0_i32_0 = arith.constant 0 : i32
    %c0_i32_1 = arith.constant 0 : i32
    return %arg0, %c0_i32, %c0_i32_0 : i32, i32, i32
  }
  func.func @transform_1(%arg0: i32) -> (i32, i32, i32) {
    %c0_i32 = arith.constant 0 : i32
    %c0_i32_0 = arith.constant 0 : i32
    %c0_i32_1 = arith.constant 0 : i32
    return %arg0, %c0_i32, %c0_i32_0 : i32, i32, i32
  }
  func.func @transform_2(%arg0: i32) -> (i32, i32) {
    %c0_i32 = arith.constant 0 : i32
    %c0_i32_0 = arith.constant 0 : i32
    %c0_i32_1 = arith.constant 0 : i32
    return %c0_i32, %c0_i32_0 : i32, i32
  }
  func.func @transform_3(%arg0: i32) -> (i32, i32) {
    %c0_i32 = arith.constant 0 : i32
    %c0_i32_0 = arith.constant 0 : i32
    %c0_i32_1 = arith.constant 0 : i32
    return %c0_i32, %c0_i32_0 : i32, i32
  }
  func.func @transform_4(%arg0: i32) -> (i32, i32, i32) {
    %c0_i32 = arith.constant 0 : i32
    %c0_i32_0 = arith.constant 0 : i32
    %c0_i32_1 = arith.constant 0 : i32
    %c0_i32_2 = arith.constant 0 : i32
    return %c0_i32, %c0_i32_0, %c0_i32_1 : i32, i32, i32
  }
  func.func @transform_5(%arg0: i32) -> (i32, i32) {
    %c0_i32 = arith.constant 0 : i32
    %c0_i32_0 = arith.constant 0 : i32
    %c0_i32_1 = arith.constant 0 : i32
    return %c0_i32, %c0_i32_0 : i32, i32
  }
  func.func @transform_6(%arg0: i32) -> (i32, i32) {
    %c0_i32 = arith.constant 0 : i32
    %c0_i32_0 = arith.constant 0 : i32
    %c0_i32_1 = arith.constant 0 : i32
    return %c0_i32, %c0_i32_0 : i32, i32
  }
  func.func @transform_7(%arg0: i32) -> (i32, i32) {
    %c0_i32 = arith.constant 0 : i32
    %c0_i32_0 = arith.constant 0 : i32
    %c0_i32_1 = arith.constant 0 : i32
    return %c0_i32, %c0_i32_0 : i32, i32
  }
  func.func @transform_8(%arg0: i32) -> (i32, i32) {
    %c0_i32 = arith.constant 0 : i32
    %c0_i32_0 = arith.constant 0 : i32
    %c0_i32_1 = arith.constant 0 : i32
    return %c0_i32, %c0_i32_0 : i32, i32
  }
  func.func @transform_9(%arg0: i32) -> (i32, i32) {
    %c0_i32 = arith.constant 0 : i32
    %c0_i32_0 = arith.constant 0 : i32
    %c0_i32_1 = arith.constant 0 : i32
    return %c0_i32, %c0_i32_0 : i32, i32
  }
  func.func @transform_10(%arg0: i32) -> (i32, i32) {
    %c0_i32 = arith.constant 0 : i32
    %c0_i32_0 = arith.constant 0 : i32
    %c0_i32_1 = arith.constant 0 : i32
    return %c0_i32, %c0_i32_0 : i32, i32
  }
  func.func @transform_11(%arg0: i32) -> (i32, i32) {
    %c0_i32 = arith.constant 0 : i32
    %c0_i32_0 = arith.constant 0 : i32
    %c0_i32_1 = arith.constant 0 : i32
    return %c0_i32, %c0_i32_0 : i32, i32
  }
  func.func @transform_12(%arg0: i32) -> (i32, i32, i32) {
    %c0_i32 = arith.constant 0 : i32
    %c0_i32_0 = arith.constant 0 : i32
    %c0_i32_1 = arith.constant 0 : i32
    return %arg0, %c0_i32, %c0_i32_0 : i32, i32, i32
  }
}

module attributes {stable_mosaic.version = 11 : i64} {
  func.func @_head_kernel(%arg0: i32, %arg1: memref<1x16x16xbf16, #tpu.memory_space<vmem>>, %arg2: memref<16x64xbf16, #tpu.memory_space<vmem>>, %arg3: memref<1x64xf32, #tpu.memory_space<vmem>>, %arg4: memref<64x10xbf16, #tpu.memory_space<vmem>>, %arg5: memref<1x10xf32, #tpu.memory_space<vmem>>, %arg6: memref<1x1x10xf32, #tpu.memory_space<vmem>>) attributes {dimension_semantics = [#tpu.dimension_semantics<parallel>], iteration_bounds = array<i64: 2>, scalar_prefetch = 0 : i64, scratch_operands = 0 : i64, tpu.core_type = #tpu.core_type<tc>, window_params = [{transform_indices = @transform_0, window_bounds = array<i64: 1, 16, 16>}, {pipeline_mode = #tpu.pipeline_mode<synchronous>, transform_indices = @transform_1, window_bounds = array<i64: 16, 64>}, {pipeline_mode = #tpu.pipeline_mode<synchronous>, transform_indices = @transform_2, window_bounds = array<i64: 1, 64>}, {pipeline_mode = #tpu.pipeline_mode<synchronous>, transform_indices = @transform_3, window_bounds = array<i64: 64, 10>}, {pipeline_mode = #tpu.pipeline_mode<synchronous>, transform_indices = @transform_4, window_bounds = array<i64: 1, 10>}, {transform_indices = @transform_5, window_bounds = array<i64: 1, 1, 10>}]} {
    %c0 = arith.constant 0 : index
    %c0_0 = arith.constant 0 : index
    %c0_1 = arith.constant 0 : index
    %0 = vector.load %arg1[%c0, %c0_0, %c0_1] : memref<1x16x16xbf16, #tpu.memory_space<vmem>>, vector<1x16x16xbf16>
    %1 = vector.shape_cast %0 : vector<1x16x16xbf16> to vector<16x16xbf16>
    %c0_2 = arith.constant 0 : index
    %c0_3 = arith.constant 0 : index
    %2 = vector.load %arg2[%c0_2, %c0_3] : memref<16x64xbf16, #tpu.memory_space<vmem>>, vector<16x64xbf16>
    %cst = arith.constant dense<0.000000e+00> : vector<16x64xf32>
    %3 = tpu.matmul %1, %2, %cst {dimension_numbers = #tpu.dot_dimension_numbers<[1], [0], [0], [1], [0, 0, 1, 1], [], []>} : vector<16x16xbf16>, vector<16x64xbf16>, vector<16x64xf32> -> vector<16x64xf32>
    %c0_4 = arith.constant 0 : index
    %c0_5 = arith.constant 0 : index
    %4 = vector.load %arg3[%c0_4, %c0_5] : memref<1x64xf32, #tpu.memory_space<vmem>>, vector<1x64xf32>
    %5 = vector.broadcast %4 : vector<1x64xf32> to vector<16x64xf32>
    %6 = arith.addf %3, %5 : vector<16x64xf32>
    %7 = arith.negf %6 : vector<16x64xf32>
    %8 = math.exp %7 : vector<16x64xf32>
    %cst_6 = arith.constant 1.000000e+00 : f32
    %9 = vector.broadcast %cst_6 : f32 to vector<16x64xf32>
    %10 = arith.addf %9, %8 : vector<16x64xf32>
    %11 = arith.divf %9, %10 : vector<16x64xf32>
    %12 = arith.mulf %6, %11 : vector<16x64xf32>
    %cst_7 = arith.constant dense<0.000000e+00> : vector<64xf32>
    %13 = vector.multi_reduction <add>, %12, %cst_7 [0] : vector<16x64xf32> to vector<64xf32>
    %14 = vector.shape_cast %13 : vector<64xf32> to vector<1x64xf32>
    %cst_8 = arith.constant 1.600000e+01 : f32
    %15 = vector.broadcast %cst_8 : f32 to vector<1x64xf32>
    %16 = arith.divf %14, %15 : vector<1x64xf32>
    %17 = arith.truncf %16 : vector<1x64xf32> to vector<1x64xbf16>
    %c0_9 = arith.constant 0 : index
    %c0_10 = arith.constant 0 : index
    %18 = vector.load %arg4[%c0_9, %c0_10] : memref<64x10xbf16, #tpu.memory_space<vmem>>, vector<64x10xbf16>
    %cst_11 = arith.constant dense<0.000000e+00> : vector<1x10xf32>
    %19 = tpu.matmul %17, %18, %cst_11 {dimension_numbers = #tpu.dot_dimension_numbers<[1], [0], [0], [1], [0, 0, 1, 1], [], []>} : vector<1x64xbf16>, vector<64x10xbf16>, vector<1x10xf32> -> vector<1x10xf32>
    %c0_12 = arith.constant 0 : index
    %c0_13 = arith.constant 0 : index
    %20 = vector.load %arg5[%c0_12, %c0_13] : memref<1x10xf32, #tpu.memory_space<vmem>>, vector<1x10xf32>
    %21 = arith.addf %19, %20 : vector<1x10xf32>
    %c0_14 = arith.constant 0 : index
    %c0_15 = arith.constant 0 : index
    %c0_16 = arith.constant 0 : index
    %22 = vector.load %arg6[%c0_14, %c0_15, %c0_16] : memref<1x1x10xf32, #tpu.memory_space<vmem>>, vector<1x1x10xf32>
    %23 = vector.shape_cast %22 : vector<1x1x10xf32> to vector<1x10xf32>
    %24 = vector.shape_cast %21 : vector<1x10xf32> to vector<1x1x10xf32>
    tpu.vector_store %arg6[%c0_14, %c0_15, %c0_16], %24 {strides = array<i32>} : memref<1x1x10xf32, #tpu.memory_space<vmem>>, vector<1x1x10xf32>,
    return
  }
  func.func @transform_0(%arg0: i32) -> (i32, i32, i32) {
    %c0_i32 = arith.constant 0 : i32
    %c0_i32_0 = arith.constant 0 : i32
    %c0_i32_1 = arith.constant 0 : i32
    return %arg0, %c0_i32, %c0_i32_0 : i32, i32, i32
  }
  func.func @transform_1(%arg0: i32) -> (i32, i32) {
    %c0_i32 = arith.constant 0 : i32
    %c0_i32_0 = arith.constant 0 : i32
    %c0_i32_1 = arith.constant 0 : i32
    return %c0_i32, %c0_i32_0 : i32, i32
  }
  func.func @transform_2(%arg0: i32) -> (i32, i32) {
    %c0_i32 = arith.constant 0 : i32
    %c0_i32_0 = arith.constant 0 : i32
    %c0_i32_1 = arith.constant 0 : i32
    return %c0_i32, %c0_i32_0 : i32, i32
  }
  func.func @transform_3(%arg0: i32) -> (i32, i32) {
    %c0_i32 = arith.constant 0 : i32
    %c0_i32_0 = arith.constant 0 : i32
    %c0_i32_1 = arith.constant 0 : i32
    return %c0_i32, %c0_i32_0 : i32, i32
  }
  func.func @transform_4(%arg0: i32) -> (i32, i32) {
    %c0_i32 = arith.constant 0 : i32
    %c0_i32_0 = arith.constant 0 : i32
    %c0_i32_1 = arith.constant 0 : i32
    return %c0_i32, %c0_i32_0 : i32, i32
  }
  func.func @transform_5(%arg0: i32) -> (i32, i32, i32) {
    %c0_i32 = arith.constant 0 : i32
    %c0_i32_0 = arith.constant 0 : i32
    %c0_i32_1 = arith.constant 0 : i32
    return %arg0, %c0_i32, %c0_i32_0 : i32, i32, i32
  }
}

</mosaic_0001>

<bundles_post_ra>
// kernel: efficientnet_forward.4
= control target key start
LH: loop header
LB: loop body
LE: loop exit
PB: predicated region body
PF: predicated region fallthrough
CT: control target
= control target key end

     0   :  { %v133_v0 = vmov 0.0   ;;  %vm134_vm0 = vmmov 0   ;;  %v135_v2 = vmov 0   ;;  %vm46_vm1 = vcmask 1041408   ;;  %s174_s1 = inlined_call_operand.vmem [shape: bf16[36,128], index: 1, kind: input, shape index: {}]   ;;  %s175_s2 = inlined_call_operand.vmem [shape: f32[8,1], index: 2, kind: input, shape index: {}]   ;;  %s176_s0 = inlined_call_operand.vmem [shape: bf16[8,36], index: 0, kind: input, shape index: {}]   ;;  %s177_s3 = inlined_call_operand.vmem [shape: bf16[8,128], index: 3, kind: output, shape index: {}]  }
   0x1   :  { %112 = vmatprep.subr.bf16.mxu0 %v133_v0  ;;  %v126_v1 = vld [vmem:[%s174_s1] sm:$0xff]   ;;  %118 = vmatprep.mubr.msk.bf16.mxu0 %vm134_vm0, %v133_v0  ;;  %v127_v3 = vld [vmem:[%s174_s1 + $0x8] sm:$0xff]   ;;  %v128_v5 = vld [vmem:[%s174_s1 + $0x10] ss:$0 sps:$4 sm:$0x33]   ;;  %vm42_vm2 = vcmask 293888  }
   0x2   :  { %125 = vset.pattern.permute.xlu0 %v135_v2  ;;  %113 = vmatpush3.bf16.msra.mxu0 %v126_v1  ;;  %v21_v4 = vld [vmem:[%s175_s2] sm:$0xff]  ;;  %v48_v6 = vsel %vm46_vm1, %v128_v5, 0 }
   0x3   :  { %114 = vmatprep.subr.bf16.mxu0 %v133_v0  ;;  %24 = vperm.xlu0 %125, %v21_v4   ;;  %v15_v7 = vld [vmem:[%s176_s0] sm:$0xf] }
   0x6   :  { %115 = vmatpush3.bf16.msra.mxu0 %v127_v3 }
   0x7   :  { %116 = vmatprep.subr.bf16.mxu0 %v133_v0 }
   0xa   :  { %117 = vmatpush3.bf16.msra.mxu0 %v48_v6 }
   0xd   :  { %119 = vmatmul.mubr.msk.bf16.vlgmr.msra.gmra.mrb[0].mxu0 %vm42_vm2, %v15_v7 }
  0x82   :  { %v25_v8 = vpop.permute.xlu0 %24 }
  0xe0   :  { %v84_v9 = vpop.f32.mrb[0].mxu0 }
  0xe1   :  { %v85_v10 = vadd.f32 %v84_v9, %v25_v8  ;;  %v120_v11 = vpop.f32.mrb[1].mxu0 }
  0xe2   :  { %v87_v12 = vpop.f32.mrb[2].mxu0 }
  0xe3   :  { %v107_v13 = vmul.f32 -1.442695, %v85_v10  ;;  %v121_v14 = vpop.f32.mrb[3].mxu0 }
  0xe5   :  { %129 = vpow2.f32 %v107_v13 }
  0xef   :  { %v130_v15 = vpop.eup %129 }
  0xf0   :  { %v93_v16 = vadd.f32 1.0, %v130_v15 }
  0xf2   :  { %131 = vrcp.f32 %v93_v16 }
  0xfc   :  { %v132_v17 = vpop.eup %131 }
  0xfd   :  { %v96_v18 = vmul.f32 %v132_v17, %v85_v10 }
  0xff   :  { %v97_v19 = vpack.c.bf16 %v96_v18, %v96_v18 }
 0x101   :  { %98 = vst [vmem:[%s177_s3] sm:$0xf] %v97_v19 }

// kernel: efficientnet_forward.7
= control target key start
LH: loop header
LB: loop body
LE: loop exit
PB: predicated region body
PF: predicated region fallthrough
CT: control target
= control target key end

     0   :  { %10 = vsyncpa [#allocation3], 0  ;;  %s782_s0 = inlined_call_operand.vmem [shape: bf16[2,16,16], index: 0, kind: input, shape index: {}]   ;;  %s783_s1 = inlined_call_operand.vmem [shape: bf16[16,64], index: 1, kind: input, shape index: {}]   ;;  %s784_s2 = inlined_call_operand.vmem [shape: f32[1,64], index: 2, kind: input, shape index: {}]   ;;  %s785_s3 = inlined_call_operand.vmem [shape: bf16[64,10], index: 3, kind: input, shape index: {}]   ;;  %s786_s4 = inlined_call_operand.vmem [shape: f32[1,10], index: 4, kind: input, shape index: {}]   ;;  %s787_s5 = inlined_call_operand.hbm [shape: f32[2,1,10], index: 5, kind: output, shape index: {}]  }
   0x1   :  { %12 = vsyncpa [#allocation3 + $0x1], 0  ;;  %s661_s18 = smov 0   ;;  %s663_s19 = smov 0  }
   0x2   :  { %s665_s20 = smov 0   ;;  %s667_s21 = smov 0  }
   0x3 LB: > { %s682_s22 = sadd.s32 4294967295, %s626_s21   ;;  %s463_s23 = sadd.s32 4294967294, %s626_s21   ;;  %s626_s21 = sphi %s667_s21, %s793_s21   ;;  %s622_s20 = sphi %s665_s20, %s792_s20   ;;  %s618_s19 = sphi %s663_s19, %s791_s19   ;;  %s614_s18 = sphi %s661_s18, %s790_s18  }
   0x4   : > { %s686_s24 = sadd.s32 1, %s626_s21   ;;  %s135_s25 = sadd.s32 1, %s622_s20 }
   0x5   : > { %s132_s26 = ssub.s32 %s626_s21, %s686_s24  ;;  %p145_p0 = scmp.ne.s32.totalorder %s622_s20, %s618_s19 }
   0x6   : > { %p133_p1 = scmp.eq.s32.totalorder %s132_s26, 0  ;;  %p146_p2 = scmp.eq.s32.totalorder %s682_s22, 1 }
   0x7   : > { %p151_p3 = scmp.ne.s32.totalorder %s618_s19, %s614_s18  ;;  %p152_p4 = scmp.eq.s32.totalorder %s463_s23, 1 }
   0x8   : > { %s697_s27 = scalar_select %p133_p1, %s622_s20, %s135_s25  }
   0x9   : > { %p699_p5 = por %p146_p2, %p145_p0  ;;  %p703_p6 = por %p152_p4, %p151_p3 }
   0xa   : > { %p466_p7 = scmp.ge.s32.totalorder %s626_s21, 1  ;;  %p190_p8 = scmp.lt.s32.totalorder %s626_s21, 3 }
   0xc   : > { %p191_p9 = pnand %p466_p7, %p190_p8 }
   0xd   : > { %v550_v0 = vld [vmem:[%s783_s1] sm:$0xff] (!%p191_p9)   ;;  %v628_v1 = vmov (!%p191_p9), 0.0   ;;  %p217_p10 = scmp.lt.s32.totalorder (!%p191_p9), %s682_s22, 1  ;;  %vm629_vm0 = vmmov (!%p191_p9), 0   ;;  %vm245_vm1 = vcmask (!%p191_p9), 130048   ;;  %v553_v4 = vld [vmem:[%s785_s3 + $0x8] sm:$0xff] (!%p191_p9)  }
   0xe   : > { %194 = sbr.rel (%p191_p9) target bundleno = 517 (0x205), region = 40  ;;  %491 = vmatprep.subr.bf16.mxu0 (!%p191_p9), %v628_v1  ;;  %497 = vmatprep.subr.bf16.mxu1 (!%p191_p9), %v628_v1  ;;  %v552_v3 = vld [vmem:[%s785_s3] sm:$0xff] (!%p191_p9)   ;;  %v554_v5 = vld [vmem:[%s785_s3 + $0x10] sm:$0xff] (!%p191_p9)   ;;  %v555_v6 = vld [vmem:[%s785_s3 + $0x18] sm:$0xff] (!%p191_p9)   ;;  %vm304_vm2 = vcmask (!%p191_p9), 523264   ;;  %s215_s6 = sand.u32 (!%p191_p9), 1, %s618_s19  }
   0xf   : > { %492 = vmatpush3.bf16.msra.mxu0 (!%p191_p9), %v550_v0  ;;  %493 = vmatprep.mubr.msk.bf16.mxu0 (!%p191_p9), %vm629_vm0, %v628_v1  ;;  %v469_v7 = vld [vmem:[%s784_s2] ss:$0 sm:$0xff] (!%p191_p9)  ;;  %s480_s9 = sshll.u32 (!%p191_p9), %s682_s22, 4  ;;  %s216_s10 = scalar_lea.vmem (!%p191_p9), [#allocation2], %s215_s6  ;;  %vm393_vm3 = vcmask (!%p191_p9), 73728  }
  0x10   : > { %505 = vmatprep.mubr.msk.bf16.mxu1 (!%p191_p9), %vm629_vm0, %v628_v1  ;;  %498 = vmatpush3.bf16.msra.mxu1 (!%p191_p9), %v552_v3  ;;  %v325_v35 = vld [vmem:[%s786_s4] sm:$0x1] (!%p191_p9)  ;;  %s740_s14 = scalar_lea.hbm (!%p191_p9), %s787_s5, %s480_s9  ;;  %s630_s16 = smov (!%p191_p9), [#allocation2]  }
  0x11   : > { %499 = vmatprep.subr.bf16.mxu1 (!%p191_p9), %v628_v1  ;;  %s568_s17 = sshll.u32 (!%p191_p9), %s630_s16, 4  ;;  %s569_s17 = int_to_ptr.vmem [resolvable:$false] %s568_s17 }
  0x12   : > { %s570_s23 = scalar_lea.vmem (!%p191_p9), %s569_s17, 32 }
  0x14   : > { %500 = vmatpush3.bf16.msra.mxu1 (!%p191_p9), %v553_v4 }
  0x15   : > { %s218_s7 = scalar_select %p217_p10, %s682_s22, 1  ;;  %501 = vmatprep.subr.bf16.mxu1 %v628_v1 }
  0x16   : > { %s396_s22 = scalar_lea.sflag [#allocation3], %s215_s6 }
  0x17   : > { %s483_s8 = sshll.u32 %s218_s7, 3 }
  0x18   : > { %s221_s11 = scalar_lea.vmem %s782_s0, %s483_s8  ;;  %502 = vmatpush3.bf16.msra.mxu1 %v554_v5 }
  0x19   : > { %v551_v2 = vld [vmem:[%s221_s11] sm:$0xff]   ;;  %503 = vmatprep.subr.bf16.mxu1 %v628_v1  ;;  %s408_s11 = sshll.u32 %s216_s10, 4  ;;  %s742_s11 = int_to_ptr.vmem [resolvable:$true] %s408_s11 }
  0x1a   : > { %494 = vmatmul.mubr.msk.bf16.vlgmr.msra.gmra.mrb[0].mxu0 %vm245_vm1, %v551_v2  ;;  %s564_s15 = scalar_lea.vmem %s742_s11, 16  ;;  %p571_p0 = scmp.lt.s32.totalorder %s742_s11, %s569_s17 }
  0x1b   : > { %p565_p11 = scmp.ne.s32.totalorder %s742_s11, %s564_s15  ;;  %p572_p1 = scmp.lt.s32.totalorder %s570_s23, %s564_s15 }
  0x1c   : > { %504 = vmatpush3.bf16.msra.mxu1 %v555_v6 }
  0x1d   : > { %p566_p12 = pnand %p565_p11, %p699_p5  ;;  %p573_p2 = por %p572_p1, %p571_p0 }
  0x1f   : > { %p567_p13 = pneg %p566_p12 }
  0x21   : > { %p574_p3 = pnand %p573_p2, %p567_p13 }
  0xed   : > { %v283_v8 = vpop.f32.mrb[0].mxu0 }
  0xee   : > { %v284_v9 = vadd.f32 %v469_v7, %v283_v8  ;;  %v495_v10 = vpop.f32.mrb[1].mxu0 }
  0xef   : > { %v286_v11 = vpop.f32.mrb[2].mxu0 }
  0xf0   : > { %v473_v12 = vmul.f32 -1.442695, %v284_v9  ;;  %v287_v13 = vadd.f32 %v469_v7, %v286_v11  ;;  %v496_v14 = vpop.f32.mrb[3].mxu0 }
  0xf2   : > { %556 = vpow2.f32 %v473_v12  ;;  %v474_v15 = vmul.f32 -1.442695, %v287_v13 }
  0xf4   : > { %558 = vpow2.f32 %v474_v15 }
  0xfc   : > { %v557_v16 = vpop.eup %556 }
  0xfd   : > { %v296_v17 = vadd.f32 1.0, %v557_v16 }
  0xfe   : > { %v559_v18 = vpop.eup %558 }
  0xff   : > { %560 = vrcp.f32 %v296_v17  ;;  %v297_v19 = vadd.f32 1.0, %v559_v18 }
 0x101   : > { %562 = vrcp.f32 %v297_v19 }
 0x109   : > { %v561_v20 = vpop.eup %560 }
 0x10a   : > { %v302_v21 = vmul.f32 %v561_v20, %v284_v9 }
 0x10b   : > { %v563_v22 = vpop.eup %562 }
 0x10c   : > { %v303_v23 = vmul.f32 %v563_v22, %v287_v13  ;;  %v305_v24 = vsel %vm304_vm2, %v302_v21, 0.0 }
 0x10e   : > { %v306_v25 = vsel %vm304_vm2, %v303_v23, 0.0 }
 0x10f   : > { %v307_v26 = vadd.f32 %v306_v25, %v305_v24 }
 0x111   : > { %v308_v27 = vrot.slane %v307_v26, 4 }
 0x113   : > { %v309_v28 = vadd.f32 %v308_v27, %v307_v26 }
 0x115   : > { %v310_v29 = vrot.slane %v309_v28, 2 }
 0x117   : > { %v311_v30 = vadd.f32 %v310_v29, %v309_v28 }
 0x119   : > { %v312_v31 = vrot.slane %v311_v30, 1 }
 0x11b   : > { %v313_v32 = vadd.f32 %v312_v31, %v311_v30 }
 0x11d   : > { %v315_v33 = vmul.f32 0.0625, %v313_v32 }
 0x11f   : > { %v316_v34 = vpack.c.bf16 %v315_v33, %v315_v33 }
 0x121   : > { %506 = vmatmul.mubr.msk.bf16.vlgmr.msra.gmra.mrb[0].mxu1 %vm304_vm2, %v316_v34 }
 0x1f4   : > { %v387_v36 = vpop.f32.mrb[0].mxu1 }
 0x1f5   : > { %v388_v37 = vadd.f32 %v387_v36, %v325_v35  ;;  %v507_v38 = vpop.f32.mrb[1].mxu1 }
 0x1f6   : > { %v390_v39 = vpop.f32.mrb[2].mxu1 }
 0x1f7   : > { %v508_v40 = vpop.f32.mrb[3].mxu1  ;;  %394 = vst.msk [vmem:[%s216_s10] sm:$0x1] %vm393_vm3, %v388_v37 }
 0x1f8   : > { %577 = shalt.err (!%p574_p3)
}
 0x1f9   : > { %s578_s25 = scalar_lea.hbm %s740_s14, 16  ;;  %s582_s6 = scalar_lea.hbm %s787_s5, 32 }
 0x1fa   : > { %p579_p4 = scmp.ne.s32.totalorder %s740_s14, %s578_s25  ;;  %p583_p9 = scmp.lt.u32.totalorder %s740_s14, %s787_s5 }
 0x1fb   : > { %p584_p10 = scmp.lt.u32.totalorder %s582_s6, %s578_s25  ;;  %p586_p12 = scmp.lt.u32.totalorder %s578_s25, %s740_s14 }
 0x1fc   : > { %p580_p7 = pnand %p579_p4, %p699_p5 }
 0x1fd   : > { %p585_p11 = por %p584_p10, %p583_p9 }
 0x1fe   : > { %p581_p8 = pneg %p580_p7 }
 0x1ff   : > { %p587_p13 = por %p586_p12, %p585_p11 }
 0x201   : > { %p588_p0 = pnand %p587_p13, %p581_p8 }
 0x203   : > { %591 = shalt.err (!%p588_p0)
}
 0x204   : > { %509 = dma.vmem_to_hbm [thread:$0]  (%p699_p5), %s742_s11, 16, %s740_s14, %s396_s22  }
 0x205 PF: > { %p515_p1 = scmp.ge.s32.totalorder %s626_s21, 2  ;;  %s420_s9 = sand.u32 1, %s614_s18  }
 0x206   : > { %s421_s10 = scalar_lea.sflag [#allocation3], %s420_s9 }
 0x207   : > { %p512_p2 = pnand %p515_p1, %p703_p6 }
 0x209   : > { %609 = dma.done.wait (!%p512_p2), %s421_s10, 16  }
 0x20a   : > { %611 = vsyncadd (!%p512_p2), %s421_s10, 4294967280  ;;  %p15_p3 = scmp.ge.s32.totalorder %s686_s24, 4   ;;  %s790_s18 = smov %s618_s19 }
 0x20b   : > { %s791_s19 = smov %s622_s20  ;;  %s792_s20 = smov %s697_s27 }
 0x20c   : > { %s793_s21 = smov %s686_s24  ;;  %17 = sbr.rel (!%p15_p3) target bundleno = 3 (0x3), region = 75 }
 0x213   :  { %425 = vsyncpa [#allocation3], 1 }
 0x214   :  { %427 = vsyncpa [#allocation3 + $0x1], 1 }

// kernel: efficientnet_forward.6
= control target key start
LH: loop header
LB: loop body
LE: loop exit
PB: predicated region body
PF: predicated region fallthrough
CT: control target
= control target key end

     0   :  { %s1808_s21 = smov 0   ;;  %s1999_s0 = inlined_call_operand.vmem [shape: bf16[2,32,8], index: 0, kind: input, shape index: {}]   ;;  %s2000_s1 = inlined_call_operand.vmem [shape: bf16[2,32,8], index: 1, kind: input, shape index: {}]   ;;  %s2001_s2 = inlined_call_operand.vmem [shape: bf16[8,32], index: 2, kind: input, shape index: {}]   ;;  %s2002_s3 = inlined_call_operand.vmem [shape: f32[1,32], index: 3, kind: input, shape index: {}, may-alias: {3,5,9}]   ;;  %s2003_s4 = inlined_call_operand.vmem [shape: f32[9,1,32], index: 4, kind: input, shape index: {}]   ;;  %s2004_s5 = inlined_call_operand.vmem [shape: f32[1,32], index: 5, kind: input, shape index: {}, may-alias: {3,5,9}]   ;;  %s2005_s6 = inlined_call_operand.vmem [shape: f32[32,2], index: 6, kind: input, shape index: {}]   ;;  %s2006_s7 = inlined_call_operand.vmem [shape: f32[1,2], index: 7, kind: input, shape index: {}]   ;;  %s2007_s8 = inlined_call_operand.vmem [shape: f32[2,32], index: 8, kind: input, shape index: {}]   ;;  %s2008_s9 = inlined_call_operand.vmem [shape: f32[1,32], index: 9, kind: input, shape index: {}, may-alias: {3,5,9}]   ;;  %s2009_s10 = inlined_call_operand.vmem [shape: bf16[32,16], index: 10, kind: input, shape index: {}]   ;;  %s2010_s11 = inlined_call_operand.vmem [shape: f32[1,16], index: 11, kind: input, shape index: {}]   ;;  %s2011_s12 = inlined_call_operand.vmem [shape: bf16[2,16,16], index: 12, kind: output, shape index: {}]  }
   0x1 LB: > { %s1479_s22 = sadd.s32 4294967295, %s1738_s21   ;;  %p1483_p0 = scmp.ge.s32.totalorder %s1738_s21, 1  ;;  %s1738_s21 = sphi %s1808_s21, %s22_s21  }
   0x2   : > { %p372_p1 = scmp.lt.s32.totalorder %s1738_s21, 3 }
   0x4   : > { %p373_p2 = pnand %p1483_p0, %p372_p1 }
   0x5   : > { %v439_v0 = vld [vmem:[%s2001_s2] sm:$0xf] (!%p373_p2)  ;;  %vm464_vm0 = vcmask (!%p373_p2), 1043456   ;;  %p419_p3 = scmp.lt.s32.totalorder (!%p373_p2), %s1479_s22, 1  ;;  %vm457_vm1 = vcmask (!%p373_p2), 64512   ;;  %vm673_vm2 = vcmask (!%p373_p2), 257024  }
   0x6   : > { %376 = sbr.rel (%p373_p2) target bundleno = 1066 (0x42a), region = 68  ;;  %v554_v1 = vld [vmem:[%s2001_s2] sm:$0xf] (!%p373_p2)  ;;  %1657 = vmatprep.subr.msk.bf16.mxu0 (!%p373_p2), %vm464_vm0, %v439_v0  ;;  %v466_v2 = vsel (!%p373_p2), %vm464_vm0, %v439_v0, 0  ;;  %v1740_v8 = vmov (!%p373_p2), 0.0   ;;  %vm662_vm3 = vcmask (!%p373_p2), 258048  }
   0x7   : > { %1658 = vmatprep.subr.msk.bf16.mxu1 (!%p373_p2), %vm464_vm0, %v554_v1  ;;  %v579_v3 = vsel (!%p373_p2), %vm464_vm0, %v554_v1, 0  ;;  %1616 = vmatpush3.bf16.msra.mxu0 (!%p373_p2), %v466_v2  ;;  %679 = vst.msk [vmem:[#allocation5 + $0x14] sm:$0xf] (!%p373_p2), %vm673_vm2, %v1740_v8  ;;  %680 = vst.msk [vmem:[#allocation5 + $0x18] sm:$0xf] (!%p373_p2), %vm673_vm2, %v1740_v8  ;;  %v1156_v9 = vld [vmem:[%s2005_s6] sm:$0xff] (!%p373_p2) }
   0x8   : > { %1622 = vmatpush3.bf16.msra.mxu1 (!%p373_p2), %v579_v3  ;;  %674 = vst.msk [vmem:[#allocation5] sm:$0xf] (!%p373_p2), %vm673_vm2, %v1740_v8  ;;  %675 = vst.msk [vmem:[#allocation5 + $0x4] sm:$0xf] (!%p373_p2), %vm673_vm2, %v1740_v8  ;;  %1643 = vmatprep.subr.bf16.mxu0 (!%p373_p2), %v1740_v8  ;;  %v1157_v10 = vld [vmem:[%s2005_s6 + $0x8] sm:$0xff] (!%p373_p2)  ;;  %v1158_v11 = vld [vmem:[%s2005_s6 + $0x10] sm:$0xff] (!%p373_p2) }
   0x9   : > { %676 = vst.msk [vmem:[#allocation5 + $0x8] sm:$0xf] (!%p373_p2), %vm673_vm2, %v1740_v8  ;;  %677 = vst.msk [vmem:[#allocation5 + $0xc] sm:$0xf] (!%p373_p2), %vm673_vm2, %v1740_v8  ;;  %v1741_v12 = vmov (!%p373_p2), 0.0|0.0   ;;  %v1652_v13 = vpack.c.bf16 (!%p373_p2), %v1157_v10, %v1156_v9  ;;  %v1159_v14 = vld [vmem:[%s2005_s6 + $0x18] sm:$0xff] (!%p373_p2) }
   0xa   : > { %678 = vst.msk [vmem:[#allocation5 + $0x10] sm:$0xf] (!%p373_p2), %vm673_vm2, %v1740_v8  ;;  %681 = vst.msk [vmem:[#allocation5 + $0x1c] sm:$0xf] (!%p373_p2), %vm673_vm2, %v1740_v8  ;;  %1651 = vmatprep.subr.bf16.mxu1 (!%p373_p2), %v1741_v12  ;;  %vm1742_vm4 = vmmov (!%p373_p2), 0   ;;  %v1655_v15 = vpack.c.bf16 (!%p373_p2), %v1159_v14, %v1158_v11  ;;  %vm545_vm5 = vcmask (!%p373_p2), 261120  }
   0xb   : > { %682 = vst.msk [vmem:[#allocation5 + $0x20] sm:$0xf] (!%p373_p2), %vm673_vm2, %v1740_v8  ;;  %v1490_v16 = vld [vmem:[%s2002_s3] ss:$0 sm:$0xff] (!%p373_p2)  ;;  %v1887_v9 = vld [vmem:[%s2003_s4 + $0x1] ss:$0 sm:$0xff] (!%p373_p2) }
   0xc   : > { %663 = vst.msk [vmem:[#allocation4] sm:$0x1f] (!%p373_p2), %vm662_vm3, %v1740_v8  ;;  %668 = vst.msk [vmem:[#allocation4 + $0x28] sm:$0x1f] (!%p373_p2), %vm662_vm3, %v1740_v8  ;;  %v1893_v11 = vld [vmem:[%s2003_s4] ss:$0 sm:$0xff] (!%p373_p2) }
   0xd   : > { %s2013_s22 = smov (!%p419_p3, %s1479_s22), 1  ;;  %669 = vst.msk [vmem:[#allocation4 + $0x30] sm:$0x1f] %vm662_vm3, %v1740_v8  ;;  %664 = vst.msk [vmem:[#allocation4 + $0x8] sm:$0x1f] %vm662_vm3, %v1740_v8  ;;  %vm1247_vm6 = vcmask 1041408  }
   0xe   : > { %s1594_s27 = sshll.u32 %s2013_s22, 4  ;;  %665 = vst.msk [vmem:[#allocation4 + $0x10] sm:$0x1f] %vm662_vm3, %v1740_v8  ;;  %666 = vst.msk [vmem:[#allocation4 + $0x18] sm:$0x1f] %vm662_vm3, %v1740_v8  ;;  %vm1243_vm7 = vcmask 15360  }
   0xf   : > { %s423_s30 = scalar_lea.vmem %s1999_s0, %s1594_s27  ;;  %s428_s15 = scalar_lea.vmem %s2000_s1, %s1594_s27  ;;  %667 = vst.msk [vmem:[#allocation4 + $0x20] sm:$0x1f] %vm662_vm3, %v1740_v8  ;;  %670 = vst.msk [vmem:[#allocation4 + $0x38] sm:$0x1f] %vm662_vm3, %v1740_v8  ;;  %vm1409_vm8 = vcmask 125952  }
  0x10   : > { %v1670_v4 = vld [vmem:[%s423_s30] sm:$0xff]   ;;  %v1672_v6 = vld [vmem:[%s423_s30 + $0x8] sm:$0xff]   ;;  %671 = vst.msk [vmem:[#allocation4 + $0x40] sm:$0x1f] %vm662_vm3, %v1740_v8  ;;  %s1596_s28 = sshll.u32 %s2013_s22, 3 }
  0x11   : > { %v1671_v5 = vld [vmem:[%s428_s15] sm:$0xff]   ;;  %1617 = vmatprep.mubr.msk.bf16.mxu0 %vm457_vm1, %v1670_v4  ;;  %v1673_v7 = vld [vmem:[%s428_s15 + $0x8] sm:$0xff]   ;;  %s433_s13 = scalar_lea.vmem %s2011_s12, %s1596_s28 }
  0x12   : > { %1623 = vmatprep.mubr.msk.bf16.mxu1 %vm457_vm1, %v1671_v5  ;;  %1618 = vmatmul.mubr.msk.bf16.vlgmr.msra.gmra.mrb[0].mxu0 %vm457_vm1, %v1672_v6 }
  0x13   : > { %1624 = vmatmul.mubr.msk.bf16.vlgmr.msra.gmra.mrb[0].mxu1 %vm457_vm1, %v1673_v7  ;;  %1647 = vmatprep.mubr.msk.bf16.mxu0 %vm1742_vm4, %v1740_v8 }
  0x14   : > { %1635 = vmatprep.mubr.msk.f32.mxu1 %vm1742_vm4, %v1740_v8  ;;  %1653 = vmatpush3.bf16.msra.mxu1 %v1652_v13  ;;  %v745_v13 = vld [vmem:[#allocation5] sm:$0xf] }
  0x15   : > { %1654 = vmatprep.subr.bf16.mxu1 %v1741_v12  ;;  %v734_v12 = vld [vmem:[#allocation4] sm:$0xf] }
  0x18   : > { %1656 = vmatpush3.bf16.msra.mxu1 %v1655_v15 }
  0x19   : > { %1638 = vmatprep.subr.mxu1 %v1740_v8 }
  0xe5   : > { %v1619_v17 = vpop.f32.mrb[0].mxu0 }
  0xe6   : > { %v511_v18 = vadd.f32 %v1619_v17, %v1490_v16  ;;  %v1625_v19 = vpop.f32.mrb[0].mxu1  ;;  %v502_v20 = vpop.f32.mrb[1].mxu0 }
  0xe7   : > { %v624_v21 = vadd.f32 %v1625_v19, %v1490_v16  ;;  %v503_v22 = vadd.f32 %v1490_v16, %v502_v20  ;;  %v615_v23 = vpop.f32.mrb[1].mxu1  ;;  %v1620_v24 = vpop.f32.mrb[2].mxu0 }
  0xe8   : > { %v1497_v25 = vmul.f32 -1.442695, %v511_v18  ;;  %v616_v26 = vadd.f32 %v1490_v16, %v615_v23  ;;  %v514_v27 = vadd.f32 %v1620_v24, %v1490_v16  ;;  %v1626_v28 = vpop.f32.mrb[2].mxu1  ;;  %v505_v29 = vpop.f32.mrb[3].mxu0 }
  0xe9   : > { %v1506_v30 = vmul.f32 -1.442695, %v624_v21  ;;  %v1495_v31 = vmul.f32 -1.442695, %v503_v22  ;;  %v627_v32 = vadd.f32 %v1626_v28, %v1490_v16  ;;  %v506_v33 = vadd.f32 %v1490_v16, %v505_v29  ;;  %v618_v34 = vpop.f32.mrb[3].mxu1 }
  0xea   : > { %1676 = vpow2.f32 %v1497_v25  ;;  %v1504_v35 = vmul.f32 -1.442695, %v616_v26  ;;  %v1498_v36 = vmul.f32 -1.442695, %v514_v27  ;;  %v619_v37 = vadd.f32 %v1490_v16, %v618_v34  ;;  %v756_v25 = vld [vmem:[#allocation4 + $0x1] sm:$0xf] }
  0xeb   : > { %1678 = vpow2.f32 %v1506_v30  ;;  %v1507_v38 = vmul.f32 -1.442695, %v627_v32  ;;  %v1496_v39 = vmul.f32 -1.442695, %v506_v33 }
  0xec   : > { %1680 = vpow2.f32 %v1495_v31  ;;  %v1505_v40 = vmul.f32 -1.442695, %v619_v37 }
  0xed   : > { %1682 = vpow2.f32 %v1504_v35 }
  0xee   : > { %1684 = vpow2.f32 %v1498_v36 }
  0xef   : > { %1686 = vpow2.f32 %v1507_v38 }
  0xf0   : > { %1688 = vpow2.f32 %v1496_v39  ;;  %v1514_v39 = vld [vmem:[%s2003_s4 + $0x3] ss:$0 sm:$0xff] }
  0xf1   : > { %1690 = vpow2.f32 %v1505_v40  ;;  %v1516_v40 = vld [vmem:[%s2003_s4 + $0x4] ss:$0 sm:$0xff] }
  0xf4   : > { %v1677_v41 = vpop.eup %1676 }
  0xf5   : > { %v1679_v42 = vpop.eup %1678  ;;  %v531_v43 = vadd.f32 1.0, %v1677_v41 }
  0xf6   : > { %v1681_v44 = vpop.eup %1680  ;;  %v644_v45 = vadd.f32 1.0, %v1679_v42 }
  0xf7   : > { %v1683_v46 = vpop.eup %1682  ;;  %1692 = vrcp.f32 %v531_v43  ;;  %v529_v47 = vadd.f32 1.0, %v1681_v44 }
  0xf8   : > { %v1685_v48 = vpop.eup %1684  ;;  %1694 = vrcp.f32 %v644_v45  ;;  %v642_v49 = vadd.f32 1.0, %v1683_v46 }
  0xf9   : > { %v1687_v50 = vpop.eup %1686  ;;  %1696 = vrcp.f32 %v529_v47  ;;  %v532_v51 = vadd.f32 1.0, %v1685_v48 }
  0xfa   : > { %v1689_v52 = vpop.eup %1688  ;;  %1698 = vrcp.f32 %v642_v49  ;;  %v645_v53 = vadd.f32 1.0, %v1687_v50 }
  0xfb   : > { %v1691_v54 = vpop.eup %1690  ;;  %1700 = vrcp.f32 %v532_v51  ;;  %v530_v55 = vadd.f32 1.0, %v1689_v52  ;;  %v1518_v52 = vld [vmem:[%s2003_s4 + $0x5] ss:$0 sm:$0xff] }
  0xfc   : > { %1702 = vrcp.f32 %v645_v53  ;;  %v643_v56 = vadd.f32 1.0, %v1691_v54 }
  0xfd   : > { %1704 = vrcp.f32 %v530_v55 }
  0xfe   : > { %1706 = vrcp.f32 %v643_v56  ;;  %v1938_v56 = vld [vmem:[%s2003_s4 + $0x6] ss:$0 sm:$0xff] }
 0x101   : > { %v1693_v57 = vpop.eup %1692 }
 0x102   : > { %v1695_v58 = vpop.eup %1694  ;;  %v543_v59 = vmul.f32 %v1693_v57, %v511_v18  ;;  %v1904_v18 = vld [vmem:[%s2003_s4 + $0x2] ss:$0 sm:$0xff] }
 0x103   : > { %v1697_v60 = vpop.eup %1696  ;;  %v656_v61 = vmul.f32 %v1695_v58, %v624_v21  ;;  %v741_v21 = vmul.f32 %v1893_v11, %v734_v12 }
 0x104   : > { %v1699_v62 = vpop.eup %1698  ;;  %548 = vst.msk [vmem:[#allocation2 + $0x10] sm:$0xff] %vm545_vm5, %v543_v59  ;;  %v541_v63 = vmul.f32 %v1697_v60, %v503_v22  ;;  %v752_v22 = vmul.f32 %v1887_v9, %v745_v13 }
 0x105   : > { %v1701_v0 = vpop.eup %1700  ;;  %660 = vst.msk [vmem:[#allocation3 + $0x10] sm:$0xff] %vm545_vm5, %v656_v61  ;;  %v654_v1 = vmul.f32 %v1699_v62, %v616_v26 }
 0x106   : > { %v1703_v2 = vpop.eup %1702  ;;  %546 = vst.msk [vmem:[#allocation2] sm:$0xff] %vm545_vm5, %v541_v63  ;;  %v544_v3 = vmul.f32 %v1701_v0, %v514_v27  ;;  %v1944_v63 = vld [vmem:[%s2003_s4 + $0x7] ss:$0 sm:$0xff] }
 0x107   : > { %v1705_v4 = vpop.eup %1704  ;;  %658 = vst.msk [vmem:[#allocation3] sm:$0xff] %vm545_vm5, %v654_v1  ;;  %v657_v5 = vmul.f32 %v1703_v2, %v627_v32  ;;  %v753_v32 = vadd.f32 %v752_v22, %v741_v21 }
 0x108   : > { %v1707_v6 = vpop.eup %1706  ;;  %549 = vst.msk [vmem:[#allocation2 + $0x18] sm:$0xff] %vm545_vm5, %v544_v3  ;;  %v542_v7 = vmul.f32 %v1705_v4, %v506_v33  ;;  %v763_v33 = vmul.f32 %v1904_v18, %v756_v25 }
 0x109   : > { %661 = vst.msk [vmem:[#allocation3 + $0x18] sm:$0xff] %vm545_vm5, %v657_v5  ;;  %v655_v10 = vmul.f32 %v1707_v6, %v619_v37 }
 0x10a   : > { %547 = vst.msk [vmem:[#allocation2 + $0x8] sm:$0xff] %vm545_vm5, %v542_v7  ;;  %v764_v44 = vadd.f32 %v763_v33, %v753_v32 }
 0x10b   : > { %v711_v14 = vld [vmem:[#allocation2 + $0x10] sm:$0xf]  ;;  %v717_v15 = vld [vmem:[#allocation2 + $0x14] sm:$0xf]  ;;  %659 = vst.msk [vmem:[#allocation3 + $0x8] sm:$0xff] %vm545_vm5, %v655_v10 }
 0x10c   : > { %713 = vst.msk [vmem:[#allocation5 + $0x14] sm:$0xf] %vm673_vm2, %v711_v14  ;;  %719 = vst.msk [vmem:[#allocation5 + $0x18] sm:$0xf] %vm673_vm2, %v717_v15  ;;  %v708_v16 = vld [vmem:[#allocation3 + $0x10] sm:$0xf] }
 0x10d   : > { %v714_v17 = vld [vmem:[#allocation3 + $0x14] sm:$0xf]  ;;  %710 = vst.msk [vmem:[#allocation4 + $0x29] sm:$0xf] %vm673_vm2, %v708_v16  ;;  %v687_v19 = vld [vmem:[#allocation2] sm:$0xf] }
 0x10e   : > { %716 = vst.msk [vmem:[#allocation4 + $0x31] sm:$0xf] %vm673_vm2, %v714_v17  ;;  %v693_v20 = vld [vmem:[#allocation2 + $0x4] sm:$0xf]  ;;  %689 = vst.msk [vmem:[#allocation5 + $0x4] sm:$0xf] %vm673_vm2, %v687_v19 }
 0x10f   : > { %695 = vst.msk [vmem:[#allocation5 + $0x8] sm:$0xf] %vm673_vm2, %v693_v20  ;;  %v684_v23 = vld [vmem:[#allocation3] sm:$0xf]  ;;  %v690_v24 = vld [vmem:[#allocation3 + $0x4] sm:$0xf] }
 0x110   : > { %686 = vst.msk [vmem:[#allocation4 + $0x9] sm:$0xf] %vm673_vm2, %v684_v23  ;;  %692 = vst.msk [vmem:[#allocation4 + $0x11] sm:$0xf] %vm673_vm2, %v690_v24  ;;  %v723_v26 = vld [vmem:[#allocation2 + $0x18] sm:$0xf] }
 0x111   : > { %v729_v27 = vld [vmem:[#allocation2 + $0x1c] sm:$0xf]  ;;  %725 = vst.msk [vmem:[#allocation5 + $0x1c] sm:$0xf] %vm673_vm2, %v723_v26  ;;  %v720_v28 = vld [vmem:[#allocation3 + $0x18] sm:$0xf] }
 0x112   : > { %731 = vst.msk [vmem:[#allocation5 + $0x20] sm:$0xf] %vm673_vm2, %v729_v27  ;;  %v726_v29 = vld [vmem:[#allocation3 + $0x1c] sm:$0xf]  ;;  %722 = vst.msk [vmem:[#allocation4 + $0x39] sm:$0xf] %vm673_vm2, %v720_v28 }
 0x113   : > { %728 = vst.msk [vmem:[#allocation4 + $0x41] sm:$0xf] %vm673_vm2, %v726_v29  ;;  %v699_v30 = vld [vmem:[#allocation2 + $0x8] sm:$0xf]  ;;  %v705_v31 = vld [vmem:[#allocation2 + $0xc] sm:$0xf] }
 0x114   : > { %701 = vst.msk [vmem:[#allocation5 + $0xc] sm:$0xf] %vm673_vm2, %v699_v30  ;;  %707 = vst.msk [vmem:[#allocation5 + $0x10] sm:$0xf] %vm673_vm2, %v705_v31  ;;  %v696_v34 = vld [vmem:[#allocation3 + $0x8] sm:$0xf] }
 0x115   : > { %v702_v35 = vld [vmem:[#allocation3 + $0xc] sm:$0xf]  ;;  %v1055_v36 = vld [vmem:[#allocation5 + $0x18] sm:$0xf]  ;;  %698 = vst.msk [vmem:[#allocation4 + $0x19] sm:$0xf] %vm673_vm2, %v696_v34 }
 0x116   : > { %704 = vst.msk [vmem:[#allocation4 + $0x21] sm:$0xf] %vm673_vm2, %v702_v35  ;;  %v1062_v37 = vmul.f32 %v1887_v9, %v1055_v36  ;;  %v1045_v38 = vld [vmem:[#allocation4 + $0x30] sm:$0xf]  ;;  %v857_v43 = vld [vmem:[#allocation5 + $0x8] sm:$0xf] }
 0x117   : > { %v1052_v41 = vmul.f32 %v1893_v11, %v1045_v38  ;;  %v1065_v42 = vld [vmem:[#allocation4 + $0x31] sm:$0xf]  ;;  %v864_v46 = vmul.f32 %v1887_v9, %v857_v43  ;;  %v767_v47 = vld [vmem:[#allocation4 + $0x8] sm:$0xf]  ;;  %v811_v12 = vld [vmem:[#allocation5 + $0x8] sm:$0xf] }
 0x118   : > { %v778_v45 = vld [vmem:[#allocation5 + $0x4] sm:$0xf]  ;;  %v847_v48 = vld [vmem:[#allocation4 + $0x10] sm:$0xf]  ;;  %v774_v51 = vmul.f32 %v1514_v39, %v767_v47  ;;  %v789_v53 = vld [vmem:[#allocation4 + $0x9] sm:$0xf]  ;;  %v1072_v55 = vmul.f32 %v1904_v18, %v1065_v42  ;;  %v818_v26 = vmul.f32 %v1944_v63, %v811_v12 }
 0x119   : > { %v867_v49 = vld [vmem:[#allocation4 + $0x11] sm:$0xf]  ;;  %v854_v50 = vmul.f32 %v1893_v11, %v847_v48  ;;  %v1063_v54 = vadd.f32 %v1062_v37, %v1052_v41  ;;  %v1075_v58 = vld [vmem:[#allocation4 + $0x38] sm:$0xf]  ;;  %v785_v61 = vmul.f32 %v1516_v40, %v778_v45  ;;  %v796_v5 = vmul.f32 %v1518_v52, %v789_v53  ;;  %v976_v6 = vld [vmem:[#allocation4 + $0x28] sm:$0xf] }
 0x11a   : > { %v874_v57 = vmul.f32 %v1904_v18, %v867_v49  ;;  %v775_v60 = vadd.f32 %v774_v51, %v764_v44  ;;  %v800_v62 = vld [vmem:[#allocation4 + $0x10] sm:$0xf]  ;;  %v1524_v17 = vld [vmem:[%s2003_s4 + $0x8] ss:$0 sm:$0xff]  ;;  %v1082_v25 = vmul.f32 %v1514_v39, %v1075_v58  ;;  %v983_v29 = vmul.f32 %v1514_v39, %v976_v6  ;;  %v1095_v30 = vld [vmem:[#allocation4 + $0x39] sm:$0xf] }
 0x11b   : > { %v956_v59 = vld [vmem:[#allocation5 + $0x10] sm:$0xf]  ;;  %v865_v0 = vadd.f32 %v864_v46, %v854_v50  ;;  %v887_v14 = vld [vmem:[#allocation5 + $0xc] sm:$0xf]  ;;  %v1073_v15 = vadd.f32 %v1072_v55, %v1063_v54  ;;  %v807_v16 = vmul.f32 %v1938_v56, %v800_v62  ;;  %v822_v22 = vld [vmem:[#allocation4 + $0x11] sm:$0xf]  ;;  %v1102_v48 = vmul.f32 %v1518_v52, %v1095_v30 }
 0x11c   : > { %v963_v1 = vmul.f32 %v1887_v9, %v956_v59  ;;  %v877_v2 = vld [vmem:[#allocation4 + $0x18] sm:$0xf]  ;;  %v786_v10 = vadd.f32 %v785_v61, %v775_v60  ;;  %v1085_v9 = vld [vmem:[#allocation5 + $0x1c] sm:$0xf]  ;;  %v894_v28 = vmul.f32 %v1516_v40, %v887_v14  ;;  %v829_v37 = vmul.f32 %v1524_v17, %v822_v22  ;;  %v1105_v42 = vld [vmem:[#allocation4 + $0x40] sm:$0xf] }
 0x11d   : > { %v946_v3 = vld [vmem:[#allocation4 + $0x20] sm:$0xf]  ;;  %v875_v13 = vadd.f32 %v874_v57, %v865_v0  ;;  %v884_v19 = vmul.f32 %v1514_v39, %v877_v2  ;;  %v897_v23 = vld [vmem:[#allocation4 + $0x19] sm:$0xf]  ;;  %v996_v34 = vld [vmem:[#allocation4 + $0x29] sm:$0xf]  ;;  %v1083_v35 = vadd.f32 %v1082_v25, %v1073_v15  ;;  %v1092_v36 = vmul.f32 %v1516_v40, %v1085_v9 }
 0x11e   : > { %v966_v4 = vld [vmem:[#allocation4 + $0x21] sm:$0xf]  ;;  %v953_v7 = vmul.f32 %v1893_v11, %v946_v3  ;;  %v797_v21 = vadd.f32 %v796_v5, %v786_v10  ;;  %v904_v38 = vmul.f32 %v1518_v52, %v897_v23  ;;  %v1006_v46 = vld [vmem:[#allocation4 + $0x30] sm:$0xf]  ;;  %v1525_v39 = vld [vmem:[%s2004_s5] ss:$0 sm:$0xff]  ;;  %v1003_v51 = vmul.f32 %v1518_v52, %v996_v34 }
 0x11f   : > { %v973_v20 = vmul.f32 %v1904_v18, %v966_v4  ;;  %v986_v11 = vld [vmem:[#allocation5 + $0x14] sm:$0xf]  ;;  %v885_v27 = vadd.f32 %v884_v19, %v875_v13  ;;  %v907_v32 = vld [vmem:[#allocation4 + $0x20] sm:$0xf]  ;;  %v1093_v47 = vadd.f32 %v1092_v36, %v1083_v35  ;;  %v1115_v53 = vld [vmem:[#allocation5 + $0x20] sm:$0xf]  ;;  %v1112_v59 = vmul.f32 %v1938_v56, %v1105_v42 }
 0x120   : > { %v964_v24 = vadd.f32 %v963_v1, %v953_v7  ;;  %v808_v31 = vadd.f32 %v807_v16, %v797_v21  ;;  %v993_v41 = vmul.f32 %v1516_v40, %v986_v11  ;;  %v917_v44 = vld [vmem:[#allocation5 + $0x10] sm:$0xf]  ;;  %v914_v50 = vmul.f32 %v1938_v56, %v907_v32  ;;  %v1016_v40 = vld [vmem:[#allocation5 + $0x18] sm:$0xf]  ;;  %v1026_v7 = vld [vmem:[#allocation4 + $0x31] sm:$0xf] }
 0x121   : > { %v895_v18 = vadd.f32 %v894_v28, %v885_v27  ;;  %v927_v55 = vld [vmem:[#allocation4 + $0x21] sm:$0xf]  ;;  %v1103_v58 = vadd.f32 %v1102_v48, %v1093_v47  ;;  %v924_v61 = vmul.f32 %v1944_v63, %v917_v44  ;;  %v1013_v62 = vmul.f32 %v1938_v56, %v1006_v46 }
 0x122   : > { %v974_v33 = vadd.f32 %v973_v20, %v964_v24  ;;  %v819_v43 = vadd.f32 %v818_v26, %v808_v31  ;;  %v1125_v0 = vld [vmem:[#allocation4 + $0x41] sm:$0xf]  ;;  %v1122_v4 = vmul.f32 %v1944_v63, %v1115_v53  ;;  %v934_v5 = vmul.f32 %v1524_v17, %v927_v55  ;;  %v1160_v53 = vld [vmem:[%s2006_s7] sm:$0x1] }
 0x123   : > { %v905_v49 = vadd.f32 %v904_v38, %v895_v18  ;;  %v1113_v3 = vadd.f32 %v1112_v59, %v1103_v58  ;;  %v1023_v6 = vmul.f32 %v1944_v63, %v1016_v40  ;;  %v1132_v14 = vmul.f32 %v1524_v17, %v1125_v0  ;;  %v1675_v0 = vld [vmem:[%s2009_s10 + $0x8] sm:$0xff]  }
 0x124   : > { %v984_v45 = vadd.f32 %v983_v29, %v974_v33  ;;  %v830_v54 = vadd.f32 %v829_v37, %v819_v43  ;;  %v1033_v19 = vmul.f32 %v1524_v17, %v1026_v7  ;;  %v1327_v7 = vlaneseq }
 0x125   : > { %v915_v60 = vadd.f32 %v914_v50, %v905_v49  ;;  %v1123_v13 = vadd.f32 %v1122_v4, %v1113_v3 }
 0x126   : > { %v994_v57 = vadd.f32 %v993_v41, %v984_v45  ;;  %v837_v1 = vadd.f32 %v1525_v39, %v830_v54 }
 0x127   : > { %v925_v52 = vadd.f32 %v924_v61, %v915_v60  ;;  %v1133_v56 = vadd.f32 %v1132_v14, %v1123_v13 }
 0x128   : > { %v1004_v2 = vadd.f32 %v1003_v51, %v994_v57  ;;  %v1526_v10 = vmul.f32 -1.442695, %v837_v1  ;;  %v1241_v51 = vld [vmem:[%s2007_s8] sm:$0x3] }
 0x129   : > { %v935_v15 = vadd.f32 %v934_v5, %v925_v52  ;;  %v1134_v21 = vadd.f32 %v1525_v39, %v1133_v56 }
 0x12a   : > { %v1014_v12 = vadd.f32 %v1013_v62, %v1004_v2  ;;  %1708 = vpow2.f32 %v1526_v10  ;;  %v1674_v62 = vld [vmem:[%s2009_s10] sm:$0xff]   ;;  %v1328_v10 = vshrl.u32 %v1327_v7, 7 }
 0x12b   : > { %v936_v9 = vadd.f32 %v1525_v39, %v935_v15  ;;  %v1580_v24 = vmul.f32 -1.442695, %v1134_v21  ;;  %1644 = vmatpush3.bf16.msra.mxu0 %v1674_v62 }
 0x12c   : > { %v1024_v16 = vadd.f32 %v1023_v6, %v1014_v12  ;;  %1645 = vmatprep.subr.bf16.mxu0 %v1740_v8  ;;  %v1329_v12 = vsub.s32 0, %v1328_v10 }
 0x12d   : > { %v1544_v22 = vmul.f32 -1.442695, %v936_v9 }
 0x12e   : > { %v1034_v20 = vadd.f32 %v1033_v19, %v1024_v16  ;;  %v1586_v19 = vld [vmem:[%s2010_s11] ss:$0 sm:$0xff] }
 0x12f   : > { %1710 = vpow2.f32 %v1544_v22  ;;  %1646 = vmatpush3.bf16.msra.mxu0 %v1675_v0 }
 0x130   : > { %v1035_v23 = vadd.f32 %v1525_v39, %v1034_v20  ;;  %1712 = vpow2.f32 %v1580_v24 }
 0x132   : > { %v1562_v11 = vmul.f32 -1.442695, %v1035_v23 }
 0x134   : > { %1714 = vpow2.f32 %v1562_v11  ;;  %v1709_v63 = vpop.eup %1708 }
 0x135   : > { %v841_v25 = vadd.f32 1.0, %v1709_v63 }
 0x137   : > { %1716 = vrcp.f32 %v841_v25 }
 0x139   : > { %v1711_v26 = vpop.eup %1710 }
 0x13a   : > { %v1713_v27 = vpop.eup %1712  ;;  %v940_v28 = vadd.f32 1.0, %v1711_v26 }
 0x13b   : > { %v1138_v29 = vadd.f32 1.0, %v1713_v27 }
 0x13c   : > { %1718 = vrcp.f32 %v940_v28 }
 0x13d   : > { %1720 = vrcp.f32 %v1138_v29 }
 0x13e   : > { %v1715_v30 = vpop.eup %1714 }
 0x13f   : > { %v1039_v17 = vadd.f32 1.0, %v1715_v30 }
 0x141   : > { %1722 = vrcp.f32 %v1039_v17  ;;  %v1717_v31 = vpop.eup %1716 }
 0x142   : > { %v844_v32 = vmul.f32 %v1717_v31, %v837_v1  ;;  %v1242_v1 = vld [vmem:[%s2008_s9] sm:$0x1] }
 0x144   : > { %845 = vst.msk [vmem:[#allocation6] sm:$0xf] %vm673_vm2, %v844_v32 }
 0x146   : > { %v1719_v33 = vpop.eup %1718 }
 0x147   : > { %v1721_v34 = vpop.eup %1720  ;;  %v943_v35 = vmul.f32 %v1719_v33, %v936_v9 }
 0x148   : > { %v1141_v36 = vmul.f32 %v1721_v34, %v1134_v21 }
 0x149   : > { %944 = vst.msk [vmem:[#allocation6 + $0x4] sm:$0xf] %vm673_vm2, %v943_v35 }
 0x14a   : > { %1142 = vst.msk [vmem:[#allocation6 + $0xc] sm:$0xf] %vm673_vm2, %v1141_v36 }
 0x14b   : > { %v1723_v37 = vpop.eup %1722 }
 0x14c   : > { %v1042_v18 = vmul.f32 %v1723_v37, %v1035_v23 }
 0x14e   : > { %1043 = vst.msk [vmem:[#allocation6 + $0x8] sm:$0xf] %vm673_vm2, %v1042_v18 }
 0x150   : > { %v1143_v38 = vld [vmem:[#allocation6] sm:$0xff] }
 0x151   : > { %v1145_v42 = vsel %vm545_vm5, %v1143_v38, 0.0 }
 0x155   : > { %v1144_v41 = vld [vmem:[#allocation6 + $0x8] sm:$0xff] }
 0x156   : > { %v1146_v43 = vsel %vm545_vm5, %v1144_v41, 0.0 }
 0x157   : > { %v1147_v44 = vadd.f32 %v1146_v43, %v1145_v42 }
 0x159   : > { %v1148_v45 = vrot.slane %v1147_v44, 4 }
 0x15b   : > { %v1149_v46 = vadd.f32 %v1148_v45, %v1147_v44 }
 0x15d   : > { %v1150_v47 = vrot.slane %v1149_v46, 2 }
 0x15f   : > { %v1151_v48 = vadd.f32 %v1150_v47, %v1149_v46 }
 0x161   : > { %v1152_v39 = vrot.slane %v1151_v48, 1 }
 0x163   : > { %v1153_v49 = vadd.f32 %v1152_v39, %v1151_v48 }
 0x165   : > { %v1155_v50 = vmul.f32 0.0625, %v1153_v49 }
 0x167   : > { %1636 = vmatmul.mubr.msk.f32.vlgmr.msra.gmra.mrb[4].mxu1 %vm545_vm5, %v1155_v50 }
 0x168   : > { %1640 = vmatprep.mubr.msk.f32.mxu1 %vm1742_vm4, %v1740_v8  ;;  %1639 = vmatpush3.msk.msra.mxu1 %vm1247_vm6, %v1241_v51 }
 0x23a   : > { %v1230_v54 = vpop.f32.mrb[4].mxu1 }
 0x23b   : > { %v1231_v55 = vadd.f32 %v1230_v54, %v1160_v53  ;;  %v1637_v57 = vpop.f32.mrb[5].mxu1 }
 0x23d   : > { %v1582_v40 = vmul.f32 -1.442695, %v1231_v55 }
 0x23f   : > { %1724 = vpow2.f32 %v1582_v40 }
 0x249   : > { %v1725_v58 = vpop.eup %1724 }
 0x24a   : > { %v1237_v59 = vadd.f32 1.0, %v1725_v58 }
 0x24c   : > { %1726 = vrcp.f32 %v1237_v59 }
 0x256   : > { %v1727_v60 = vpop.eup %1726 }
 0x257   : > { %v1240_v61 = vmul.f32 %v1727_v60, %v1231_v55 }
 0x259   : > { %1641 = vmatmul.mubr.msk.f32.vlgmr.msra.gmra.mrb[6].mxu1 %vm1243_vm7, %v1240_v61 }
 0x32c   : > { %v1317_v2 = vpop.f32.mrb[6].mxu1 }
 0x32d   : > { %v1318_v3 = vadd.f32 %v1317_v2, %v1242_v1  ;;  %v1642_v4 = vpop.f32.mrb[7].mxu1 }
 0x32f   : > { %v1585_v52 = vmul.f32 -1.442695, %v1318_v3 }
 0x331   : > { %1728 = vpow2.f32 %v1585_v52 }
 0x33b   : > { %v1729_v5 = vpop.eup %1728 }
 0x33c   : > { %v1324_v6 = vadd.f32 1.0, %v1729_v5 }
 0x33e   : > { %1730 = vrcp.f32 %v1324_v6 }
 0x348   : > { %v1731_v13 = vpop.eup %1730 }
 0x349   : > { %v1330_v14 = vrot.slane %v1731_v13, %v1329_v12 }
 0x34b   : > { %v1331_v8 = vmul.f32 %v1330_v14, %v1143_v38  ;;  %v1332_v15 = vmul.f32 %v1330_v14, %v1144_v41 }
 0x34d   : > { %v1333_v16 = vpack.c.bf16 %v1332_v15, %v1331_v8 }
 0x34f   : > { %1648 = vmatmul.mubr.msk.bf16.vlgmr.msra.gmra.mrb[4].mxu0 %vm545_vm5, %v1333_v16 }
 0x422   : > { %v1394_v56 = vpop.f32.mrb[4].mxu0 }
 0x423   : > { %v1395_v9 = vadd.f32 %v1586_v19, %v1394_v56  ;;  %v1649_v20 = vpop.f32.mrb[5].mxu0 }
 0x424   : > { %v1397_v21 = vpop.f32.mrb[6].mxu0 }
 0x425   : > { %v1597_v22 = vpack.c.bf16 %v1395_v9, %v1395_v9  ;;  %v1398_v23 = vadd.f32 %v1586_v19, %v1397_v21  ;;  %v1650_v24 = vpop.f32.mrb[7].mxu0 }
 0x427   : > { %1410 = vst.msk [vmem:[%s433_s13] sm:$0xf] %vm1409_vm8, %v1597_v22  ;;  %v1598_v11 = vpack.c.bf16 %v1398_v23, %v1398_v23 }
 0x429   : > { %1411 = vst.msk [vmem:[%s433_s13 + $0x4] sm:$0xf] %vm1409_vm8, %v1598_v11 }
 0x42a PF: > { %s22_s21 = sadd.s32 1, %s1738_s21  }
 0x42b   : > { %p19_p4 = scmp.ge.s32.totalorder %s22_s21, 4  }
 0x42d   :  { %21 = sbr.rel (!%p19_p4) target bundleno = 1 (0x1), region = 125 }

// kernel: efficientnet_forward.5
= control target key start
LH: loop header
LB: loop body
LE: loop exit
PB: predicated region body
PF: predicated region fallthrough
CT: control target
= control target key end

     0   :  { %s1985_s30 = smov 0   ;;  %s2318_s0 = inlined_call_operand.vmem [shape: bf16[2,64,8], index: 0, kind: input, shape index: {}]   ;;  %s2319_s1 = inlined_call_operand.vmem [shape: f32[9,1,8], index: 1, kind: input, shape index: {}]   ;;  %s2320_s2 = inlined_call_operand.vmem [shape: f32[1,8], index: 2, kind: input, shape index: {}, may-alias: {2,6,8}]   ;;  %s2321_s3 = inlined_call_operand.vmem [shape: f32[8,2], index: 3, kind: input, shape index: {}]   ;;  %s2322_s4 = inlined_call_operand.vmem [shape: f32[1,2], index: 4, kind: input, shape index: {}]   ;;  %s2323_s5 = inlined_call_operand.vmem [shape: f32[2,8], index: 5, kind: input, shape index: {}]   ;;  %s2324_s6 = inlined_call_operand.vmem [shape: f32[1,8], index: 6, kind: input, shape index: {}, may-alias: {2,6,8}]   ;;  %s2325_s7 = inlined_call_operand.vmem [shape: bf16[8,8], index: 7, kind: input, shape index: {}]   ;;  %s2326_s8 = inlined_call_operand.vmem [shape: f32[1,8], index: 8, kind: input, shape index: {}, may-alias: {2,6,8}]   ;;  %s2327_s9 = inlined_call_operand.vmem [shape: bf16[2,64,8], index: 9, kind: output, shape index: {}]  }
   0x1 LB: > { %s1620_s10 = sadd.s32 4294967295, %s1931_s30   ;;  %p1624_p0 = scmp.ge.s32.totalorder %s1931_s30, 1  ;;  %s1931_s30 = sphi %s1985_s30, %s19_s30  }
   0x2   : > { %p287_p1 = scmp.lt.s32.totalorder %s1931_s30, 3 }
   0x4   : > { %p288_p2 = pnand %p1624_p0, %p287_p1 }
   0x5   : > { %v1227_v0 = vld [vmem:[%s2321_s3] sm:$0xff] (!%p288_p2)  ;;  %p1998_p3 = scmp.lt.s32.totalorder (!%p288_p2), %s1620_s10, 1  ;;  %vm334_vm0 = vcmask (!%p288_p2), 64512   ;;  %vm336_vm1 = vcmask (!%p288_p2), 58368   ;;  %v1933_v1 = vmov (!%p288_p2), 0.0   ;;  %vm1934_vm2 = vmmov (!%p288_p2), 0  }
   0x6   : > { %291 = sbr.rel (%p288_p2) target bundleno = 840 (0x348), region = 56  ;;  %1851 = vmatprep.subr.mxu0 (!%p288_p2), %v1933_v1  ;;  %1853 = vmatprep.mubr.msk.f32.mxu0 (!%p288_p2), %vm1934_vm2, %v1933_v1  ;;  %335 = vst.msk [vmem:[#allocation2] sm:$0xff] (!%p288_p2), %vm334_vm0, %v1933_v1  ;;  %338 = vst.msk [vmem:[#allocation2 + $0x10] sm:$0xff] (!%p288_p2), %vm334_vm0, %v1933_v1  ;;  %v2039_v2 = vld [vmem:[%s2319_s1] ss:$0 sm:$0xff] (!%p288_p2)  ;;  %vm1315_vm3 = vcmask (!%p288_p2), 1041408  }
   0x7   : > { %337 = vst.msk [vmem:[#allocation2 + $0x8] sm:$0x3] (!%p288_p2), %vm336_vm1, %v1933_v1  ;;  %339 = vst.msk [vmem:[#allocation2 + $0x18] sm:$0x3] (!%p288_p2), %vm336_vm1, %v1933_v1  ;;  %1852 = vmatpush3.msra.mxu0 (!%p288_p2), %v1227_v0  ;;  %1856 = vmatprep.subr.mxu1 (!%p288_p2), %v1933_v1  ;;  %v2044_v3 = vld [vmem:[%s2319_s1 + $0x1] ss:$0 sm:$0xff] (!%p288_p2) }
   0x8   : > { %340 = vst.msk [vmem:[#allocation2 + $0x20] sm:$0xff] (!%p288_p2), %vm334_vm0, %v1933_v1  ;;  %342 = vst.msk [vmem:[#allocation2 + $0x30] sm:$0xff] (!%p288_p2), %vm334_vm0, %v1933_v1  ;;  %1858 = vmatprep.mubr.msk.f32.mxu1 (!%p288_p2), %vm1934_vm2, %v1933_v1  ;;  %v2061_v12 = vld [vmem:[%s2319_s1 + $0x2] ss:$0 sm:$0xff] (!%p288_p2)  ;;  %v2097_v24 = vld [vmem:[%s2319_s1 + $0x3] ss:$0 sm:$0xff] (!%p288_p2) }
   0x9   : > { %341 = vst.msk [vmem:[#allocation2 + $0x28] sm:$0x3] (!%p288_p2), %vm336_vm1, %v1933_v1  ;;  %343 = vst.msk [vmem:[#allocation2 + $0x38] sm:$0x3] (!%p288_p2), %vm336_vm1, %v1933_v1  ;;  %v2102_v25 = vld [vmem:[%s2319_s1 + $0x4] ss:$0 sm:$0xff] (!%p288_p2) }
   0xa   : > { %344 = vst.msk [vmem:[#allocation2 + $0x40] sm:$0xff] (!%p288_p2), %vm334_vm0, %v1933_v1  ;;  %346 = vst.msk [vmem:[#allocation2 + $0x50] sm:$0xff] (!%p288_p2), %vm334_vm0, %v1933_v1  ;;  %v2107_v27 = vld [vmem:[%s2319_s1 + $0x5] ss:$0 sm:$0xff] (!%p288_p2)  ;;  %v2112_v28 = vld [vmem:[%s2319_s1 + $0x6] ss:$0 sm:$0xff] (!%p288_p2) }
   0xb   : > { %345 = vst.msk [vmem:[#allocation2 + $0x48] sm:$0x3] (!%p288_p2), %vm336_vm1, %v1933_v1  ;;  %347 = vst.msk [vmem:[#allocation2 + $0x58] sm:$0x3] (!%p288_p2), %vm336_vm1, %v1933_v1  ;;  %v2117_v29 = vld [vmem:[%s2319_s1 + $0x7] ss:$0 sm:$0xff] (!%p288_p2) }
   0xc   : > { %348 = vst.msk [vmem:[#allocation2 + $0x60] sm:$0xff] (!%p288_p2), %vm334_vm0, %v1933_v1  ;;  %350 = vst.msk [vmem:[#allocation2 + $0x70] sm:$0xff] (!%p288_p2), %vm334_vm0, %v1933_v1  ;;  %v2124_v35 = vld [vmem:[%s2319_s1 + $0x8] ss:$0 sm:$0xff] (!%p288_p2)  ;;  %vm1311_vm4 = vcmask (!%p288_p2), 15360   ;;  %vm1431_vm5 = vcmask (!%p288_p2), 1043456  }
   0xd   : > { %349 = vst.msk [vmem:[#allocation2 + $0x68] sm:$0x3] %vm336_vm1, %v1933_v1  ;;  %351 = vst.msk [vmem:[#allocation2 + $0x78] sm:$0x3] %vm336_vm1, %v1933_v1  ;;  %s2330_s10 = smov (!%p1998_p3, %s1620_s10), 1  ;;  %v390_v17 = vld [vmem:[#allocation2] sm:$0xff] }
   0xe   : > { %352 = vst.msk [vmem:[#allocation2 + $0x80] sm:$0xff] %vm334_vm0, %v1933_v1  ;;  %354 = vst.msk [vmem:[#allocation2 + $0x90] sm:$0xff] %vm334_vm0, %v1933_v1  ;;  %s1794_s14 = sshll.u32 %s2330_s10, 5  ;;  %v401_v18 = vld [vmem:[#allocation2 + $0x1] sm:$0xff]  ;;  %v397_v20 = vmul.f32 %v2039_v2, %v390_v17  ;;  %vm1556_vm6 = vcmask 60416  }
   0xf   : > { %353 = vst.msk [vmem:[#allocation2 + $0x88] sm:$0x3] %vm336_vm1, %v1933_v1  ;;  %355 = vst.msk [vmem:[#allocation2 + $0x98] sm:$0x3] %vm336_vm1, %v1933_v1  ;;  %s327_s17 = scalar_lea.vmem %s2318_s0, %s1794_s14  ;;  %v412_v19 = vld [vmem:[#allocation2 + $0x2] sm:$0xff]  ;;  %v408_v21 = vmul.f32 %v2044_v3, %v401_v18  ;;  %s332_s13 = scalar_lea.vmem %s2327_s9, %s1794_s14 }
  0x10   : > { %v2046_v4 = vld [vmem:[%s327_s17] sm:$0xff]   ;;  %v2048_v5 = vld [vmem:[%s327_s17 + $0x8] sm:$0xff]   ;;  %v2050_v6 = vld [vmem:[%s327_s17 + $0x10] sm:$0xff]   ;;  %v419_v23 = vmul.f32 %v2061_v12, %v412_v19 }
  0x11   : > { %v1806_v7 = vunpack.c.l.bf16 %v2046_v4  ;;  %v1807_v8 = vunpack.c.h.bf16 %v2046_v4  ;;  %v1810_v9 = vunpack.c.l.bf16 %v2048_v5  ;;  %v1811_v10 = vunpack.c.h.bf16 %v2048_v5  ;;  %v2056_v11 = vld [vmem:[%s327_s17 + $0x18] sm:$0xff]  }
  0x12   : > { %v1814_v13 = vunpack.c.l.bf16 %v2050_v6  ;;  %v1815_v14 = vunpack.c.h.bf16 %v2050_v6  ;;  %v1818_v15 = vunpack.c.l.bf16 %v2056_v11  ;;  %v1819_v16 = vunpack.c.h.bf16 %v2056_v11 }
  0x13   : > { %359 = vst.msk [vmem:[#allocation2 + $0x11] sm:$0xff] %vm334_vm0, %v1806_v7  ;;  %363 = vst.msk [vmem:[#allocation2 + $0x21] sm:$0xff] %vm334_vm0, %v1807_v8  ;;  %v409_v22 = vadd.f32 %v408_v21, %v397_v20 }
  0x14   : > { %367 = vst.msk [vmem:[#allocation2 + $0x31] sm:$0xff] %vm334_vm0, %v1810_v9  ;;  %371 = vst.msk [vmem:[#allocation2 + $0x41] sm:$0xff] %vm334_vm0, %v1811_v10 }
  0x15   : > { %375 = vst.msk [vmem:[#allocation2 + $0x51] sm:$0xff] %vm334_vm0, %v1814_v13  ;;  %379 = vst.msk [vmem:[#allocation2 + $0x61] sm:$0xff] %vm334_vm0, %v1815_v14  ;;  %v420_v26 = vadd.f32 %v419_v23, %v409_v22 }
  0x16   : > { %383 = vst.msk [vmem:[#allocation2 + $0x71] sm:$0xff] %vm334_vm0, %v1818_v15  ;;  %387 = vst.msk [vmem:[#allocation2 + $0x81] sm:$0xff] %vm334_vm0, %v1819_v16 }
  0x1a   : > { %v423_v30 = vld [vmem:[#allocation2 + $0x10] sm:$0xff]  ;;  %v456_v38 = vld [vmem:[#allocation2 + $0x20] sm:$0xff] }
  0x1b   : > { %v434_v31 = vld [vmem:[#allocation2 + $0x11] sm:$0xff]  ;;  %v430_v33 = vmul.f32 %v2097_v24, %v423_v30  ;;  %v510_v36 = vmul.f32 %v2039_v2, %v423_v30  ;;  %v467_v39 = vld [vmem:[#allocation2 + $0x21] sm:$0xff]  ;;  %v463_v42 = vmul.f32 %v2112_v28, %v456_v38  ;;  %v540_v48 = vmul.f32 %v2097_v24, %v456_v38 }
  0x1c   : > { %v445_v32 = vld [vmem:[#allocation2 + $0x12] sm:$0xff]  ;;  %v441_v34 = vmul.f32 %v2102_v25, %v434_v31  ;;  %v520_v40 = vmul.f32 %v2044_v3, %v434_v31  ;;  %v474_v43 = vmul.f32 %v2117_v29, %v467_v39  ;;  %v478_v44 = vld [vmem:[#allocation2 + $0x22] sm:$0xff]  ;;  %v550_v49 = vmul.f32 %v2102_v25, %v467_v39 }
  0x1d   : > { %v452_v37 = vmul.f32 %v2107_v27, %v445_v32  ;;  %v431_v41 = vadd.f32 %v430_v33, %v420_v26  ;;  %v530_v45 = vmul.f32 %v2061_v12, %v445_v32  ;;  %v485_v46 = vmul.f32 %v2124_v35, %v478_v44  ;;  %v563_v52 = vld [vmem:[#allocation2 + $0x30] sm:$0xff]  ;;  %v662_v22 = vld [vmem:[#allocation2 + $0x40] sm:$0xff] }
  0x1e   : > { %v521_v47 = vadd.f32 %v520_v40, %v510_v36  ;;  %v560_v51 = vmul.f32 %v2107_v27, %v478_v44  ;;  %v573_v53 = vld [vmem:[#allocation2 + $0x31] sm:$0xff]  ;;  %v609_v54 = vmul.f32 %v2039_v2, %v456_v38  ;;  %v619_v55 = vmul.f32 %v2044_v3, %v467_v39  ;;  %v672_v23 = vld [vmem:[#allocation2 + $0x41] sm:$0xff] }
  0x1f   : > { %v442_v50 = vadd.f32 %v441_v34, %v431_v41  ;;  %v570_v57 = vmul.f32 %v2112_v28, %v563_v52  ;;  %v580_v58 = vmul.f32 %v2117_v29, %v573_v53  ;;  %v583_v59 = vld [vmem:[#allocation2 + $0x32] sm:$0xff]  ;;  %v629_v60 = vmul.f32 %v2061_v12, %v478_v44  ;;  %v682_v26 = vld [vmem:[#allocation2 + $0x42] sm:$0xff]  ;;  %v2155_v41 = vld [vmem:[%s2320_s2] ss:$0 sm:$0xff] }
  0x20   : > { %v531_v56 = vadd.f32 %v530_v45, %v521_v47  ;;  %v590_v62 = vmul.f32 %v2124_v35, %v583_v59  ;;  %v620_v63 = vadd.f32 %v619_v55, %v609_v54  ;;  %v639_v0 = vmul.f32 %v2097_v24, %v563_v52 }
  0x21   : > { %v453_v61 = vadd.f32 %v452_v37, %v442_v50  ;;  %v649_v17 = vmul.f32 %v2102_v25, %v573_v53  ;;  %v659_v18 = vmul.f32 %v2107_v27, %v583_v59  ;;  %v708_v19 = vmul.f32 %v2039_v2, %v563_v52 }
  0x22   : > { %v541_v1 = vadd.f32 %v540_v48, %v531_v56  ;;  %v630_v21 = vadd.f32 %v629_v60, %v620_v63  ;;  %v718_v30 = vmul.f32 %v2044_v3, %v573_v53  ;;  %v728_v31 = vmul.f32 %v2061_v12, %v583_v59  ;;  %v781_v63 = vld [vmem:[#allocation2 + $0x52] sm:$0xff] }
  0x23   : > { %v464_v20 = vadd.f32 %v463_v42, %v453_v61  ;;  %v669_v33 = vmul.f32 %v2112_v28, %v662_v22  ;;  %v679_v34 = vmul.f32 %v2117_v29, %v672_v23  ;;  %v689_v36 = vmul.f32 %v2124_v35, %v682_v26  ;;  %v771_v61 = vld [vmem:[#allocation2 + $0x51] sm:$0xff] }
  0x24   : > { %v551_v32 = vadd.f32 %v550_v49, %v541_v1  ;;  %v640_v38 = vadd.f32 %v639_v0, %v630_v21  ;;  %v719_v39 = vadd.f32 %v718_v30, %v708_v19  ;;  %v738_v40 = vmul.f32 %v2097_v24, %v662_v22 }
  0x25   : > { %v475_v37 = vadd.f32 %v474_v43, %v464_v20  ;;  %v748_v44 = vmul.f32 %v2102_v25, %v672_v23  ;;  %v758_v45 = vmul.f32 %v2107_v27, %v682_v26  ;;  %v807_v47 = vmul.f32 %v2039_v2, %v662_v22  ;;  %v761_v43 = vld [vmem:[#allocation2 + $0x50] sm:$0xff] }
  0x26   : > { %v561_v42 = vadd.f32 %v560_v51, %v551_v32  ;;  %v650_v49 = vadd.f32 %v649_v17, %v640_v38  ;;  %v729_v50 = vadd.f32 %v728_v31, %v719_v39  ;;  %v817_v52 = vmul.f32 %v2044_v3, %v672_v23 }
  0x27   : > { %v486_v48 = vadd.f32 %v485_v46, %v475_v37  ;;  %v768_v54 = vmul.f32 %v2112_v28, %v761_v43  ;;  %v827_v55 = vmul.f32 %v2061_v12, %v682_v26  ;;  %v837_v56 = vmul.f32 %v2097_v24, %v761_v43  ;;  %v860_v37 = vld [vmem:[#allocation2 + $0x60] sm:$0xff] }
  0x28   : > { %v571_v53 = vadd.f32 %v570_v57, %v561_v42  ;;  %v660_v59 = vadd.f32 %v659_v18, %v650_v49  ;;  %v739_v60 = vadd.f32 %v738_v40, %v729_v50  ;;  %v818_v46 = vadd.f32 %v817_v52, %v807_v47 }
  0x29   : > { %v2165_v51 = vadd.f32 %v2155_v41, %v486_v48  ;;  %v778_v1 = vmul.f32 %v2117_v29, %v771_v61  ;;  %v788_v17 = vmul.f32 %v2124_v35, %v781_v63  ;;  %v847_v57 = vmul.f32 %v2102_v25, %v771_v61  ;;  %v870_v48 = vld [vmem:[#allocation2 + $0x61] sm:$0xff] }
  0x2a   : > { %v581_v0 = vadd.f32 %v580_v58, %v571_v53  ;;  %v670_v20 = vadd.f32 %v669_v33, %v660_v59  ;;  %v749_v21 = vadd.f32 %v748_v44, %v739_v60  ;;  %v828_v22 = vadd.f32 %v827_v55, %v818_v46  ;;  %v959_v46 = vld [vmem:[#allocation2 + $0x70] sm:$0xff] }
  0x2b   : > { %v1647_v19 = vmul.f32 -1.442695, %v2165_v51  ;;  %v857_v26 = vmul.f32 %v2107_v27, %v781_v63  ;;  %v906_v18 = vmul.f32 %v2039_v2, %v761_v43  ;;  %v916_v30 = vmul.f32 %v2044_v3, %v771_v61 }
  0x2c   : > { %v591_v23 = vadd.f32 %v590_v62, %v581_v0  ;;  %v680_v58 = vadd.f32 %v679_v34, %v670_v20  ;;  %v759_v31 = vadd.f32 %v758_v45, %v749_v21  ;;  %v838_v32 = vadd.f32 %v837_v56, %v828_v22  ;;  %v880_v45 = vld [vmem:[#allocation2 + $0x62] sm:$0xff] }
  0x2d   : > { %1885 = vpow2.f32 %v1647_v19  ;;  %v917_v39 = vadd.f32 %v916_v30, %v906_v18  ;;  %v926_v33 = vmul.f32 %v2061_v12, %v781_v63  ;;  %v936_v40 = vmul.f32 %v2097_v24, %v860_v37 }
  0x2e   : > { %v2175_v38 = vadd.f32 %v2155_v41, %v591_v23  ;;  %v690_v62 = vadd.f32 %v689_v36, %v680_v58  ;;  %v769_v42 = vadd.f32 %v768_v54, %v759_v31  ;;  %v848_v44 = vadd.f32 %v847_v57, %v838_v32  ;;  %v969_v23 = vld [vmem:[#allocation2 + $0x71] sm:$0xff] }
  0x2f   : > { %v867_v47 = vmul.f32 %v2112_v28, %v860_v37  ;;  %v877_v34 = vmul.f32 %v2117_v29, %v870_v48  ;;  %v927_v50 = vadd.f32 %v926_v33, %v917_v39  ;;  %v946_v43 = vmul.f32 %v2102_v25, %v870_v48 }
  0x30   : > { %v1665_v49 = vmul.f32 -1.442695, %v2175_v38  ;;  %v2184_v52 = vadd.f32 %v2155_v41, %v690_v62  ;;  %v779_v53 = vadd.f32 %v778_v1, %v769_v42  ;;  %v858_v55 = vadd.f32 %v857_v26, %v848_v44  ;;  %v979_v26 = vld [vmem:[#allocation2 + $0x72] sm:$0xff]  ;;  %v1058_v62 = vld [vmem:[#allocation2 + $0x80] sm:$0xff] }
  0x31   : > { %v887_v36 = vmul.f32 %v2124_v35, %v880_v45  ;;  %v937_v54 = vadd.f32 %v936_v40, %v927_v50  ;;  %v956_v56 = vmul.f32 %v2107_v27, %v880_v45  ;;  %v1005_v59 = vmul.f32 %v2039_v2, %v860_v37 }
  0x32   : > { %1887 = vpow2.f32 %v1665_v49  ;;  %v1683_v60 = vmul.f32 -1.442695, %v2184_v52  ;;  %v789_v61 = vadd.f32 %v788_v17, %v779_v53  ;;  %v868_v63 = vadd.f32 %v867_v47, %v858_v55 }
  0x33   : > { %v1015_v0 = vmul.f32 %v2044_v3, %v870_v48  ;;  %v947_v57 = vadd.f32 %v946_v43, %v937_v54  ;;  %v966_v19 = vmul.f32 %v2112_v28, %v959_v46  ;;  %v1025_v1 = vmul.f32 %v2061_v12, %v880_v45  ;;  %v1068_v45 = vld [vmem:[#allocation2 + $0x81] sm:$0xff] }
  0x34   : > { %v1035_v20 = vmul.f32 %v2097_v24, %v959_v46  ;;  %1889 = vpow2.f32 %v1683_v60  ;;  %v2195_v21 = vadd.f32 %v2155_v41, %v789_v61  ;;  %v878_v22 = vadd.f32 %v877_v34, %v868_v63 }
  0x35   : > { %v1016_v18 = vadd.f32 %v1015_v0, %v1005_v59  ;;  %v957_v17 = vadd.f32 %v956_v56, %v947_v57  ;;  %v976_v30 = vmul.f32 %v2117_v29, %v969_v23  ;;  %v986_v58 = vmul.f32 %v2124_v35, %v979_v26  ;;  %v1078_v56 = vld [vmem:[#allocation2 + $0x82] sm:$0xff]  ;;  %v1158_v0 = vld [vmem:[#allocation2 + $0x90] sm:$0xff] }
  0x36   : > { %v1045_v31 = vmul.f32 %v2102_v25, %v969_v23  ;;  %v1701_v37 = vmul.f32 -1.442695, %v2195_v21  ;;  %v888_v39 = vadd.f32 %v887_v36, %v878_v22  ;;  %v1055_v40 = vmul.f32 %v2107_v27, %v979_v26 }
  0x37   : > { %v1886_v32 = vpop.eup %1885  ;;  %v1026_v33 = vadd.f32 %v1025_v1, %v1016_v18  ;;  %v967_v44 = vadd.f32 %v966_v19, %v957_v17  ;;  %v1104_v47 = vmul.f32 %v2039_v2, %v959_v46  ;;  %v1114_v48 = vmul.f32 %v2044_v3, %v969_v23  ;;  %v1168_v23 = vld [vmem:[#allocation2 + $0x91] sm:$0xff] }
  0x38   : > { %v497_v42 = vadd.f32 1.0, %v1886_v32  ;;  %1891 = vpow2.f32 %v1701_v37  ;;  %v2205_v49 = vadd.f32 %v2155_v41, %v888_v39  ;;  %v1124_v50 = vmul.f32 %v2061_v12, %v979_v26 }
  0x39   : > { %v1036_v34 = vadd.f32 %v1035_v20, %v1026_v33  ;;  %v977_v43 = vadd.f32 %v976_v30, %v967_v44  ;;  %v1115_v53 = vadd.f32 %v1114_v48, %v1104_v47  ;;  %v1134_v55 = vmul.f32 %v2097_v24, %v1058_v62 }
  0x3a   : > { %1893 = vrcp.f32 %v497_v42  ;;  %v1719_v36 = vmul.f32 -1.442695, %v2205_v49  ;;  %v1065_v2 = vmul.f32 %v2112_v28, %v1058_v62  ;;  %v1144_v61 = vmul.f32 %v2102_v25, %v1068_v45 }
  0x3b   : > { %v1046_v54 = vadd.f32 %v1045_v31, %v1036_v34  ;;  %v987_v59 = vadd.f32 %v986_v58, %v977_v43  ;;  %v1125_v60 = vadd.f32 %v1124_v50, %v1115_v53  ;;  %v1075_v12 = vmul.f32 %v2117_v29, %v1068_v45  ;;  %v1178_v58 = vld [vmem:[#allocation2 + $0x92] sm:$0xff] }
  0x3c   : > { %v1888_v3 = vpop.eup %1887  ;;  %1895 = vpow2.f32 %v1719_v36  ;;  %v1154_v19 = vmul.f32 %v2107_v27, %v1078_v56  ;;  %v1085_v22 = vmul.f32 %v2124_v35, %v1078_v56  ;;  %v1165_v17 = vmul.f32 %v2112_v28, %v1158_v0 }
  0x3d   : > { %v596_v63 = vadd.f32 1.0, %v1888_v3  ;;  %v1056_v46 = vadd.f32 %v1055_v40, %v1046_v54  ;;  %v2214_v57 = vadd.f32 %v2155_v41, %v987_v59  ;;  %v1135_v24 = vadd.f32 %v1134_v55, %v1125_v60 }
  0x3e   : > { %v1890_v1 = vpop.eup %1889  ;;  %v1175_v32 = vmul.f32 %v2117_v29, %v1168_v23  ;;  %v1185_v62 = vmul.f32 %v2124_v35, %v1178_v58 }
  0x3f   : > { %1897 = vrcp.f32 %v596_v63  ;;  %v1066_v20 = vadd.f32 %v1065_v2, %v1056_v46  ;;  %v695_v26 = vadd.f32 1.0, %v1890_v1  ;;  %v1737_v25 = vmul.f32 -1.442695, %v2214_v57 }
  0x40   : > { %v1145_v18 = vadd.f32 %v1144_v61, %v1135_v24 }
  0x41   : > { %v1076_v30 = vadd.f32 %v1075_v12, %v1066_v20  ;;  %1899 = vrcp.f32 %v695_v26 }
  0x42   : > { %v1155_v31 = vadd.f32 %v1154_v19, %v1145_v18  ;;  %v1892_v37 = vpop.eup %1891  ;;  %1901 = vpow2.f32 %v1737_v25 }
  0x43   : > { %v1086_v27 = vadd.f32 %v1085_v22, %v1076_v30  ;;  %v794_v33 = vadd.f32 1.0, %v1892_v37 }
  0x44   : > { %v1894_v39 = vpop.eup %1893  ;;  %v1166_v40 = vadd.f32 %v1165_v17, %v1155_v31 }
  0x45   : > { %v500_v42 = vmul.f32 %v1894_v39, %v2165_v51  ;;  %v1087_v44 = vadd.f32 %v2155_v41, %v1086_v27  ;;  %1903 = vrcp.f32 %v794_v33 }
  0x46   : > { %v1176_v28 = vadd.f32 %v1175_v32, %v1166_v40  ;;  %v1896_v47 = vpop.eup %1895 }
  0x47   : > { %501 = vst.msk [vmem:[#allocation3] sm:$0xff] %vm334_vm0, %v500_v42  ;;  %v1755_v48 = vmul.f32 -1.442695, %v1087_v44  ;;  %v893_v34 = vadd.f32 1.0, %v1896_v47 }
  0x48   : > { %v1186_v29 = vadd.f32 %v1185_v62, %v1176_v28 }
  0x49   : > { %v1898_v45 = vpop.eup %1897  ;;  %1905 = vpow2.f32 %v1755_v48 }
  0x4a   : > { %v599_v50 = vmul.f32 %v1898_v45, %v2175_v38  ;;  %1907 = vrcp.f32 %v893_v34  ;;  %v1187_v43 = vadd.f32 %v2155_v41, %v1186_v29  ;;  %v1309_v45 = vld [vmem:[%s2323_s5] sm:$0x3] }
  0x4b   : > { %v1900_v35 = vpop.eup %1899  ;;  %1857 = vmatpush3.msk.msra.mxu1 %vm1315_vm3, %v1309_v45 }
  0x4c   : > { %600 = vst.msk [vmem:[#allocation3 + $0x8] sm:$0xff] %vm334_vm0, %v599_v50  ;;  %v1773_v51 = vmul.f32 -1.442695, %v1187_v43  ;;  %v1902_v53 = vpop.eup %1901  ;;  %v698_v55 = vmul.f32 %v1900_v35, %v2184_v52  ;;  %v1228_v50 = vld [vmem:[%s2322_s4] sm:$0x1] }
  0x4d   : > { %v992_v36 = vadd.f32 1.0, %v1902_v53 }
  0x4e   : > { %1909 = vpow2.f32 %v1773_v51  ;;  %699 = vst.msk [vmem:[#allocation3 + $0x10] sm:$0xff] %vm334_vm0, %v698_v55  ;;  %v2232_v38 = vld [vmem:[#allocation3] sm:$0xff] }
  0x4f   : > { %v1904_v54 = vpop.eup %1903  ;;  %1911 = vrcp.f32 %v992_v36  ;;  %v1204_v52 = vsel %vm334_vm0, %v2232_v38, 0.0 }
  0x50   : > { %v797_v2 = vmul.f32 %v1904_v54, %v2195_v21 }
  0x52   : > { %798 = vst.msk [vmem:[#allocation3 + $0x18] sm:$0xff] %vm334_vm0, %v797_v2 }
  0x53   : > { %v1906_v56 = vpop.eup %1905  ;;  %v2234_v41 = vld [vmem:[#allocation3 + $0x8] sm:$0xff] }
  0x54   : > { %v1908_v3 = vpop.eup %1907  ;;  %v1091_v59 = vadd.f32 1.0, %v1906_v56  ;;  %v1205_v61 = vsel %vm334_vm0, %v2234_v41, 0.0  ;;  %v1411_v56 = vld [vmem:[%s2325_s7] sm:$0xf] }
  0x55   : > { %v896_v60 = vmul.f32 %v1908_v3, %v2205_v49  ;;  %v2242_v21 = vld [vmem:[#allocation3 + $0x10] sm:$0xff]  ;;  %v1206_v12 = vadd.f32 %v1205_v61, %v1204_v52  ;;  %1873 = vmatprep.subr.msk.bf16.mxu0 %vm1431_vm5, %v1411_v56  ;;  %1874 = vmatprep.subr.msk.bf16.mxu1 %vm1431_vm5, %v1411_v56  ;;  %v1433_v3 = vsel %vm1431_vm5, %v1411_v56, 0 }
  0x56   : > { %1913 = vrcp.f32 %v1091_v59  ;;  %v1207_v24 = vsel %vm334_vm0, %v2242_v21, 0.0  ;;  %v1310_v59 = vld [vmem:[%s2324_s6] sm:$0x1] }
  0x57   : > { %897 = vst.msk [vmem:[#allocation3 + $0x20] sm:$0xff] %vm334_vm0, %v896_v60  ;;  %v1208_v1 = vadd.f32 %v1207_v24, %v1206_v12 }
  0x58   : > { %v1910_v63 = vpop.eup %1909 }
  0x59   : > { %v1191_v46 = vadd.f32 1.0, %v1910_v63  ;;  %v1912_v0 = vpop.eup %1911  ;;  %v2247_v19 = vld [vmem:[#allocation3 + $0x18] sm:$0xff] }
  0x5a   : > { %v995_v49 = vmul.f32 %v1912_v0, %v2214_v57  ;;  %v1209_v20 = vsel %vm334_vm0, %v2247_v19, 0.0  ;;  %v1395_v0 = vlaneseq }
  0x5b   : > { %1915 = vrcp.f32 %v1191_v46  ;;  %v1210_v25 = vadd.f32 %v1209_v20, %v1208_v1 }
  0x5c   : > { %996 = vst.msk [vmem:[#allocation3 + $0x28] sm:$0xff] %vm334_vm0, %v995_v49  ;;  %v1396_v24 = vshrl.u32 %v1395_v0, 7 }
  0x5e   : > { %v2252_v22 = vld [vmem:[#allocation3 + $0x20] sm:$0xff]  ;;  %v1397_v49 = vsub.s32 0, %v1396_v24 }
  0x5f   : > { %v1211_v18 = vsel %vm334_vm0, %v2252_v22, 0.0 }
  0x60   : > { %v1914_v23 = vpop.eup %1913  ;;  %v1212_v30 = vadd.f32 %v1211_v18, %v1210_v25 }
  0x61   : > { %v1094_v26 = vmul.f32 %v1914_v23, %v1087_v44 }
  0x63   : > { %1095 = vst.msk [vmem:[#allocation3 + $0x30] sm:$0xff] %vm334_vm0, %v1094_v26  ;;  %v1201_v57 = vld [vmem:[#allocation3 + $0x28] sm:$0xff] }
  0x64   : > { %v1213_v31 = vsel %vm334_vm0, %v1201_v57, 0.0 }
  0x65   : > { %v1916_v17 = vpop.eup %1915  ;;  %v1214_v32 = vadd.f32 %v1213_v31, %v1212_v30 }
  0x66   : > { %v1194_v58 = vmul.f32 %v1916_v17, %v1187_v43 }
  0x68   : > { %1195 = vst.msk [vmem:[#allocation3 + $0x38] sm:$0xff] %vm334_vm0, %v1194_v58 }
  0x6a   : > { %v1202_v37 = vld [vmem:[#allocation3 + $0x30] sm:$0xff] }
  0x6b   : > { %v1215_v27 = vsel %vm334_vm0, %v1202_v37, 0.0 }
  0x6c   : > { %v1216_v39 = vadd.f32 %v1215_v27, %v1214_v32 }
  0x6f   : > { %v1203_v33 = vld [vmem:[#allocation3 + $0x38] sm:$0xff] }
  0x70   : > { %v1217_v40 = vsel %vm334_vm0, %v1203_v33, 0.0 }
  0x71   : > { %v1218_v62 = vadd.f32 %v1217_v40, %v1216_v39 }
  0x73   : > { %v1219_v42 = vrot.slane %v1218_v62, 4 }
  0x75   : > { %v1220_v44 = vadd.f32 %v1219_v42, %v1218_v62 }
  0x77   : > { %v1221_v28 = vrot.slane %v1220_v44, 2 }
  0x79   : > { %v1222_v47 = vadd.f32 %v1221_v28, %v1220_v44 }
  0x7b   : > { %v1223_v48 = vrot.slane %v1222_v47, 1 }
  0x7d   : > { %v1224_v34 = vadd.f32 %v1223_v48, %v1222_v47 }
  0x7f   : > { %v1226_v29 = vmul.f32 0.015625, %v1224_v34 }
  0x81   : > { %1854 = vmatmul.mubr.msk.f32.vlgmr.msra.gmra.mrb[0].mxu0 %vm334_vm0, %v1226_v29 }
  0x82   : > { %1862 = vmatpush3.bf16.msra.mxu0 %v1433_v3 }
 0x154   : > { %v1298_v43 = vpop.f32.mrb[0].mxu0 }
 0x155   : > { %v1299_v35 = vadd.f32 %v1298_v43, %v1228_v50  ;;  %v1855_v51 = vpop.f32.mrb[1].mxu0 }
 0x157   : > { %v1775_v53 = vmul.f32 -1.442695, %v1299_v35 }
 0x159   : > { %1917 = vpow2.f32 %v1775_v53 }
 0x163   : > { %v1918_v55 = vpop.eup %1917 }
 0x164   : > { %v1305_v36 = vadd.f32 1.0, %v1918_v55 }
 0x166   : > { %1919 = vrcp.f32 %v1305_v36 }
 0x170   : > { %v1920_v54 = vpop.eup %1919 }
 0x171   : > { %v1308_v2 = vmul.f32 %v1920_v54, %v1299_v35 }
 0x173   : > { %1859 = vmatmul.mubr.msk.f32.vlgmr.msra.gmra.mrb[0].mxu1 %vm1311_vm4, %v1308_v2 }
 0x174   : > { %1872 = vmatpush3.bf16.msra.mxu1 %v1433_v3 }
 0x246   : > { %v1385_v60 = vpop.f32.mrb[0].mxu1 }
 0x247   : > { %v1386_v52 = vadd.f32 %v1385_v60, %v1310_v59  ;;  %v1860_v61 = vpop.f32.mrb[1].mxu1 }
 0x249   : > { %v1778_v63 = vmul.f32 -1.442695, %v1386_v52 }
 0x24b   : > { %1921 = vpow2.f32 %v1778_v63 }
 0x255   : > { %v1922_v46 = vpop.eup %1921 }
 0x256   : > { %v1392_v12 = vadd.f32 1.0, %v1922_v46 }
 0x258   : > { %1923 = vrcp.f32 %v1392_v12 }
 0x262   : > { %v1924_v1 = vpop.eup %1923 }
 0x263   : > { %v1398_v20 = vrot.slane %v1924_v1, %v1397_v49 }
 0x265   : > { %v1399_v23 = vmul.f32 %v1398_v20, %v2232_v38  ;;  %v1400_v26 = vmul.f32 %v1398_v20, %v2234_v41  ;;  %v1403_v25 = vmul.f32 %v1398_v20, %v2252_v22  ;;  %v1404_v18 = vmul.f32 %v1398_v20, %v1201_v57  ;;  %v1779_v38 = vld [vmem:[%s2326_s8] ss:$0 sm:$0xff] }
 0x266   : > { %v1401_v17 = vmul.f32 %v1398_v20, %v2242_v21  ;;  %v1402_v30 = vmul.f32 %v1398_v20, %v2247_v19  ;;  %v1405_v58 = vmul.f32 %v1398_v20, %v1202_v37  ;;  %v1406_v31 = vmul.f32 %v1398_v20, %v1203_v33 }
 0x267   : > { %v1407_v32 = vpack.c.bf16 %v1400_v26, %v1399_v23  ;;  %v1409_v27 = vpack.c.bf16 %v1404_v18, %v1403_v25 }
 0x268   : > { %v1408_v39 = vpack.c.bf16 %v1402_v30, %v1401_v17  ;;  %v1410_v40 = vpack.c.bf16 %v1406_v31, %v1405_v58 }
 0x269   : > { %1863 = vmatprep.mubr.msk.bf16.mxu0 %vm334_vm0, %v1407_v32  ;;  %1867 = vmatprep.mubr.msk.bf16.mxu1 %vm334_vm0, %v1409_v27 }
 0x26a   : > { %1864 = vmatmul.mubr.msk.bf16.vlgmr.msra.gmra.mrb[4].mxu0 %vm334_vm0, %v1408_v39  ;;  %1868 = vmatmul.mubr.msk.bf16.vlgmr.msra.gmra.mrb[4].mxu1 %vm334_vm0, %v1410_v40 }
 0x33d   : > { %v1865_v41 = vpop.f32.mrb[4].mxu0  ;;  %v1869_v21 = vpop.f32.mrb[4].mxu1 }
 0x33e   : > { %v1478_v19 = vadd.f32 %v1865_v41, %v1779_v38  ;;  %v1494_v22 = vadd.f32 %v1869_v21, %v1779_v38  ;;  %v1469_v57 = vpop.f32.mrb[5].mxu0  ;;  %v1485_v37 = vpop.f32.mrb[5].mxu1 }
 0x33f   : > { %v1470_v33 = vadd.f32 %v1779_v38, %v1469_v57  ;;  %v1486_v62 = vadd.f32 %v1779_v38, %v1485_v37  ;;  %v1866_v42 = vpop.f32.mrb[6].mxu0  ;;  %v1870_v44 = vpop.f32.mrb[6].mxu1 }
 0x340   : > { %v1518_v28 = vadd.f32 %v1810_v9, %v1478_v19  ;;  %v1522_v47 = vadd.f32 %v1818_v15, %v1494_v22  ;;  %v1481_v48 = vadd.f32 %v1866_v42, %v1779_v38  ;;  %v1497_v34 = vadd.f32 %v1870_v44, %v1779_v38  ;;  %v1472_v29 = vpop.f32.mrb[7].mxu0  ;;  %v1488_v45 = vpop.f32.mrb[7].mxu1 }
 0x341   : > { %v1516_v50 = vadd.f32 %v1806_v7, %v1470_v33  ;;  %v1520_v43 = vadd.f32 %v1814_v13, %v1486_v62  ;;  %v1473_v35 = vadd.f32 %v1779_v38, %v1472_v29  ;;  %v1489_v9 = vadd.f32 %v1779_v38, %v1488_v45 }
 0x342   : > { %v1798_v51 = vpack.c.bf16 %v1518_v28, %v1518_v28  ;;  %v1802_v53 = vpack.c.bf16 %v1522_v47, %v1522_v47  ;;  %v1519_v15 = vadd.f32 %v1811_v10, %v1481_v48  ;;  %v1523_v55 = vadd.f32 %v1819_v16, %v1497_v34 }
 0x343   : > { %v1796_v36 = vpack.c.bf16 %v1516_v50, %v1516_v50  ;;  %v1800_v54 = vpack.c.bf16 %v1520_v43, %v1520_v43  ;;  %v1517_v2 = vadd.f32 %v1807_v8, %v1473_v35  ;;  %v1521_v7 = vadd.f32 %v1815_v14, %v1489_v9 }
 0x344   : > { %1559 = vst.msk [vmem:[%s332_s13 + $0x8] sm:$0xf] %vm1556_vm6, %v1798_v51  ;;  %1563 = vst.msk [vmem:[%s332_s13 + $0x18] sm:$0xf] %vm1556_vm6, %v1802_v53  ;;  %v1799_v13 = vpack.c.bf16 %v1519_v15, %v1519_v15  ;;  %v1803_v56 = vpack.c.bf16 %v1523_v55, %v1523_v55 }
 0x345   : > { %1557 = vst.msk [vmem:[%s332_s13] sm:$0xf] %vm1556_vm6, %v1796_v36  ;;  %1561 = vst.msk [vmem:[%s332_s13 + $0x10] sm:$0xf] %vm1556_vm6, %v1800_v54  ;;  %v1797_v5 = vpack.c.bf16 %v1517_v2, %v1517_v2  ;;  %v1801_v10 = vpack.c.bf16 %v1521_v7, %v1521_v7 }
 0x346   : > { %1560 = vst.msk [vmem:[%s332_s13 + $0xc] sm:$0xf] %vm1556_vm6, %v1799_v13  ;;  %1564 = vst.msk [vmem:[%s332_s13 + $0x1c] sm:$0xf] %vm1556_vm6, %v1803_v56 }
 0x347   : > { %1558 = vst.msk [vmem:[%s332_s13 + $0x4] sm:$0xf] %vm1556_vm6, %v1797_v5  ;;  %1562 = vst.msk [vmem:[%s332_s13 + $0x14] sm:$0xf] %vm1556_vm6, %v1801_v10 }
 0x348 PF: > { %s19_s30 = sadd.s32 1, %s1931_s30  }
 0x349   : > { %p16_p4 = scmp.ge.s32.totalorder %s19_s30, 4  }
 0x34b   :  { %18 = sbr.rel (!%p16_p4) target bundleno = 1 (0x1), region = 103 }

</bundles_post_ra>
